<compile_context>
chip_gen: v6e
topology: v6e:2x2x1
jax: 0.10.0
libtpu: 0.0.40
codegen_flags: <defaults>
</compile_context>

<pallas_src>
import math

import jax
import jax.numpy as jnp
from jax.experimental import pallas as pl
from jax.experimental.pallas import tpu as pltpu

D_IN, H1, H2 = 6144, 256, 512


def _round_up(n, m):
    return ((n + m - 1) // m) * m


def _mlp_kernel(x_ref, w1_ref, b1_ref, w2_ref, b2_ref, w3_ref, sc_ref, o_ref):
    # x arrives as the original f32 rows; cast to bf16 on-chip (VPU) so HBM
    # only ever sees the single f32 read (no separate convert/pad pass).
    x = x_ref[...].astype(jnp.bfloat16)                       # [TB, 6144] bf16

    # Linear(6144 -> 256) + ReLU  (bf16 MXU, f32 accumulation)
    h1 = jnp.dot(x, w1_ref[...], preferred_element_type=jnp.float32)
    h1 = jnp.maximum(h1 + b1_ref[...], 0.0)                   # [TB, 256] f32

    # Linear(256 -> 512) + ReLU
    h2 = jnp.dot(h1.astype(jnp.bfloat16), w2_ref[...],
                 preferred_element_type=jnp.float32)
    h2 = jnp.maximum(h2 + b2_ref[...], 0.0)                   # [TB, 512] f32

    # Linear(512 -> 1) + ReLU: VPU multiply + lane reduction instead of an
    # N=1 matmul that would use only 1/256 of the MXU columns.
    h3 = jnp.sum(h2 * w3_ref[...], axis=-1, keepdims=True) + sc_ref[0]
    h3 = jnp.maximum(h3, 0.0)                                 # [TB, 1]

    # Linear(1 -> 1) + Sigmoid (scalar affine, scalars read from SMEM).
    d = h3 * sc_ref[1] + sc_ref[2]
    o_ref[...] = 1.0 / (1.0 + jnp.exp(-d))


def latent_discriminator_forward(x, params, *, tb=512):
    """x: [B, 2048, 3] float32 -> [B, 1] float32."""
    B = x.shape[0]
    x_flat = x.reshape(B, -1).astype(jnp.float32)             # [B, 6144] (torch Flatten)
    assert x_flat.shape[1] == D_IN
    w1, b1, w2, b2, w3, b3, w4, b4 = params

    # Batch tiling.  B <= tb: one full-extent tile (no pad at all — a block
    # dim equal to the full array dim is always legal).  B > tb: balance the
    # tiles so tail padding is at most 7 rows instead of up to a full tile.
    if B <= tb:
        TB, B_pad = B, B
    else:
        b8 = _round_up(B, 8)                                  # f32 sublane tiling
        n_tiles = -(-b8 // tb)
        TB = _round_up(-(-b8 // n_tiles), 8)
        B_pad = TB * n_tiles
    if B_pad != B:
        # Padded rows are independent garbage; sliced off below.
        x_flat = jnp.pad(x_flat, ((0, B_pad - B), (0, 0)))

    grid = (B_pad // TB,)

    # Weights are converted once (small, one-off); activations are NOT.
    w1b = w1.astype(jnp.bfloat16)
    w2b = w2.astype(jnp.bfloat16)
    w3_row = w3.reshape(1, H2).astype(jnp.float32)            # [1, 512]
    scalars = jnp.array([b3[0, 0], w4[0, 0], b4[0, 0]], dtype=jnp.float32)

    # Constant (grid-invariant) operands: single-buffered, VMEM-resident.
    def _const_spec(shape):
        return pl.BlockSpec(shape, lambda i: (0, 0), pipeline_mode=pl.Buffered(1))

    # VMEM budget (explicit: v5e default scoped VMEM is only 16 MiB).
    x_bufs = 2 if grid[0] > 1 else 1
    vmem_est = (x_bufs * TB * D_IN * 4            # streamed f32 x tile(s)
                + (D_IN * H1 + H1 * H2) * 2       # resident bf16 weights (1 buf)
                + TB * D_IN * 2                   # in-kernel bf16 copy of x
                + TB * (H1 + H2) * 4              # f32 intermediates
                + 2 * TB * 128 * 4                # (lane-padded) output tile x2
                + (2 << 20))                      # misc headroom
    vmem_limit = max(32 << 20, min(int(vmem_est * 1.2), 100 << 20))

    out = pl.pallas_call(
        _mlp_kernel,
        out_shape=jax.ShapeDtypeStruct((B_pad, 1), jnp.float32),
        grid=grid,
        in_specs=[
            pl.BlockSpec((TB, D_IN), lambda i: (i, 0)),       # x tile (streamed, f32)
            _const_spec((D_IN, H1)),                          # w1 bf16 (resident)
            _const_spec((1, H1)),                             # b1
            _const_spec((H1, H2)),                            # w2 bf16 (resident)
            _const_spec((1, H2)),                             # b2
            _const_spec((1, H2)),                             # w3 as a row
            pl.BlockSpec(memory_space=pltpu.MemorySpace.SMEM),  # [b3, w4, b4]
        ],
        out_specs=pl.BlockSpec((TB, 1), lambda i: (i, 0)),
        compiler_params=pltpu.CompilerParams(
            dimension_semantics=("parallel",),
            vmem_limit_bytes=vmem_limit,
        ),
    )(x_flat, w1b, b1, w2b, b2, w3_row, scalars)

    return out[:B]


def init_params(key):
    """Deterministic init mimicking PyTorch nn.Linear default (uniform +-1/sqrt(fan_in)).

    Weights are stored as [in_features, out_features]; biases as [1, out_features].
    """
    dims = [(D_IN, H1), (H1, H2), (H2, 1), (1, 1)]
    params = []
    for (fan_in, fan_out) in dims:
        key, kw, kb = jax.random.split(key, 3)
        bound = 1.0 / math.sqrt(fan_in)
        w = jax.random.uniform(kw, (fan_in, fan_out), jnp.float32, -bound, bound)
        b = jax.random.uniform(kb, (1, fan_out), jnp.float32, -bound, bound)
        params += [w, b]
    return tuple(params)


def reference_forward(x, params):
    """Pure-JAX reference.

    NOTE: this intentionally mirrors the kernel's mixed-precision numerics
    (bf16 x / bf16 weights on the MXU, f32 accumulation), so it validates the
    kernel implementation rather than a pure-f32 PyTorch run; a full-f32
    reference would differ by bf16 rounding (~1e-2 relative on activations).
    """
    w1, b1, w2, b2, w3, b3, w4, b4 = params
    h = x.reshape(x.shape[0], -1).astype(jnp.bfloat16)
    h = jnp.maximum(
        jnp.dot(h, w1.astype(jnp.bfloat16), preferred_element_type=jnp.float32) + b1,
        0.0)
    h = jnp.maximum(
        jnp.dot(h.astype(jnp.bfloat16), w2.astype(jnp.bfloat16),
                preferred_element_type=jnp.float32) + b2,
        0.0)
    h = jnp.maximum(h @ w3 + b3, 0.0)
    h = h * w4[0, 0] + b4[0, 0]
    return jax.nn.sigmoid(h)


if __name__ == "__main__":
    key = jax.random.PRNGKey(0)
    key, kx = jax.random.split(key)

    B = 2
    x = jax.random.normal(kx, (B, 2048, 3), dtype=jnp.float32)
    params = init_params(key)

    out = latent_discriminator_forward(x, params)
    out = jax.block_until_ready(out)

    ref = reference_forward(x, params)
    assert out.shape == (B, 1), out.shape
    assert jnp.allclose(out, ref, atol=2e-4, rtol=2e-4), (out, ref)

    print("KERNEL_OK")
</pallas_src>

<mosaic_0001>
module attributes {stable_mosaic.version = 11 : i64} {
  func.func @_mlp_kernel(%arg0: i32, %arg1: memref<2x6144xf32, #tpu.memory_space<vmem>>, %arg2: memref<6144x256xbf16, #tpu.memory_space<vmem>>, %arg3: memref<1x256xf32, #tpu.memory_space<vmem>>, %arg4: memref<256x512xbf16, #tpu.memory_space<vmem>>, %arg5: memref<1x512xf32, #tpu.memory_space<vmem>>, %arg6: memref<1x512xf32, #tpu.memory_space<vmem>>, %arg7: memref<3xf32, #tpu.memory_space<smem>>, %arg8: memref<2x1xf32, #tpu.memory_space<vmem>>) attributes {dimension_semantics = [#tpu.dimension_semantics<parallel>], iteration_bounds = array<i64: 1>, scalar_prefetch = 0 : i64, scratch_operands = 0 : i64, tpu.core_type = #tpu.core_type<tc>, window_params = [{transform_indices = @transform_0, window_bounds = array<i64: 2, 6144>}, {pipeline_mode = #tpu.pipeline_mode<synchronous>, transform_indices = @transform_1, window_bounds = array<i64: 6144, 256>}, {pipeline_mode = #tpu.pipeline_mode<synchronous>, transform_indices = @transform_2, window_bounds = array<i64: 1, 256>}, {pipeline_mode = #tpu.pipeline_mode<synchronous>, transform_indices = @transform_3, window_bounds = array<i64: 256, 512>}, {pipeline_mode = #tpu.pipeline_mode<synchronous>, transform_indices = @transform_4, window_bounds = array<i64: 1, 512>}, {pipeline_mode = #tpu.pipeline_mode<synchronous>, transform_indices = @transform_5, window_bounds = array<i64: 1, 512>}, {transform_indices = @transform_6, window_bounds = array<i64: 3>}, {transform_indices = @transform_7, window_bounds = array<i64: 2, 1>}]} {
    %c0 = arith.constant 0 : index
    %c0_0 = arith.constant 0 : index
    %0 = vector.load %arg1[%c0, %c0_0] : memref<2x6144xf32, #tpu.memory_space<vmem>>, vector<2x6144xf32>
    %1 = arith.truncf %0 : vector<2x6144xf32> to vector<2x6144xbf16>
    %c0_1 = arith.constant 0 : index
    %c0_2 = arith.constant 0 : index
    %2 = vector.load %arg2[%c0_1, %c0_2] : memref<6144x256xbf16, #tpu.memory_space<vmem>>, vector<6144x256xbf16>
    %cst = arith.constant dense<0.000000e+00> : vector<2x256xf32>
    %3 = tpu.matmul %1, %2, %cst {dimension_numbers = #tpu.dot_dimension_numbers<[1], [0], [0], [1], [0, 0, 1, 1], [], []>} : vector<2x6144xbf16>, vector<6144x256xbf16>, vector<2x256xf32> -> vector<2x256xf32>
    %c0_3 = arith.constant 0 : index
    %c0_4 = arith.constant 0 : index
    %4 = vector.load %arg3[%c0_3, %c0_4] : memref<1x256xf32, #tpu.memory_space<vmem>>, vector<1x256xf32>
    %5 = vector.broadcast %4 : vector<1x256xf32> to vector<2x256xf32>
    %6 = arith.addf %3, %5 : vector<2x256xf32>
    %cst_5 = arith.constant 0.000000e+00 : f32
    %7 = vector.broadcast %cst_5 : f32 to vector<2x256xf32>
    %8 = arith.maximumf %6, %7 : vector<2x256xf32>
    %9 = arith.truncf %8 : vector<2x256xf32> to vector<2x256xbf16>
    %c0_6 = arith.constant 0 : index
    %c0_7 = arith.constant 0 : index
    %10 = vector.load %arg4[%c0_6, %c0_7] : memref<256x512xbf16, #tpu.memory_space<vmem>>, vector<256x512xbf16>
    %cst_8 = arith.constant dense<0.000000e+00> : vector<2x512xf32>
    %11 = tpu.matmul %9, %10, %cst_8 {dimension_numbers = #tpu.dot_dimension_numbers<[1], [0], [0], [1], [0, 0, 1, 1], [], []>} : vector<2x256xbf16>, vector<256x512xbf16>, vector<2x512xf32> -> vector<2x512xf32>
    %c0_9 = arith.constant 0 : index
    %c0_10 = arith.constant 0 : index
    %12 = vector.load %arg5[%c0_9, %c0_10] : memref<1x512xf32, #tpu.memory_space<vmem>>, vector<1x512xf32>
    %13 = vector.broadcast %12 : vector<1x512xf32> to vector<2x512xf32>
    %14 = arith.addf %11, %13 : vector<2x512xf32>
    %cst_11 = arith.constant 0.000000e+00 : f32
    %15 = vector.broadcast %cst_11 : f32 to vector<2x512xf32>
    %16 = arith.maximumf %14, %15 : vector<2x512xf32>
    %c0_12 = arith.constant 0 : index
    %c0_13 = arith.constant 0 : index
    %17 = vector.load %arg6[%c0_12, %c0_13] : memref<1x512xf32, #tpu.memory_space<vmem>>, vector<1x512xf32>
    %18 = vector.broadcast %17 : vector<1x512xf32> to vector<2x512xf32>
    %19 = arith.mulf %16, %18 : vector<2x512xf32>
    %cst_14 = arith.constant dense<0.000000e+00> : vector<2xf32>
    %20 = vector.multi_reduction <add>, %19, %cst_14 [1] : vector<2x512xf32> to vector<2xf32>
    %21 = vector.shape_cast %20 : vector<2xf32> to vector<2x1xf32>
    %c0_15 = arith.constant 0 : index
    %22 = memref.load %arg7[%c0_15] : memref<3xf32, #tpu.memory_space<smem>>
    %23 = vector.broadcast %22 : f32 to vector<2x1xf32>
    %24 = arith.addf %21, %23 : vector<2x1xf32>
    %cst_16 = arith.constant 0.000000e+00 : f32
    %25 = vector.broadcast %cst_16 : f32 to vector<2x1xf32>
    %26 = arith.maximumf %24, %25 : vector<2x1xf32>
    %c1 = arith.constant 1 : index
    %27 = memref.load %arg7[%c1] : memref<3xf32, #tpu.memory_space<smem>>
    %28 = vector.broadcast %27 : f32 to vector<2x1xf32>
    %29 = arith.mulf %26, %28 : vector<2x1xf32>
    %c2 = arith.constant 2 : index
    %30 = memref.load %arg7[%c2] : memref<3xf32, #tpu.memory_space<smem>>
    %31 = vector.broadcast %30 : f32 to vector<2x1xf32>
    %32 = arith.addf %29, %31 : vector<2x1xf32>
    %cst_17 = arith.constant 0.000000e+00 : f32
    %33 = vector.broadcast %cst_17 : f32 to vector<2x1xf32>
    %34 = arith.subf %33, %32 : vector<2x1xf32>
    %35 = math.exp %34 : vector<2x1xf32>
    %cst_18 = arith.constant 1.000000e+00 : f32
    %36 = vector.broadcast %cst_18 : f32 to vector<2x1xf32>
    %37 = arith.addf %36, %35 : vector<2x1xf32>
    %cst_19 = arith.constant 1.000000e+00 : f32
    %38 = vector.broadcast %cst_19 : f32 to vector<2x1xf32>
    %39 = arith.divf %38, %37 : vector<2x1xf32>
    %c0_20 = arith.constant 0 : index
    %c0_21 = arith.constant 0 : index
    %40 = vector.load %arg8[%c0_20, %c0_21] : memref<2x1xf32, #tpu.memory_space<vmem>>, vector<2x1xf32>
    tpu.vector_store %arg8[%c0_20, %c0_21], %39 {strides = array<i32>} : memref<2x1xf32, #tpu.memory_space<vmem>>, vector<2x1xf32>,
    return
  }
  func.func @transform_0(%arg0: i32) -> (i32, i32) {
    %c0_i32 = arith.constant 0 : i32
    %c0_i32_0 = arith.constant 0 : i32
    return %arg0, %c0_i32 : i32, i32
  }
  func.func @transform_1(%arg0: i32) -> (i32, i32) {
    %c0_i32 = arith.constant 0 : i32
    %c0_i32_0 = arith.constant 0 : i32
    %c0_i32_1 = arith.constant 0 : i32
    return %c0_i32, %c0_i32_0 : i32, i32
  }
  func.func @transform_2(%arg0: i32) -> (i32, i32) {
    %c0_i32 = arith.constant 0 : i32
    %c0_i32_0 = arith.constant 0 : i32
    %c0_i32_1 = arith.constant 0 : i32
    return %c0_i32, %c0_i32_0 : i32, i32
  }
  func.func @transform_3(%arg0: i32) -> (i32, i32) {
    %c0_i32 = arith.constant 0 : i32
    %c0_i32_0 = arith.constant 0 : i32
    %c0_i32_1 = arith.constant 0 : i32
    return %c0_i32, %c0_i32_0 : i32, i32
  }
  func.func @transform_4(%arg0: i32) -> (i32, i32) {
    %c0_i32 = arith.constant 0 : i32
    %c0_i32_0 = arith.constant 0 : i32
    %c0_i32_1 = arith.constant 0 : i32
    return %c0_i32, %c0_i32_0 : i32, i32
  }
  func.func @transform_5(%arg0: i32) -> (i32, i32) {
    %c0_i32 = arith.constant 0 : i32
    %c0_i32_0 = arith.constant 0 : i32
    %c0_i32_1 = arith.constant 0 : i32
    return %c0_i32, %c0_i32_0 : i32, i32
  }
  func.func @transform_6(%arg0: i32) -> i32 {
    %c0_i32 = arith.constant 0 : i32
    %c0_i32_0 = arith.constant 0 : i32
    return %c0_i32 : i32
  }
  func.func @transform_7(%arg0: i32) -> (i32, i32) {
    %c0_i32 = arith.constant 0 : i32
    %c0_i32_0 = arith.constant 0 : i32
    return %arg0, %c0_i32 : i32, i32
  }
}

</mosaic_0001>

<bundles_post_ra>
// kernel: tpu_custom_call.1
= control target key start
LH: loop header
LB: loop body
LE: loop exit
PB: predicated region body
PF: predicated region fallthrough
CT: control target
= control target key end

     0   :  { %12 = vsyncpa [#allocation3], 0  ;;  %s9151_s0 = inlined_call_operand.hbm [shape: f32[2,6144], index: 0, kind: input, shape index: {}]   ;;  %s9152_s1 = inlined_call_operand.hbm [shape: bf16[6144,256], index: 1, kind: input, shape index: {}]   ;;  %s9153_s2 = inlined_call_operand.hbm [shape: f32[1,256], index: 2, kind: input, shape index: {}]   ;;  %s9154_s3 = inlined_call_operand.hbm [shape: bf16[256,512], index: 3, kind: input, shape index: {}]   ;;  %s9155_s4 = inlined_call_operand.hbm [shape: f32[1,512], index: 4, kind: input, shape index: {}]   ;;  %s9156_s5 = inlined_call_operand.hbm [shape: f32[1,512], index: 5, kind: input, shape index: {}]   ;;  %s9157_s6 = inlined_call_operand.hbm [shape: f32[3], index: 6, kind: input, shape index: {}]   ;;  %s9158_s7 = inlined_call_operand.vmem [shape: f32[2,1], index: 7, kind: output, shape index: {}]  }
   0x1   :  { %13 = vsyncpa [#allocation6], 0 }
   0x2   :  { %14 = vsyncpa [#allocation9], 0 }
   0x3   :  { %15 = vsyncpa [#allocation12], 0 }
   0x4   :  { %16 = vsyncpa [#allocation4], 0  ;;  %s8846_s24 = smov [#allocation5]  }
   0x5   :  { %s32_s25 = sshll.u32 %s8846_s24, 4  ;;  %s33_s25 = int_to_ptr.vmem [resolvable:$true] %s32_s25 }
   0x6   :  { %s8716_s26 = scalar_lea.vmem %s33_s25, 98304  ;;  %p8721_p1 = scmp.lt.s32.totalorder %s33_s25, %s33_s25 }
   0x7   :  { %p8717_p0 = scmp.ne.s32.totalorder %s33_s25, %s8716_s26  ;;  %p8722_p2 = scmp.lt.s32.totalorder %s8716_s26, %s8716_s26 }
   0x9   :  { %p8723_p3 = por %p8722_p2, %p8721_p1 }
   0xb   :  { %p8724_p4 = pnand %p8723_p3, %p8717_p0 }
   0xd   :  { %8727 = shalt.err (!%p8724_p4)
}
   0xe   :  { %s8847_s27 = smov 128   ;;  %s8848_s28 = smov 8  }
   0xf   :  { %38 = dma.hbm_to_vmem [thread:$0]  %s9152_s1, 98304, %s33_s25, [#allocation6], %s8847_s27, %s8847_s27, %s8848_s28  }
  0x10   :  { %s8849_s8 = smov [#allocation8]  }
  0x11   :  { %s54_s9 = sshll.u32 %s8849_s8, 4  ;;  %s55_s9 = int_to_ptr.vmem [resolvable:$true] %s54_s9 }
  0x12   :  { %s8736_s10 = scalar_lea.vmem %s55_s9, 8192  ;;  %p8741_p6 = scmp.lt.s32.totalorder %s55_s9, %s55_s9 }
  0x13   :  { %p8737_p5 = scmp.ne.s32.totalorder %s55_s9, %s8736_s10  ;;  %p8742_p7 = scmp.lt.s32.totalorder %s8736_s10, %s8736_s10 }
  0x15   :  { %p8743_p8 = por %p8742_p7, %p8741_p6 }
  0x17   :  { %p8744_p9 = pnand %p8743_p8, %p8737_p5 }
  0x19   :  { %8747 = shalt.err (!%p8744_p9)
}
  0x1a   :  { %s8850_s11 = smov 256   ;;  %s8851_s12 = smov 16  }
  0x1b   :  { %60 = dma.hbm_to_vmem [thread:$0]  %s9154_s3, 8192, %s55_s9, [#allocation9], %s8850_s11, %s8850_s11, %s8851_s12  }
  0x1c   :  { %s8852_s15 = smov [#allocation2]   ;;  %s8853_s17 = smov [#allocation7]  }
  0x1d   :  { %s23_s16 = sshll.u32 %s8852_s15, 4  ;;  %s45_s1 = sshll.u32 %s8853_s17, 4  ;;  %s24_s16 = int_to_ptr.vmem [resolvable:$true] %s23_s16  ;;  %s46_s1 = int_to_ptr.vmem [resolvable:$true] %s45_s1 }
  0x1e   :  { %s8756_s18 = scalar_lea.vmem %s24_s16, 1536  ;;  %p8761_p11 = scmp.lt.s32.totalorder %s24_s16, %s24_s16 }
  0x1f   :  { %p8757_p10 = scmp.ne.s32.totalorder %s24_s16, %s8756_s18  ;;  %p8762_p12 = scmp.lt.s32.totalorder %s8756_s18, %s8756_s18 }
  0x21   :  { %p8763_p13 = por %p8762_p12, %p8761_p11 }
  0x23   :  { %p8764_p0 = pnand %p8763_p13, %p8757_p10 }
  0x25   :  { %8767 = shalt.err (!%p8764_p0)
}
  0x26   :  { %26 = dma.hbm_to_vmem [thread:$0]  %s9151_s0, 1536, %s24_s16, [#allocation3]  }
  0x27   :  { %s8776_s21 = scalar_lea.vmem %s46_s1, 32  ;;  %p8781_p2 = scmp.lt.s32.totalorder %s46_s1, %s46_s1 }
  0x28   :  { %p8777_p1 = scmp.ne.s32.totalorder %s46_s1, %s8776_s21  ;;  %p8782_p3 = scmp.lt.s32.totalorder %s8776_s21, %s8776_s21 }
  0x2a   :  { %p8783_p4 = por %p8782_p3, %p8781_p2 }
  0x2c   :  { %p8784_p5 = pnand %p8783_p4, %p8777_p1 }
  0x2e   :  { %8787 = shalt.err (!%p8784_p5)
}
  0x2f   :  { %48 = dma.hbm_to_vmem [thread:$0]  %s9153_s2, 32, %s46_s1, [#allocation6]  }
  0x30   :  { %s8854_s23 = smov [#allocation10]   ;;  %s8855_s25 = smov [#allocation11]  }
  0x31   :  { %s67_s24 = sshll.u32 %s8854_s23, 4  ;;  %s77_s26 = sshll.u32 %s8855_s25, 4  ;;  %s68_s24 = int_to_ptr.vmem [resolvable:$true] %s67_s24  ;;  %s78_s26 = int_to_ptr.vmem [resolvable:$true] %s77_s26 }
  0x32   :  { %s8796_s27 = scalar_lea.vmem %s68_s24, 64  ;;  %p8801_p7 = scmp.lt.s32.totalorder %s68_s24, %s68_s24 }
  0x33   :  { %p8797_p6 = scmp.ne.s32.totalorder %s68_s24, %s8796_s27  ;;  %p8802_p8 = scmp.lt.s32.totalorder %s8796_s27, %s8796_s27 }
  0x35   :  { %p8803_p9 = por %p8802_p8, %p8801_p7 }
  0x37   :  { %p8804_p10 = pnand %p8803_p9, %p8797_p6 }
  0x39   :  { %8807 = shalt.err (!%p8804_p10)
}
  0x3a   :  { %70 = dma.hbm_to_vmem [thread:$0]  %s9155_s4, 64, %s68_s24, [#allocation9]  }
  0x3b   :  { %s8816_s29 = scalar_lea.vmem %s78_s26, 64  ;;  %p8821_p12 = scmp.lt.s32.totalorder %s78_s26, %s78_s26 }
  0x3c   :  { %p8817_p11 = scmp.ne.s32.totalorder %s78_s26, %s8816_s29  ;;  %p8822_p13 = scmp.lt.s32.totalorder %s8816_s29, %s8816_s29 }
  0x3e   :  { %p8823_p0 = por %p8822_p13, %p8821_p12 }
  0x40   :  { %p8824_p1 = pnand %p8823_p0, %p8817_p11 }
  0x42   :  { %8827 = shalt.err (!%p8824_p1)
}
  0x43   :  { %80 = dma.hbm_to_vmem [thread:$0]  %s9156_s5, 64, %s78_s26, [#allocation12]  }
  0x44   :  { %s8856_s8 = smov [#allocation13]  }
  0x45   :  { %88 = dma.hbm_to_smem %s9157_s6, 16, %s8856_s8, [#allocation4]  }
  0x46   :  { %8836 = dma.done.wait [#allocation3], 1536  }
  0x47   :  { %8837 = vsyncadd [#allocation3], 4294965760 }
  0x48   :  { %8838 = dma.done.wait [#allocation6], 98336  }
  0x49   :  { %8839 = vsyncadd [#allocation6], 4294868960 }
  0x4a   :  { %8840 = dma.done.wait [#allocation9], 8256  }
  0x4b   :  { %8841 = vsyncadd [#allocation9], 4294959040 }
  0x4c   :  { %8842 = dma.done.wait [#allocation12], 64  }
  0x4d   :  { %8843 = vsyncadd [#allocation12], 4294967232 }
  0x4e   :  { %8844 = dma.done.wait [#allocation4], 16  }
  0x4f   :  { %8845 = vsyncadd [#allocation4], 4294967280 }
  0x50   :  { %110 = sfence }
  0x51   :  { %v7444_v0 = vld [vmem:[#allocation5 + $0x74] ss:$8 sps:$4 sm:$0xff]   ;;  %v7448_v2 = vld [vmem:[#allocation5 + $0x70] ss:$8 sps:$4 sm:$0xff]   ;;  %v7450_v4 = vld [vmem:[#allocation5 + $0x64] ss:$8 sps:$4 sm:$0xff]   ;;  %v139_v38 = vlaneseq }
  0x52   :  { %v7446_v1 = vld [vmem:[#allocation5 + $0x174] ss:$8 sps:$4 sm:$0xff]   ;;  %5055 = vmatprep.subr.bf16.mxu0 %v7444_v0  ;;  %v7449_v3 = vld [vmem:[#allocation5 + $0x170] ss:$8 sps:$4 sm:$0xff]   ;;  %v7452_v5 = vld [vmem:[#allocation5 + $0x164] ss:$8 sps:$4 sm:$0xff]  }
  0x53   :  { %5096 = vmatprep.subr.bf16.mxu1 %v7446_v1  ;;  %5056 = vmatpush1.bf16.msra.mxu0 %v7448_v2  ;;  %v7454_v6 = vld [vmem:[#allocation5 + $0x60] ss:$8 sps:$4 sm:$0xff]   ;;  %v7456_v8 = vld [vmem:[#allocation5 + $0x54] ss:$8 sps:$4 sm:$0xff]   ;;  %v7460_v10 = vld [vmem:[#allocation5 + $0x50] ss:$8 sps:$4 sm:$0xff]  }
  0x54   :  { %5097 = vmatpush1.bf16.msra.mxu1 %v7449_v3  ;;  %5057 = vmatprep.subr.bf16.mxu0 %v7450_v4  ;;  %v7455_v7 = vld [vmem:[#allocation5 + $0x160] ss:$8 sps:$4 sm:$0xff]   ;;  %v7458_v9 = vld [vmem:[#allocation5 + $0x154] ss:$8 sps:$4 sm:$0xff]   ;;  %v7461_v11 = vld [vmem:[#allocation5 + $0x150] ss:$8 sps:$4 sm:$0xff]  }
  0x55   :  { %5098 = vmatprep.subr.bf16.mxu1 %v7452_v5  ;;  %v7462_v12 = vld [vmem:[#allocation5 + $0x44] ss:$8 sps:$4 sm:$0xff]   ;;  %v7466_v14 = vld [vmem:[#allocation5 + $0x40] ss:$8 sps:$4 sm:$0xff]   ;;  %v7468_v16 = vld [vmem:[#allocation5 + $0x34] ss:$8 sps:$4 sm:$0xff]  }
  0x56   :  { %v7464_v13 = vld [vmem:[#allocation5 + $0x144] ss:$8 sps:$4 sm:$0xff]   ;;  %v7467_v15 = vld [vmem:[#allocation5 + $0x140] ss:$8 sps:$4 sm:$0xff]   ;;  %v7470_v17 = vld [vmem:[#allocation5 + $0x134] ss:$8 sps:$4 sm:$0xff]  }
  0x57   :  { %5058 = vmatpush1.bf16.msra.mxu0 %v7454_v6  ;;  %v7472_v18 = vld [vmem:[#allocation5 + $0x30] ss:$8 sps:$4 sm:$0xff]   ;;  %v7474_v20 = vld [vmem:[#allocation5 + $0x24] ss:$8 sps:$4 sm:$0xff]   ;;  %v7478_v22 = vld [vmem:[#allocation5 + $0x20] ss:$8 sps:$4 sm:$0xff]  }
  0x58   :  { %5099 = vmatpush1.bf16.msra.mxu1 %v7455_v7  ;;  %5059 = vmatprep.subr.bf16.mxu0 %v7456_v8  ;;  %v7473_v19 = vld [vmem:[#allocation5 + $0x130] ss:$8 sps:$4 sm:$0xff]   ;;  %v7476_v21 = vld [vmem:[#allocation5 + $0x124] ss:$8 sps:$4 sm:$0xff]   ;;  %v7479_v23 = vld [vmem:[#allocation5 + $0x120] ss:$8 sps:$4 sm:$0xff]  }
  0x59   :  { %5100 = vmatprep.subr.bf16.mxu1 %v7458_v9  ;;  %v7480_v24 = vld [vmem:[#allocation5 + $0x14] ss:$8 sps:$4 sm:$0xff]   ;;  %v7484_v26 = vld [vmem:[#allocation5 + $0x10] ss:$8 sps:$4 sm:$0xff]   ;;  %v7486_v28 = vld [vmem:[#allocation5 + $0x4] ss:$8 sps:$4 sm:$0xff]  }
  0x5a   :  { %v7482_v25 = vld [vmem:[#allocation5 + $0x114] ss:$8 sps:$4 sm:$0xff]   ;;  %v7485_v27 = vld [vmem:[#allocation5 + $0x110] ss:$8 sps:$4 sm:$0xff]   ;;  %v7488_v29 = vld [vmem:[#allocation5 + $0x104] ss:$8 sps:$4 sm:$0xff]  }
  0x5b   :  { %5060 = vmatpush1.bf16.msra.mxu0 %v7460_v10  ;;  %v7490_v30 = vld [vmem:[#allocation5] ss:$8 sps:$4 sm:$0xff]   ;;  %v7492_v32 = vld [vmem:[#allocation5 + $0xf4] ss:$8 sps:$4 sm:$0xff]   ;;  %v7496_v34 = vld [vmem:[#allocation5 + $0xf0] ss:$8 sps:$4 sm:$0xff]  }
  0x5c   :  { %5101 = vmatpush1.bf16.msra.mxu1 %v7461_v11  ;;  %5061 = vmatprep.subr.bf16.mxu0 %v7462_v12  ;;  %v7491_v31 = vld [vmem:[#allocation5 + $0x100] ss:$8 sps:$4 sm:$0xff]   ;;  %v7494_v33 = vld [vmem:[#allocation5 + $0x1f4] ss:$8 sps:$4 sm:$0xff]   ;;  %v7497_v35 = vld [vmem:[#allocation5 + $0x1f0] ss:$8 sps:$4 sm:$0xff]  }
  0x5d   :  { %5102 = vmatprep.subr.bf16.mxu1 %v7464_v13  ;;  %v8857_v36 = vmov 1983009808   ;;  %v7498_v39 = vld [vmem:[#allocation5 + $0xe4] ss:$8 sps:$4 sm:$0xff]   ;;  %v7502_v41 = vld [vmem:[#allocation5 + $0xe0] ss:$8 sps:$4 sm:$0xff]  }
  0x5e   :  { %v137_v37 = vunpack.c.l.s4 %v8857_v36  ;;  %v7500_v40 = vld [vmem:[#allocation5 + $0x1e4] ss:$8 sps:$4 sm:$0xff]   ;;  %v8919_v43 = vshrl.u32 %v139_v38, 7  ;;  %v7503_v44 = vld [vmem:[#allocation5 + $0x1e0] ss:$8 sps:$4 sm:$0xff]   ;;  %vm6561_vm0 = vcmask 1041408  }
  0x5f   :  { %5062 = vmatpush1.bf16.msra.mxu0 %v7466_v14  ;;  %v7504_v45 = vld [vmem:[#allocation5 + $0xd4] ss:$8 sps:$4 sm:$0xff]   ;;  %v7508_v47 = vld [vmem:[#allocation5 + $0xd0] ss:$8 sps:$4 sm:$0xff]   ;;  %v7510_v50 = vld [vmem:[#allocation5 + $0xc4] ss:$8 sps:$4 sm:$0xff]  }
  0x60   :  { %5103 = vmatpush1.bf16.msra.mxu1 %v7467_v15  ;;  %5063 = vmatprep.subr.bf16.mxu0 %v7468_v16  ;;  %v138_v42 = vunpack.c.0.s8 %v137_v37  ;;  %v7506_v46 = vld [vmem:[#allocation5 + $0x1d4] ss:$8 sps:$4 sm:$0xff]   ;;  %v7509_v48 = vld [vmem:[#allocation5 + $0x1d0] ss:$8 sps:$4 sm:$0xff]   ;;  %v7512_v51 = vld [vmem:[#allocation5 + $0x1c4] ss:$8 sps:$4 sm:$0xff]  }
  0x61   :  { %5104 = vmatprep.subr.bf16.mxu1 %v7470_v17  ;;  %v111_v52 = vld [vmem:[#allocation2] sm:$0xff]  ;;  %v7516_v57 = vld [vmem:[#allocation5 + $0xb4] ss:$8 sps:$4 sm:$0xff]   ;;  %v7520_v61 = vld [vmem:[#allocation5 + $0xb0] ss:$8 sps:$4 sm:$0xff]   ;;  %s6571_s4 = sld [smem:[#allocation13]] }
  0x62   :  { %v8922_v49 = vsub.s32 %v138_v42, %v8919_v43  ;;  %v7514_v53 = vld [vmem:[#allocation5 + $0xc0] ss:$8 sps:$4 sm:$0xff]   ;;  %v135_v55 = vcombine.high %v111_v52, %v111_v52  ;;  %v7518_v58 = vld [vmem:[#allocation5 + $0x1b4] ss:$8 sps:$4 sm:$0xff]   ;;  %v7521_v0 = vld [vmem:[#allocation5 + $0x1b0] ss:$8 sps:$4 sm:$0xff]  }
  0x63   :  { %5064 = vmatpush1.bf16.msra.mxu0 %v7472_v18  ;;  %v7515_v56 = vld [vmem:[#allocation5 + $0x1c0] ss:$8 sps:$4 sm:$0xff]   ;;  %v7522_v1 = vld [vmem:[#allocation5 + $0xa4] ss:$8 sps:$4 sm:$0xff]   ;;  %v7528_v6 = vld [vmem:[#allocation5 + $0x94] ss:$8 sps:$4 sm:$0xff]  }
  0x64   :  { %5105 = vmatpush1.bf16.msra.mxu1 %v7473_v19  ;;  %5065 = vmatprep.subr.bf16.mxu0 %v7474_v20  ;;  %v142_v54 = vrot.slane %v111_v52, %v8922_v49  ;;  %v149_v60 = vrot.slane %v135_v55, %v8922_v49  ;;  %v7524_v2 = vld [vmem:[#allocation5 + $0x1a4] ss:$8 sps:$4 sm:$0xff]   ;;  %v7526_v4 = vld [vmem:[#allocation5 + $0xa0] ss:$8 sps:$4 sm:$0xff]   ;;  %v7530_v7 = vld [vmem:[#allocation5 + $0x194] ss:$8 sps:$4 sm:$0xff]  }
  0x65   :  { %5106 = vmatprep.subr.bf16.mxu1 %v7476_v21  ;;  %v7527_v5 = vld [vmem:[#allocation5 + $0x1a0] ss:$8 sps:$4 sm:$0xff]   ;;  %v7532_v8 = vld [vmem:[#allocation5 + $0x90] ss:$8 sps:$4 sm:$0xff]   ;;  %v7534_v10 = vld [vmem:[#allocation5 + $0x84] ss:$8 sps:$4 sm:$0xff]  }
  0x66   :  { %v150_v59 = vcombine.high %v142_v54, %v142_v54  ;;  %v151_v63 = vcombine.high %v149_v60, %v149_v60  ;;  %v7533_v9 = vld [vmem:[#allocation5 + $0x190] ss:$8 sps:$4 sm:$0xff]   ;;  %v7536_v11 = vld [vmem:[#allocation5 + $0x184] ss:$8 sps:$4 sm:$0xff]   ;;  %v7538_v12 = vld [vmem:[#allocation5 + $0x80] ss:$8 sps:$4 sm:$0xff]   ;;  %v387_v16 = vpack.c.bf16 %v142_v54, %v142_v54  ;;  %v389_v17 = vpack.c.bf16 %v149_v60, %v149_v60 }
  0x67   :  { %5066 = vmatpush1.bf16.msra.mxu0 %v7478_v22  ;;  %v7539_v13 = vld [vmem:[#allocation5 + $0x180] ss:$8 sps:$4 sm:$0xff]   ;;  %v7543_v14 = vld [vmem:[#allocation5 + $0x274] ss:$8 sps:$4 sm:$0xff]   ;;  %v7541_v18 = vld [vmem:[#allocation5 + $0x270] ss:$8 sps:$4 sm:$0xff]  }
  0x68   :  { %5107 = vmatpush1.bf16.msra.mxu1 %v7479_v23  ;;  %5067 = vmatprep.subr.bf16.mxu0 %v7480_v24  ;;  %v388_v62 = vpack.c.bf16 %v150_v59, %v150_v59  ;;  %v390_v3 = vpack.c.bf16 %v151_v63, %v151_v63  ;;  %v7546_v15 = vld [vmem:[#allocation5 + $0x374] ss:$8 sps:$4 sm:$0xff]   ;;  %v7544_v19 = vld [vmem:[#allocation5 + $0x370] ss:$8 sps:$4 sm:$0xff]   ;;  %v7549_v20 = vld [vmem:[#allocation5 + $0x264] ss:$8 sps:$4 sm:$0xff]  }
  0x69   :  { %5108 = vmatprep.subr.bf16.mxu1 %v7482_v25  ;;  %v7552_v21 = vld [vmem:[#allocation5 + $0x364] ss:$8 sps:$4 sm:$0xff]   ;;  %v7547_v22 = vld [vmem:[#allocation5 + $0x260] ss:$8 sps:$4 sm:$0xff]   ;;  %v7555_v24 = vld [vmem:[#allocation5 + $0x254] ss:$8 sps:$4 sm:$0xff]  }
  0x6a   :  { %5087 = vmatprep.mubr.bf16.mxu0 %v388_v62  ;;  %5128 = vmatprep.mubr.bf16.mxu1 %v390_v3  ;;  %v7550_v23 = vld [vmem:[#allocation5 + $0x360] ss:$8 sps:$4 sm:$0xff]   ;;  %v7558_v25 = vld [vmem:[#allocation5 + $0x354] ss:$8 sps:$4 sm:$0xff]   ;;  %v7573_v36 = vld [vmem:[#allocation5 + $0x224] ss:$8 sps:$4 sm:$0xff]  }
  0x6b   :  { %5068 = vmatpush1.bf16.msra.mxu0 %v7484_v26  ;;  %v7553_v26 = vld [vmem:[#allocation5 + $0x250] ss:$8 sps:$4 sm:$0xff]   ;;  %v7576_v37 = vld [vmem:[#allocation5 + $0x324] ss:$8 sps:$4 sm:$0xff]   ;;  %v7571_v38 = vld [vmem:[#allocation5 + $0x220] ss:$8 sps:$4 sm:$0xff]  }
  0x6c   :  { %5109 = vmatpush1.bf16.msra.mxu1 %v7485_v27  ;;  %5069 = vmatprep.subr.bf16.mxu0 %v7486_v28  ;;  %v7556_v27 = vld [vmem:[#allocation5 + $0x350] ss:$8 sps:$4 sm:$0xff]   ;;  %v7561_v28 = vld [vmem:[#allocation5 + $0x244] ss:$8 sps:$4 sm:$0xff]   ;;  %v7583_v55 = vld [vmem:[#allocation5 + $0x200] ss:$8 sps:$4 sm:$0xff]  }
  0x6d   :  { %5110 = vmatprep.subr.bf16.mxu1 %v7488_v29  ;;  %v7564_v29 = vld [vmem:[#allocation5 + $0x344] ss:$8 sps:$4 sm:$0xff]   ;;  %v7594_v59 = vld [vmem:[#allocation5 + $0x3f4] ss:$8 sps:$4 sm:$0xff]   ;;  %v7589_v60 = vld [vmem:[#allocation5 + $0x2f0] ss:$8 sps:$4 sm:$0xff]  }
  0x6e   :  { %v112_v42 = vld [vmem:[#allocation2 + $0x8] sm:$0xff]  ;;  %v7606_v3 = vld [vmem:[#allocation5 + $0x3d4] ss:$8 sps:$4 sm:$0xff]   ;;  %s7430_s5 = sld [smem:[#allocation13 + $0x1]]  ;;  %vm6587_vm1 = vcmask 1024  }
  0x6f   :  { %5070 = vmatpush1.bf16.msra.mxu0 %v7490_v30  ;;  %v7559_v30 = vld [vmem:[#allocation5 + $0x240] ss:$8 sps:$4 sm:$0xff]   ;;  %v7588_v52 = vld [vmem:[#allocation5 + $0x304] ss:$8 sps:$4 sm:$0xff]   ;;  %s7431_s6 = sld [smem:[#allocation13 + $0x2]] }
  0x70   :  { %5111 = vmatpush1.bf16.msra.mxu1 %v7491_v31  ;;  %5071 = vmatprep.subr.bf16.mxu0 %v7492_v32  ;;  %v7562_v31 = vld [vmem:[#allocation5 + $0x340] ss:$8 sps:$4 sm:$0xff]   ;;  %v7567_v32 = vld [vmem:[#allocation5 + $0x234] ss:$8 sps:$4 sm:$0xff]   ;;  %v7597_v62 = vld [vmem:[#allocation5 + $0x2e4] ss:$8 sps:$4 sm:$0xff]  }
  0x71   :  { %5112 = vmatprep.subr.bf16.mxu1 %v7494_v33  ;;  %v7570_v33 = vld [vmem:[#allocation5 + $0x334] ss:$8 sps:$4 sm:$0xff]   ;;  %v7600_v63 = vld [vmem:[#allocation5 + $0x3e4] ss:$8 sps:$4 sm:$0xff]  }
  0x73   :  { %5072 = vmatpush2.bf16.msra.mxu0 %v7496_v34  ;;  %v7565_v34 = vld [vmem:[#allocation5 + $0x230] ss:$8 sps:$4 sm:$0xff]  }
  0x74   :  { %5113 = vmatpush2.bf16.msra.mxu1 %v7497_v35  ;;  %5073 = vmatprep.subr.bf16.mxu0 %v7498_v39  ;;  %v7568_v35 = vld [vmem:[#allocation5 + $0x330] ss:$8 sps:$4 sm:$0xff]   ;;  %v7574_v39 = vld [vmem:[#allocation5 + $0x320] ss:$8 sps:$4 sm:$0xff]  }
  0x75   :  { %5114 = vmatprep.subr.bf16.mxu1 %v7500_v40  ;;  %v7579_v40 = vld [vmem:[#allocation5 + $0x214] ss:$8 sps:$4 sm:$0xff]  }
  0x77   :  { %5074 = vmatpush2.bf16.msra.mxu0 %v7502_v41  ;;  %v7582_v41 = vld [vmem:[#allocation5 + $0x314] ss:$8 sps:$4 sm:$0xff]  }
  0x78   :  { %5115 = vmatpush2.bf16.msra.mxu1 %v7503_v44  ;;  %5075 = vmatprep.subr.bf16.mxu0 %v7504_v45  ;;  %v8927_v44 = vrot.slane %v112_v42, %v8922_v49  ;;  %v152_v45 = vcombine.high %v112_v42, %v112_v42  ;;  %v7655_v42 = vld [vmem:[#allocation5 + $0x554] ss:$8 sps:$4 sm:$0xff]  }
  0x79   :  { %5116 = vmatprep.subr.bf16.mxu1 %v7506_v46  ;;  %v7577_v46 = vld [vmem:[#allocation5 + $0x210] ss:$8 sps:$4 sm:$0xff]  }
  0x7b   :  { %5076 = vmatpush2.bf16.msra.mxu0 %v7508_v47  ;;  %v7580_v47 = vld [vmem:[#allocation5 + $0x310] ss:$8 sps:$4 sm:$0xff]  }
  0x7c   :  { %5117 = vmatpush2.bf16.msra.mxu1 %v7509_v48  ;;  %5077 = vmatprep.subr.bf16.mxu0 %v7510_v50  ;;  %v167_v48 = vcombine.high %v8927_v44, %v8927_v44  ;;  %v8932_v50 = vrot.slane %v152_v45, %v8922_v49 }
  0x7d   :  { %5118 = vmatprep.subr.bf16.mxu1 %v7512_v51  ;;  %v7585_v51 = vld [vmem:[#allocation5 + $0x204] ss:$8 sps:$4 sm:$0xff]  }
  0x7e   :  { %v168_v54 = vcombine.high %v8932_v50, %v8932_v50 }
  0x7f   :  { %5078 = vmatpush2.bf16.msra.mxu0 %v7514_v53  ;;  %v392_v53 = vpack.c.bf16 %v167_v48, %v167_v48  ;;  %v7653_v48 = vld [vmem:[#allocation5 + $0x550] ss:$8 sps:$4 sm:$0xff]  }
  0x80   :  { %5119 = vmatpush2.bf16.msra.mxu1 %v7515_v56  ;;  %5079 = vmatprep.subr.bf16.mxu0 %v7516_v57  ;;  %v7586_v56 = vld [vmem:[#allocation5 + $0x300] ss:$8 sps:$4 sm:$0xff]   ;;  %v394_v57 = vpack.c.bf16 %v168_v54, %v168_v54  ;;  %v7664_v54 = vld [vmem:[#allocation5 + $0x434] ss:$8 sps:$4 sm:$0xff]  }
  0x81   :  { %5120 = vmatprep.subr.bf16.mxu1 %v7518_v58  ;;  %v7591_v58 = vld [vmem:[#allocation5 + $0x2f4] ss:$8 sps:$4 sm:$0xff]  }
  0x83   :  { %5080 = vmatpush2.bf16.msra.mxu0 %v7520_v61  ;;  %v7592_v61 = vld [vmem:[#allocation5 + $0x3f0] ss:$8 sps:$4 sm:$0xff]  }
  0x84   :  { %5121 = vmatpush2.bf16.msra.mxu1 %v7521_v0  ;;  %5081 = vmatprep.subr.bf16.mxu0 %v7522_v1  ;;  %v7595_v0 = vld [vmem:[#allocation5 + $0x2e0] ss:$8 sps:$4 sm:$0xff]  }
  0x85   :  { %5122 = vmatprep.subr.bf16.mxu1 %v7524_v2  ;;  %v7598_v1 = vld [vmem:[#allocation5 + $0x3e0] ss:$8 sps:$4 sm:$0xff]   ;;  %v7603_v2 = vld [vmem:[#allocation5 + $0x2d4] ss:$8 sps:$4 sm:$0xff]  }
  0x87   :  { %5082 = vmatpush2.bf16.msra.mxu0 %v7526_v4  ;;  %v7601_v4 = vld [vmem:[#allocation5 + $0x2d0] ss:$8 sps:$4 sm:$0xff]  }
  0x88   :  { %5123 = vmatpush2.bf16.msra.mxu1 %v7527_v5  ;;  %5083 = vmatprep.subr.bf16.mxu0 %v7528_v6  ;;  %v7604_v5 = vld [vmem:[#allocation5 + $0x3d0] ss:$8 sps:$4 sm:$0xff]   ;;  %v7609_v6 = vld [vmem:[#allocation5 + $0x2c4] ss:$8 sps:$4 sm:$0xff]  }
  0x89   :  { %5124 = vmatprep.subr.bf16.mxu1 %v7530_v7  ;;  %v7612_v7 = vld [vmem:[#allocation5 + $0x3c4] ss:$8 sps:$4 sm:$0xff]  }
  0x8b   :  { %5084 = vmatpush2.bf16.msra.mxu0 %v7532_v8  ;;  %v7607_v8 = vld [vmem:[#allocation5 + $0x2c0] ss:$8 sps:$4 sm:$0xff]  }
  0x8c   :  { %5125 = vmatpush2.bf16.msra.mxu1 %v7533_v9  ;;  %5085 = vmatprep.subr.bf16.mxu0 %v7534_v10  ;;  %v7610_v9 = vld [vmem:[#allocation5 + $0x3c0] ss:$8 sps:$4 sm:$0xff]   ;;  %v7615_v10 = vld [vmem:[#allocation5 + $0x2b4] ss:$8 sps:$4 sm:$0xff]  }
  0x8d   :  { %5126 = vmatprep.subr.bf16.mxu1 %v7536_v11  ;;  %v7618_v11 = vld [vmem:[#allocation5 + $0x3b4] ss:$8 sps:$4 sm:$0xff]  }
  0x8f   :  { %5086 = vmatpush2.bf16.msra.mxu0 %v7538_v12  ;;  %v7613_v12 = vld [vmem:[#allocation5 + $0x2b0] ss:$8 sps:$4 sm:$0xff]  }
  0x90   :  { %5127 = vmatpush2.bf16.msra.mxu1 %v7539_v13  ;;  %5137 = vmatprep.subr.bf16.mxu0 %v7543_v14  ;;  %v7616_v13 = vld [vmem:[#allocation5 + $0x3b0] ss:$8 sps:$4 sm:$0xff]   ;;  %v7621_v14 = vld [vmem:[#allocation5 + $0x2a4] ss:$8 sps:$4 sm:$0xff]  }
  0x91   :  { %5178 = vmatprep.subr.bf16.mxu1 %v7546_v15  ;;  %v7624_v15 = vld [vmem:[#allocation5 + $0x3a4] ss:$8 sps:$4 sm:$0xff]  }
  0x92   :  { %5088 = vmatmul.mubr.bf16.vlgmr.msra.gmra.mxu0 %v387_v16  ;;  %v7619_v16 = vld [vmem:[#allocation5 + $0x2a0] ss:$8 sps:$4 sm:$0xff]  }
  0x93   :  { %5129 = vmatmul.mubr.bf16.vlgmr.msra.gmra.mxu1 %v389_v17  ;;  %5138 = vmatpush1.bf16.msra.mxu0 %v7541_v18  ;;  %v7622_v17 = vld [vmem:[#allocation5 + $0x3a0] ss:$8 sps:$4 sm:$0xff]   ;;  %v7627_v18 = vld [vmem:[#allocation5 + $0x294] ss:$8 sps:$4 sm:$0xff]  }
  0x94   :  { %5179 = vmatpush1.bf16.msra.mxu1 %v7544_v19  ;;  %5139 = vmatprep.subr.bf16.mxu0 %v7549_v20  ;;  %v7630_v19 = vld [vmem:[#allocation5 + $0x394] ss:$8 sps:$4 sm:$0xff]   ;;  %v7625_v20 = vld [vmem:[#allocation5 + $0x290] ss:$8 sps:$4 sm:$0xff]  }
  0x95   :  { %5180 = vmatprep.subr.bf16.mxu1 %v7552_v21  ;;  %5169 = vmatprep.mubr.bf16.mxu0 %v392_v53  ;;  %v7628_v21 = vld [vmem:[#allocation5 + $0x390] ss:$8 sps:$4 sm:$0xff]   ;;  %v7659_v53 = vld [vmem:[#allocation5 + $0x540] ss:$8 sps:$4 sm:$0xff]  }
  0x96   :  { %5210 = vmatprep.mubr.bf16.mxu1 %v394_v57  ;;  %v7665_v57 = vld [vmem:[#allocation5 + $0x530] ss:$8 sps:$4 sm:$0xff]  }
  0x97   :  { %5140 = vmatpush1.bf16.msra.mxu0 %v7547_v22  ;;  %v7633_v22 = vld [vmem:[#allocation5 + $0x284] ss:$8 sps:$4 sm:$0xff]  }
  0x98   :  { %5181 = vmatpush1.bf16.msra.mxu1 %v7550_v23  ;;  %5141 = vmatprep.subr.bf16.mxu0 %v7555_v24  ;;  %v7636_v23 = vld [vmem:[#allocation5 + $0x384] ss:$8 sps:$4 sm:$0xff]   ;;  %v7631_v24 = vld [vmem:[#allocation5 + $0x280] ss:$8 sps:$4 sm:$0xff]  }
  0x99   :  { %5182 = vmatprep.subr.bf16.mxu1 %v7558_v25  ;;  %v7634_v25 = vld [vmem:[#allocation5 + $0x380] ss:$8 sps:$4 sm:$0xff]  }
  0x9b   :  { %5142 = vmatpush1.bf16.msra.mxu0 %v7553_v26  ;;  %v7640_v26 = vld [vmem:[#allocation5 + $0x474] ss:$8 sps:$4 sm:$0xff]  }
  0x9c   :  { %5183 = vmatpush1.bf16.msra.mxu1 %v7556_v27  ;;  %5143 = vmatprep.subr.bf16.mxu0 %v7561_v28  ;;  %v7643_v27 = vld [vmem:[#allocation5 + $0x574] ss:$8 sps:$4 sm:$0xff]   ;;  %v391_v28 = vpack.c.bf16 %v8927_v44, %v8927_v44 }
  0x9d   :  { %5184 = vmatprep.subr.bf16.mxu1 %v7564_v29  ;;  %v393_v29 = vpack.c.bf16 %v8932_v50, %v8932_v50  ;;  %v7658_v50 = vld [vmem:[#allocation5 + $0x444] ss:$8 sps:$4 sm:$0xff]  }
  0x9f   :  { %5144 = vmatpush1.bf16.msra.mxu0 %v7559_v30  ;;  %v7638_v30 = vld [vmem:[#allocation5 + $0x470] ss:$8 sps:$4 sm:$0xff]  }
  0xa0   :  { %5185 = vmatpush1.bf16.msra.mxu1 %v7562_v31  ;;  %5145 = vmatprep.subr.bf16.mxu0 %v7567_v32  ;;  %v7641_v31 = vld [vmem:[#allocation5 + $0x570] ss:$8 sps:$4 sm:$0xff]   ;;  %v7646_v32 = vld [vmem:[#allocation5 + $0x464] ss:$8 sps:$4 sm:$0xff]  }
  0xa1   :  { %5186 = vmatprep.subr.bf16.mxu1 %v7570_v33  ;;  %v113_v33 = vld [vmem:[#allocation2 + $0x10] sm:$0xff] }
  0xa3   :  { %5146 = vmatpush1.bf16.msra.mxu0 %v7565_v34  ;;  %v7649_v34 = vld [vmem:[#allocation5 + $0x564] ss:$8 sps:$4 sm:$0xff]  }
  0xa4   :  { %5187 = vmatpush1.bf16.msra.mxu1 %v7568_v35  ;;  %5147 = vmatprep.subr.bf16.mxu0 %v7573_v36  ;;  %v8941_v35 = vrot.slane %v113_v33, %v8922_v49  ;;  %v169_v36 = vcombine.high %v113_v33, %v113_v33 }
  0xa5   :  { %5188 = vmatprep.subr.bf16.mxu1 %v7576_v37  ;;  %v7644_v37 = vld [vmem:[#allocation5 + $0x460] ss:$8 sps:$4 sm:$0xff]  }
  0xa7   :  { %5148 = vmatpush1.bf16.msra.mxu0 %v7571_v38  ;;  %v184_v38 = vcombine.high %v8941_v35, %v8941_v35 }
  0xa8   :  { %5189 = vmatpush1.bf16.msra.mxu1 %v7574_v39  ;;  %5149 = vmatprep.subr.bf16.mxu0 %v7579_v40  ;;  %v8946_v39 = vrot.slane %v169_v36, %v8922_v49  ;;  %v7647_v40 = vld [vmem:[#allocation5 + $0x560] ss:$8 sps:$4 sm:$0xff]   ;;  %v7725_v36 = vld [vmem:[#allocation5 + $0x590] ss:$8 sps:$4 sm:$0xff]  }
  0xa9   :  { %5190 = vmatprep.subr.bf16.mxu1 %v7582_v41  ;;  %v7652_v41 = vld [vmem:[#allocation5 + $0x454] ss:$8 sps:$4 sm:$0xff]   ;;  %v396_v44 = vpack.c.bf16 %v184_v38, %v184_v38  ;;  %v7733_v38 = vld [vmem:[#allocation5 + $0x584] ss:$8 sps:$4 sm:$0xff]  }
  0xaa   :  { %v185_v45 = vcombine.high %v8946_v39, %v8946_v39 }
  0xab   :  { %5150 = vmatpush1.bf16.msra.mxu0 %v7577_v46  ;;  %v7650_v46 = vld [vmem:[#allocation5 + $0x450] ss:$8 sps:$4 sm:$0xff]  }
  0xac   :  { %5191 = vmatpush1.bf16.msra.mxu1 %v7580_v47  ;;  %5151 = vmatprep.subr.bf16.mxu0 %v7585_v51  ;;  %v398_v47 = vpack.c.bf16 %v185_v45, %v185_v45  ;;  %v7661_v51 = vld [vmem:[#allocation5 + $0x544] ss:$8 sps:$4 sm:$0xff]   ;;  %v7737_v45 = vld [vmem:[#allocation5 + $0x674] ss:$8 sps:$4 sm:$0xff]  }
  0xad   :  { %5192 = vmatprep.subr.bf16.mxu1 %v7588_v52  ;;  %v7656_v52 = vld [vmem:[#allocation5 + $0x440] ss:$8 sps:$4 sm:$0xff]  }
  0xaf   :  { %5152 = vmatpush1.bf16.msra.mxu0 %v7583_v55  ;;  %v7667_v55 = vld [vmem:[#allocation5 + $0x534] ss:$8 sps:$4 sm:$0xff]  }
  0xb0   :  { %5193 = vmatpush1.bf16.msra.mxu1 %v7586_v56  ;;  %5153 = vmatprep.subr.bf16.mxu0 %v7591_v58  ;;  %v7662_v56 = vld [vmem:[#allocation5 + $0x430] ss:$8 sps:$4 sm:$0xff]   ;;  %v7670_v58 = vld [vmem:[#allocation5 + $0x424] ss:$8 sps:$4 sm:$0xff]  }
  0xb1   :  { %5194 = vmatprep.subr.bf16.mxu1 %v7594_v59  ;;  %v7673_v59 = vld [vmem:[#allocation5 + $0x524] ss:$8 sps:$4 sm:$0xff]  }
  0xb3   :  { %5154 = vmatpush2.bf16.msra.mxu0 %v7589_v60  ;;  %v7668_v60 = vld [vmem:[#allocation5 + $0x420] ss:$8 sps:$4 sm:$0xff]  }
  0xb4   :  { %5195 = vmatpush2.bf16.msra.mxu1 %v7592_v61  ;;  %5155 = vmatprep.subr.bf16.mxu0 %v7597_v62  ;;  %v7671_v61 = vld [vmem:[#allocation5 + $0x520] ss:$8 sps:$4 sm:$0xff]   ;;  %v7676_v62 = vld [vmem:[#allocation5 + $0x414] ss:$8 sps:$4 sm:$0xff]  }
  0xb5   :  { %5196 = vmatprep.subr.bf16.mxu1 %v7600_v63  ;;  %v7679_v63 = vld [vmem:[#allocation5 + $0x514] ss:$8 sps:$4 sm:$0xff]  }
  0xb7   :  { %5156 = vmatpush2.bf16.msra.mxu0 %v7595_v0  ;;  %v7674_v0 = vld [vmem:[#allocation5 + $0x410] ss:$8 sps:$4 sm:$0xff]  }
  0xb8   :  { %5197 = vmatpush2.bf16.msra.mxu1 %v7598_v1  ;;  %5157 = vmatprep.subr.bf16.mxu0 %v7603_v2  ;;  %v7677_v1 = vld [vmem:[#allocation5 + $0x510] ss:$8 sps:$4 sm:$0xff]   ;;  %v7682_v2 = vld [vmem:[#allocation5 + $0x404] ss:$8 sps:$4 sm:$0xff]  }
  0xb9   :  { %5198 = vmatprep.subr.bf16.mxu1 %v7606_v3  ;;  %v7685_v3 = vld [vmem:[#allocation5 + $0x504] ss:$8 sps:$4 sm:$0xff]  }
  0xbb   :  { %5158 = vmatpush2.bf16.msra.mxu0 %v7601_v4  ;;  %v7680_v4 = vld [vmem:[#allocation5 + $0x400] ss:$8 sps:$4 sm:$0xff]  }
  0xbc   :  { %5199 = vmatpush2.bf16.msra.mxu1 %v7604_v5  ;;  %5159 = vmatprep.subr.bf16.mxu0 %v7609_v6  ;;  %v7683_v5 = vld [vmem:[#allocation5 + $0x500] ss:$8 sps:$4 sm:$0xff]   ;;  %v7688_v6 = vld [vmem:[#allocation5 + $0x4f4] ss:$8 sps:$4 sm:$0xff]  }
  0xbd   :  { %5200 = vmatprep.subr.bf16.mxu1 %v7612_v7  ;;  %v7691_v7 = vld [vmem:[#allocation5 + $0x5f4] ss:$8 sps:$4 sm:$0xff]  }
  0xbf   :  { %5160 = vmatpush2.bf16.msra.mxu0 %v7607_v8  ;;  %v7686_v8 = vld [vmem:[#allocation5 + $0x4f0] ss:$8 sps:$4 sm:$0xff]  }
  0xc0   :  { %5201 = vmatpush2.bf16.msra.mxu1 %v7610_v9  ;;  %5161 = vmatprep.subr.bf16.mxu0 %v7615_v10  ;;  %v7689_v9 = vld [vmem:[#allocation5 + $0x5f0] ss:$8 sps:$4 sm:$0xff]   ;;  %v7694_v10 = vld [vmem:[#allocation5 + $0x4e4] ss:$8 sps:$4 sm:$0xff]  }
  0xc1   :  { %5202 = vmatprep.subr.bf16.mxu1 %v7618_v11  ;;  %v7697_v11 = vld [vmem:[#allocation5 + $0x5e4] ss:$8 sps:$4 sm:$0xff]  }
  0xc3   :  { %5162 = vmatpush2.bf16.msra.mxu0 %v7613_v12  ;;  %v7692_v12 = vld [vmem:[#allocation5 + $0x4e0] ss:$8 sps:$4 sm:$0xff]  }
  0xc4   :  { %5203 = vmatpush2.bf16.msra.mxu1 %v7616_v13  ;;  %5163 = vmatprep.subr.bf16.mxu0 %v7621_v14  ;;  %v7695_v13 = vld [vmem:[#allocation5 + $0x5e0] ss:$8 sps:$4 sm:$0xff]   ;;  %v7700_v14 = vld [vmem:[#allocation5 + $0x4d4] ss:$8 sps:$4 sm:$0xff]  }
  0xc5   :  { %5204 = vmatprep.subr.bf16.mxu1 %v7624_v15  ;;  %v7703_v15 = vld [vmem:[#allocation5 + $0x5d4] ss:$8 sps:$4 sm:$0xff]  }
  0xc7   :  { %5164 = vmatpush2.bf16.msra.mxu0 %v7619_v16  ;;  %v7698_v16 = vld [vmem:[#allocation5 + $0x4d0] ss:$8 sps:$4 sm:$0xff]  }
  0xc8   :  { %5205 = vmatpush2.bf16.msra.mxu1 %v7622_v17  ;;  %5165 = vmatprep.subr.bf16.mxu0 %v7627_v18  ;;  %v7701_v17 = vld [vmem:[#allocation5 + $0x5d0] ss:$8 sps:$4 sm:$0xff]   ;;  %v7706_v18 = vld [vmem:[#allocation5 + $0x4c4] ss:$8 sps:$4 sm:$0xff]  }
  0xc9   :  { %5206 = vmatprep.subr.bf16.mxu1 %v7630_v19  ;;  %v7709_v19 = vld [vmem:[#allocation5 + $0x5c4] ss:$8 sps:$4 sm:$0xff]  }
  0xcb   :  { %5166 = vmatpush2.bf16.msra.mxu0 %v7625_v20  ;;  %v7704_v20 = vld [vmem:[#allocation5 + $0x4c0] ss:$8 sps:$4 sm:$0xff]  }
  0xcc   :  { %5207 = vmatpush2.bf16.msra.mxu1 %v7628_v21  ;;  %5167 = vmatprep.subr.bf16.mxu0 %v7633_v22  ;;  %v7707_v21 = vld [vmem:[#allocation5 + $0x5c0] ss:$8 sps:$4 sm:$0xff]   ;;  %v7712_v22 = vld [vmem:[#allocation5 + $0x4b4] ss:$8 sps:$4 sm:$0xff]  }
  0xcd   :  { %5208 = vmatprep.subr.bf16.mxu1 %v7636_v23  ;;  %v7715_v23 = vld [vmem:[#allocation5 + $0x5b4] ss:$8 sps:$4 sm:$0xff]  }
  0xcf   :  { %5168 = vmatpush2.bf16.msra.mxu0 %v7631_v24  ;;  %v7710_v24 = vld [vmem:[#allocation5 + $0x4b0] ss:$8 sps:$4 sm:$0xff]  }
  0xd0   :  { %5209 = vmatpush2.bf16.msra.mxu1 %v7634_v25  ;;  %5219 = vmatprep.subr.bf16.mxu0 %v7640_v26  ;;  %v7713_v25 = vld [vmem:[#allocation5 + $0x5b0] ss:$8 sps:$4 sm:$0xff]   ;;  %v7718_v26 = vld [vmem:[#allocation5 + $0x4a4] ss:$8 sps:$4 sm:$0xff]  }
  0xd1   :  { %5260 = vmatprep.subr.bf16.mxu1 %v7643_v27  ;;  %v7721_v27 = vld [vmem:[#allocation5 + $0x5a4] ss:$8 sps:$4 sm:$0xff]  }
  0xd2   :  { %5170 = vmatmul.mubr.bf16.vlgmr.msra.gmra.mxu0 %v391_v28  ;;  %v7716_v28 = vld [vmem:[#allocation5 + $0x4a0] ss:$8 sps:$4 sm:$0xff]  }
  0xd3   :  { %5211 = vmatmul.mubr.bf16.vlgmr.msra.gmra.mxu1 %v393_v29  ;;  %5220 = vmatpush1.bf16.msra.mxu0 %v7638_v30  ;;  %v114_v29 = vld [vmem:[#allocation2 + $0x18] sm:$0xff]  ;;  %v7719_v30 = vld [vmem:[#allocation5 + $0x5a0] ss:$8 sps:$4 sm:$0xff]  }
  0xd4   :  { %5261 = vmatpush1.bf16.msra.mxu1 %v7641_v31  ;;  %5221 = vmatprep.subr.bf16.mxu0 %v7646_v32  ;;  %v7724_v31 = vld [vmem:[#allocation5 + $0x494] ss:$8 sps:$4 sm:$0xff]   ;;  %v186_v33 = vcombine.high %v114_v29, %v114_v29 }
  0xd5   :  { %5262 = vmatprep.subr.bf16.mxu1 %v7649_v34  ;;  %5251 = vmatprep.mubr.bf16.mxu0 %v396_v44  ;;  %v7727_v32 = vld [vmem:[#allocation5 + $0x594] ss:$8 sps:$4 sm:$0xff]   ;;  %v7722_v34 = vld [vmem:[#allocation5 + $0x490] ss:$8 sps:$4 sm:$0xff]   ;;  %v7731_v44 = vld [vmem:[#allocation5 + $0x580] ss:$8 sps:$4 sm:$0xff]  }
  0xd6   :  { %5292 = vmatprep.mubr.bf16.mxu1 %v398_v47 }
  0xd7   :  { %5222 = vmatpush1.bf16.msra.mxu0 %v7644_v37  ;;  %v7730_v37 = vld [vmem:[#allocation5 + $0x484] ss:$8 sps:$4 sm:$0xff]  }
  0xd8   :  { %5263 = vmatpush1.bf16.msra.mxu1 %v7647_v40  ;;  %5223 = vmatprep.subr.bf16.mxu0 %v7652_v41  ;;  %v8951_v40 = vrot.slane %v114_v29, %v8922_v49  ;;  %v8954_v41 = vrot.slane %v186_v33, %v8922_v49  ;;  %v7798_v29 = vld [vmem:[#allocation5 + $0x7d0] ss:$8 sps:$4 sm:$0xff]   ;;  %v7804_v33 = vld [vmem:[#allocation5 + $0x7c0] ss:$8 sps:$4 sm:$0xff]  }
  0xd9   :  { %5264 = vmatprep.subr.bf16.mxu1 %v7655_v42  ;;  %v7728_v42 = vld [vmem:[#allocation5 + $0x480] ss:$8 sps:$4 sm:$0xff]  }
  0xda   :  { %v201_v47 = vcombine.high %v8951_v40, %v8951_v40 }
  0xdb   :  { %5224 = vmatpush1.bf16.msra.mxu0 %v7650_v46  ;;  %v7740_v46 = vld [vmem:[#allocation5 + $0x774] ss:$8 sps:$4 sm:$0xff]  }
  0xdc   :  { %5265 = vmatpush1.bf16.msra.mxu1 %v7653_v48  ;;  %5225 = vmatprep.subr.bf16.mxu0 %v7658_v50  ;;  %v202_v48 = vcombine.high %v8954_v41, %v8954_v41  ;;  %v395_v50 = vpack.c.bf16 %v8941_v35, %v8941_v35  ;;  %v7749_v35 = vld [vmem:[#allocation5 + $0x654] ss:$8 sps:$4 sm:$0xff]  }
  0xdd   :  { %5266 = vmatprep.subr.bf16.mxu1 %v7661_v51  ;;  %v397_v51 = vpack.c.bf16 %v8946_v39, %v8946_v39  ;;  %v7752_v39 = vld [vmem:[#allocation5 + $0x754] ss:$8 sps:$4 sm:$0xff]  }
  0xdf   :  { %5226 = vmatpush1.bf16.msra.mxu0 %v7656_v52  ;;  %v7735_v52 = vld [vmem:[#allocation5 + $0x670] ss:$8 sps:$4 sm:$0xff]  }
  0xe0   :  { %5267 = vmatpush1.bf16.msra.mxu1 %v7659_v53  ;;  %5227 = vmatprep.subr.bf16.mxu0 %v7664_v54  ;;  %v7738_v53 = vld [vmem:[#allocation5 + $0x770] ss:$8 sps:$4 sm:$0xff]   ;;  %v7743_v54 = vld [vmem:[#allocation5 + $0x664] ss:$8 sps:$4 sm:$0xff]  }
  0xe1   :  { %5268 = vmatprep.subr.bf16.mxu1 %v7667_v55  ;;  %v7746_v55 = vld [vmem:[#allocation5 + $0x764] ss:$8 sps:$4 sm:$0xff]  }
  0xe3   :  { %5228 = vmatpush1.bf16.msra.mxu0 %v7662_v56  ;;  %v400_v56 = vpack.c.bf16 %v201_v47, %v201_v47  ;;  %v7816_v47 = vld [vmem:[#allocation5 + $0x7a0] ss:$8 sps:$4 sm:$0xff]  }
  0xe4   :  { %5269 = vmatpush1.bf16.msra.mxu1 %v7665_v57  ;;  %5229 = vmatprep.subr.bf16.mxu0 %v7670_v58  ;;  %v402_v57 = vpack.c.bf16 %v202_v48, %v202_v48  ;;  %v7741_v58 = vld [vmem:[#allocation5 + $0x660] ss:$8 sps:$4 sm:$0xff]   ;;  %v7821_v48 = vld [vmem:[#allocation5 + $0x694] ss:$8 sps:$4 sm:$0xff]  }
  0xe5   :  { %5270 = vmatprep.subr.bf16.mxu1 %v7673_v59  ;;  %v7744_v59 = vld [vmem:[#allocation5 + $0x760] ss:$8 sps:$4 sm:$0xff]  }
  0xe7   :  { %5230 = vmatpush1.bf16.msra.mxu0 %v7668_v60  ;;  %v7747_v60 = vld [vmem:[#allocation5 + $0x650] ss:$8 sps:$4 sm:$0xff]  }
  0xe8   :  { %5271 = vmatpush1.bf16.msra.mxu1 %v7671_v61  ;;  %5231 = vmatprep.subr.bf16.mxu0 %v7676_v62  ;;  %v7750_v61 = vld [vmem:[#allocation5 + $0x750] ss:$8 sps:$4 sm:$0xff]   ;;  %v7755_v62 = vld [vmem:[#allocation5 + $0x644] ss:$8 sps:$4 sm:$0xff]  }
  0xe9   :  { %5272 = vmatprep.subr.bf16.mxu1 %v7679_v63  ;;  %v7758_v63 = vld [vmem:[#allocation5 + $0x744] ss:$8 sps:$4 sm:$0xff]  }
  0xeb   :  { %5232 = vmatpush1.bf16.msra.mxu0 %v7674_v0  ;;  %v7753_v0 = vld [vmem:[#allocation5 + $0x640] ss:$8 sps:$4 sm:$0xff]  }
  0xec   :  { %5273 = vmatpush1.bf16.msra.mxu1 %v7677_v1  ;;  %5233 = vmatprep.subr.bf16.mxu0 %v7682_v2  ;;  %v7756_v1 = vld [vmem:[#allocation5 + $0x740] ss:$8 sps:$4 sm:$0xff]   ;;  %v7761_v2 = vld [vmem:[#allocation5 + $0x634] ss:$8 sps:$4 sm:$0xff]  }
  0xed   :  { %5274 = vmatprep.subr.bf16.mxu1 %v7685_v3  ;;  %v7764_v3 = vld [vmem:[#allocation5 + $0x734] ss:$8 sps:$4 sm:$0xff]  }
  0xef   :  { %5234 = vmatpush1.bf16.msra.mxu0 %v7680_v4  ;;  %v7759_v4 = vld [vmem:[#allocation5 + $0x630] ss:$8 sps:$4 sm:$0xff]  }
  0xf0   :  { %5275 = vmatpush1.bf16.msra.mxu1 %v7683_v5  ;;  %5235 = vmatprep.subr.bf16.mxu0 %v7688_v6  ;;  %v7762_v5 = vld [vmem:[#allocation5 + $0x730] ss:$8 sps:$4 sm:$0xff]   ;;  %v7767_v6 = vld [vmem:[#allocation5 + $0x624] ss:$8 sps:$4 sm:$0xff]  }
  0xf1   :  { %5276 = vmatprep.subr.bf16.mxu1 %v7691_v7  ;;  %v7770_v7 = vld [vmem:[#allocation5 + $0x724] ss:$8 sps:$4 sm:$0xff]  }
  0xf3   :  { %5236 = vmatpush2.bf16.msra.mxu0 %v7686_v8  ;;  %v7765_v8 = vld [vmem:[#allocation5 + $0x620] ss:$8 sps:$4 sm:$0xff]  }
  0xf4   :  { %5277 = vmatpush2.bf16.msra.mxu1 %v7689_v9  ;;  %5237 = vmatprep.subr.bf16.mxu0 %v7694_v10  ;;  %v7768_v9 = vld [vmem:[#allocation5 + $0x720] ss:$8 sps:$4 sm:$0xff]   ;;  %v7773_v10 = vld [vmem:[#allocation5 + $0x614] ss:$8 sps:$4 sm:$0xff]  }
  0xf5   :  { %5278 = vmatprep.subr.bf16.mxu1 %v7697_v11  ;;  %v7776_v11 = vld [vmem:[#allocation5 + $0x714] ss:$8 sps:$4 sm:$0xff]  }
  0xf7   :  { %5238 = vmatpush2.bf16.msra.mxu0 %v7692_v12  ;;  %v7771_v12 = vld [vmem:[#allocation5 + $0x610] ss:$8 sps:$4 sm:$0xff]  }
  0xf8   :  { %5279 = vmatpush2.bf16.msra.mxu1 %v7695_v13  ;;  %5239 = vmatprep.subr.bf16.mxu0 %v7700_v14  ;;  %v7774_v13 = vld [vmem:[#allocation5 + $0x710] ss:$8 sps:$4 sm:$0xff]   ;;  %v7779_v14 = vld [vmem:[#allocation5 + $0x604] ss:$8 sps:$4 sm:$0xff]  }
  0xf9   :  { %5280 = vmatprep.subr.bf16.mxu1 %v7703_v15  ;;  %v7782_v15 = vld [vmem:[#allocation5 + $0x704] ss:$8 sps:$4 sm:$0xff]  }
  0xfb   :  { %5240 = vmatpush2.bf16.msra.mxu0 %v7698_v16  ;;  %v7777_v16 = vld [vmem:[#allocation5 + $0x600] ss:$8 sps:$4 sm:$0xff]  }
  0xfc   :  { %5281 = vmatpush2.bf16.msra.mxu1 %v7701_v17  ;;  %5241 = vmatprep.subr.bf16.mxu0 %v7706_v18  ;;  %v7780_v17 = vld [vmem:[#allocation5 + $0x700] ss:$8 sps:$4 sm:$0xff]   ;;  %v7785_v18 = vld [vmem:[#allocation5 + $0x6f4] ss:$8 sps:$4 sm:$0xff]  }
  0xfd   :  { %5282 = vmatprep.subr.bf16.mxu1 %v7709_v19  ;;  %v7788_v19 = vld [vmem:[#allocation5 + $0x7f4] ss:$8 sps:$4 sm:$0xff]  }
  0xff   :  { %5242 = vmatpush2.bf16.msra.mxu0 %v7704_v20  ;;  %v7783_v20 = vld [vmem:[#allocation5 + $0x6f0] ss:$8 sps:$4 sm:$0xff]  }
 0x100   :  { %5283 = vmatpush2.bf16.msra.mxu1 %v7707_v21  ;;  %5243 = vmatprep.subr.bf16.mxu0 %v7712_v22  ;;  %v7786_v21 = vld [vmem:[#allocation5 + $0x7f0] ss:$8 sps:$4 sm:$0xff]   ;;  %v7791_v22 = vld [vmem:[#allocation5 + $0x6e4] ss:$8 sps:$4 sm:$0xff]  }
 0x101   :  { %5284 = vmatprep.subr.bf16.mxu1 %v7715_v23  ;;  %v7794_v23 = vld [vmem:[#allocation5 + $0x7e4] ss:$8 sps:$4 sm:$0xff]  }
 0x103   :  { %5244 = vmatpush2.bf16.msra.mxu0 %v7710_v24  ;;  %v7789_v24 = vld [vmem:[#allocation5 + $0x6e0] ss:$8 sps:$4 sm:$0xff]  }
 0x104   :  { %5285 = vmatpush2.bf16.msra.mxu1 %v7713_v25  ;;  %5245 = vmatprep.subr.bf16.mxu0 %v7718_v26  ;;  %v7792_v25 = vld [vmem:[#allocation5 + $0x7e0] ss:$8 sps:$4 sm:$0xff]   ;;  %v7797_v26 = vld [vmem:[#allocation5 + $0x6d4] ss:$8 sps:$4 sm:$0xff]  }
 0x105   :  { %5286 = vmatprep.subr.bf16.mxu1 %v7721_v27  ;;  %v7800_v27 = vld [vmem:[#allocation5 + $0x7d4] ss:$8 sps:$4 sm:$0xff]  }
 0x107   :  { %5246 = vmatpush2.bf16.msra.mxu0 %v7716_v28  ;;  %v7795_v28 = vld [vmem:[#allocation5 + $0x6d0] ss:$8 sps:$4 sm:$0xff]  }
 0x108   :  { %5287 = vmatpush2.bf16.msra.mxu1 %v7719_v30  ;;  %5247 = vmatprep.subr.bf16.mxu0 %v7724_v31  ;;  %v7803_v30 = vld [vmem:[#allocation5 + $0x6c4] ss:$8 sps:$4 sm:$0xff]  }
 0x109   :  { %5288 = vmatprep.subr.bf16.mxu1 %v7727_v32  ;;  %v7806_v31 = vld [vmem:[#allocation5 + $0x7c4] ss:$8 sps:$4 sm:$0xff]   ;;  %v7801_v32 = vld [vmem:[#allocation5 + $0x6c0] ss:$8 sps:$4 sm:$0xff]  }
 0x10b   :  { %5248 = vmatpush2.bf16.msra.mxu0 %v7722_v34  ;;  %v7809_v34 = vld [vmem:[#allocation5 + $0x6b4] ss:$8 sps:$4 sm:$0xff]  }
 0x10c   :  { %5289 = vmatpush2.bf16.msra.mxu1 %v7725_v36  ;;  %5249 = vmatprep.subr.bf16.mxu0 %v7730_v37  ;;  %v7812_v36 = vld [vmem:[#allocation5 + $0x7b4] ss:$8 sps:$4 sm:$0xff]   ;;  %v7807_v37 = vld [vmem:[#allocation5 + $0x6b0] ss:$8 sps:$4 sm:$0xff]  }
 0x10d   :  { %5290 = vmatprep.subr.bf16.mxu1 %v7733_v38  ;;  %v7810_v38 = vld [vmem:[#allocation5 + $0x7b0] ss:$8 sps:$4 sm:$0xff]  }
 0x10f   :  { %5250 = vmatpush2.bf16.msra.mxu0 %v7728_v42  ;;  %v7815_v42 = vld [vmem:[#allocation5 + $0x6a4] ss:$8 sps:$4 sm:$0xff]  }
 0x110   :  { %5291 = vmatpush2.bf16.msra.mxu1 %v7731_v44  ;;  %5301 = vmatprep.subr.bf16.mxu0 %v7737_v45  ;;  %v7818_v44 = vld [vmem:[#allocation5 + $0x7a4] ss:$8 sps:$4 sm:$0xff]  }
 0x111   :  { %5342 = vmatprep.subr.bf16.mxu1 %v7740_v46  ;;  %v115_v45 = vld [vmem:[#allocation2 + $0x20] sm:$0xff] }
 0x112   :  { %5252 = vmatmul.mubr.bf16.vlgmr.msra.gmra.mxu0 %v395_v50  ;;  %v7813_v46 = vld [vmem:[#allocation5 + $0x6a0] ss:$8 sps:$4 sm:$0xff]   ;;  %v7824_v50 = vld [vmem:[#allocation5 + $0x794] ss:$8 sps:$4 sm:$0xff]  }
 0x113   :  { %5293 = vmatmul.mubr.bf16.vlgmr.msra.gmra.mxu1 %v397_v51  ;;  %5302 = vmatpush1.bf16.msra.mxu0 %v7735_v52  ;;  %v203_v51 = vcombine.high %v115_v45, %v115_v45  ;;  %v7819_v52 = vld [vmem:[#allocation5 + $0x690] ss:$8 sps:$4 sm:$0xff]  }
 0x114   :  { %5343 = vmatpush1.bf16.msra.mxu1 %v7738_v53  ;;  %5303 = vmatprep.subr.bf16.mxu0 %v7743_v54  ;;  %v7822_v53 = vld [vmem:[#allocation5 + $0x790] ss:$8 sps:$4 sm:$0xff]   ;;  %v7827_v54 = vld [vmem:[#allocation5 + $0x684] ss:$8 sps:$4 sm:$0xff]  }
 0x115   :  { %5344 = vmatprep.subr.bf16.mxu1 %v7746_v55  ;;  %5333 = vmatprep.mubr.bf16.mxu0 %v400_v56  ;;  %v7830_v55 = vld [vmem:[#allocation5 + $0x784] ss:$8 sps:$4 sm:$0xff]   ;;  %v8965_v56 = vrot.slane %v115_v45, %v8922_v49  ;;  %v7873_v45 = vld [vmem:[#allocation5 + $0x914] ss:$8 sps:$4 sm:$0xff]  }
 0x116   :  { %5374 = vmatprep.mubr.bf16.mxu1 %v402_v57  ;;  %v8968_v57 = vrot.slane %v203_v51, %v8922_v49  ;;  %v7874_v51 = vld [vmem:[#allocation5 + $0x800] ss:$8 sps:$4 sm:$0xff]  }
 0x117   :  { %5304 = vmatpush1.bf16.msra.mxu0 %v7741_v58  ;;  %v7825_v58 = vld [vmem:[#allocation5 + $0x680] ss:$8 sps:$4 sm:$0xff]  }
 0x118   :  { %5345 = vmatpush1.bf16.msra.mxu1 %v7744_v59  ;;  %5305 = vmatprep.subr.bf16.mxu0 %v7749_v35  ;;  %v7828_v59 = vld [vmem:[#allocation5 + $0x780] ss:$8 sps:$4 sm:$0xff]  }
 0x119   :  { %5346 = vmatprep.subr.bf16.mxu1 %v7752_v39  ;;  %v1203_v35 = vld [vmem:[#allocation7] sm:$0x3]  ;;  %v8971_v39 = vsub.s32 0, %v8919_v43 }
 0x11b   :  { %5306 = vmatpush1.bf16.msra.mxu0 %v7747_v60  ;;  %v7834_v60 = vld [vmem:[#allocation5 + $0x874] ss:$8 sps:$4 sm:$0xff]  }
 0x11c   :  { %5347 = vmatpush1.bf16.msra.mxu1 %v7750_v61  ;;  %5307 = vmatprep.subr.bf16.mxu0 %v7755_v62  ;;  %v7837_v61 = vld [vmem:[#allocation5 + $0x974] ss:$8 sps:$4 sm:$0xff]   ;;  %v8974_v62 = vsub.s32 1, %v8919_v43 }
 0x11d   :  { %5348 = vmatprep.subr.bf16.mxu1 %v7758_v63  ;;  %v218_v63 = vcombine.high %v8965_v56, %v8965_v56 }
 0x11f   :  { %5308 = vmatpush1.bf16.msra.mxu0 %v7753_v0  ;;  %v219_v0 = vcombine.high %v8968_v57, %v8968_v57 }
 0x120   :  { %5349 = vmatpush1.bf16.msra.mxu1 %v7756_v1  ;;  %5309 = vmatprep.subr.bf16.mxu0 %v7761_v2  ;;  %v399_v1 = vpack.c.bf16 %v8951_v40, %v8951_v40  ;;  %v401_v2 = vpack.c.bf16 %v8954_v41, %v8954_v41  ;;  %v7838_v40 = vld [vmem:[#allocation5 + $0x860] ss:$8 sps:$4 sm:$0xff]  }
 0x121   :  { %5350 = vmatprep.subr.bf16.mxu1 %v7764_v3  ;;  %v1208_v3 = vrot.slane %v1203_v35, %v8971_v39 }
 0x123   :  { %5310 = vmatpush1.bf16.msra.mxu0 %v7759_v4  ;;  %v7832_v4 = vld [vmem:[#allocation5 + $0x870] ss:$8 sps:$4 sm:$0xff]  }
 0x124   :  { %5351 = vmatpush1.bf16.msra.mxu1 %v7762_v5  ;;  %5311 = vmatprep.subr.bf16.mxu0 %v7767_v6  ;;  %v7835_v5 = vld [vmem:[#allocation5 + $0x970] ss:$8 sps:$4 sm:$0xff]   ;;  %v7840_v6 = vld [vmem:[#allocation5 + $0x864] ss:$8 sps:$4 sm:$0xff]  }
 0x125   :  { %5352 = vmatprep.subr.bf16.mxu1 %v7770_v7  ;;  %v7843_v7 = vld [vmem:[#allocation5 + $0x964] ss:$8 sps:$4 sm:$0xff]  }
 0x127   :  { %5312 = vmatpush1.bf16.msra.mxu0 %v7765_v8  ;;  %v1212_v8 = vrot.slane %v1203_v35, %v8974_v62  ;;  %v7891_v35 = vld [vmem:[#allocation5 + $0x9e4] ss:$8 sps:$4 sm:$0xff]  }
 0x128   :  { %5353 = vmatpush1.bf16.msra.mxu1 %v7768_v9  ;;  %5313 = vmatprep.subr.bf16.mxu0 %v7773_v10  ;;  %v404_v9 = vpack.c.bf16 %v218_v63, %v218_v63  ;;  %v406_v10 = vpack.c.bf16 %v219_v0, %v219_v0  ;;  %v7894_v63 = vld [vmem:[#allocation5 + $0x8d4] ss:$8 sps:$4 sm:$0xff]  }
 0x129   :  { %5354 = vmatprep.subr.bf16.mxu1 %v7776_v11  ;;  %v7897_v0 = vld [vmem:[#allocation5 + $0x9d4] ss:$8 sps:$4 sm:$0xff]  }
 0x12b   :  { %5314 = vmatpush1.bf16.msra.mxu0 %v7771_v12 }
 0x12c   :  { %5355 = vmatpush1.bf16.msra.mxu1 %v7774_v13  ;;  %5315 = vmatprep.subr.bf16.mxu0 %v7779_v14  ;;  %v7841_v13 = vld [vmem:[#allocation5 + $0x960] ss:$8 sps:$4 sm:$0xff]   ;;  %v7846_v14 = vld [vmem:[#allocation5 + $0x854] ss:$8 sps:$4 sm:$0xff]  }
 0x12d   :  { %5356 = vmatprep.subr.bf16.mxu1 %v7782_v15 }
 0x12f   :  { %5316 = vmatpush1.bf16.msra.mxu0 %v7777_v16 }
 0x130   :  { %5357 = vmatpush1.bf16.msra.mxu1 %v7780_v17  ;;  %5317 = vmatprep.subr.bf16.mxu0 %v7785_v18  ;;  %v7849_v17 = vld [vmem:[#allocation5 + $0x954] ss:$8 sps:$4 sm:$0xff]  }
 0x131   :  { %5358 = vmatprep.subr.bf16.mxu1 %v7788_v19 }
 0x133   :  { %5318 = vmatpush2.bf16.msra.mxu0 %v7783_v20 }
 0x134   :  { %5359 = vmatpush2.bf16.msra.mxu1 %v7786_v21  ;;  %5319 = vmatprep.subr.bf16.mxu0 %v7791_v22  ;;  %v7844_v22 = vld [vmem:[#allocation5 + $0x850] ss:$8 sps:$4 sm:$0xff]  }
 0x135   :  { %5360 = vmatprep.subr.bf16.mxu1 %v7794_v23  ;;  %v7847_v23 = vld [vmem:[#allocation5 + $0x950] ss:$8 sps:$4 sm:$0xff]  }
 0x137   :  { %5320 = vmatpush2.bf16.msra.mxu0 %v7789_v24 }
 0x138   :  { %5361 = vmatpush2.bf16.msra.mxu1 %v7792_v25  ;;  %5321 = vmatprep.subr.bf16.mxu0 %v7797_v26 }
 0x139   :  { %5362 = vmatprep.subr.bf16.mxu1 %v7800_v27  ;;  %v7852_v27 = vld [vmem:[#allocation5 + $0x844] ss:$8 sps:$4 sm:$0xff]  }
 0x13b   :  { %5322 = vmatpush2.bf16.msra.mxu0 %v7795_v28  ;;  %v7855_v28 = vld [vmem:[#allocation5 + $0x944] ss:$8 sps:$4 sm:$0xff]  }
 0x13c   :  { %5363 = vmatpush2.bf16.msra.mxu1 %v7798_v29  ;;  %5323 = vmatprep.subr.bf16.mxu0 %v7803_v30  ;;  %v7850_v29 = vld [vmem:[#allocation5 + $0x840] ss:$8 sps:$4 sm:$0xff]  }
 0x13d   :  { %5364 = vmatprep.subr.bf16.mxu1 %v7806_v31  ;;  %v7853_v30 = vld [vmem:[#allocation5 + $0x940] ss:$8 sps:$4 sm:$0xff]   ;;  %v7858_v31 = vld [vmem:[#allocation5 + $0x834] ss:$8 sps:$4 sm:$0xff]  }
 0x13f   :  { %5324 = vmatpush2.bf16.msra.mxu0 %v7801_v32  ;;  %v7861_v32 = vld [vmem:[#allocation5 + $0x934] ss:$8 sps:$4 sm:$0xff]  }
 0x140   :  { %5365 = vmatpush2.bf16.msra.mxu1 %v7804_v33  ;;  %5325 = vmatprep.subr.bf16.mxu0 %v7809_v34  ;;  %v7856_v33 = vld [vmem:[#allocation5 + $0x830] ss:$8 sps:$4 sm:$0xff]  }
 0x141   :  { %5366 = vmatprep.subr.bf16.mxu1 %v7812_v36  ;;  %v7859_v34 = vld [vmem:[#allocation5 + $0x930] ss:$8 sps:$4 sm:$0xff]   ;;  %v7864_v36 = vld [vmem:[#allocation5 + $0x824] ss:$8 sps:$4 sm:$0xff]  }
 0x143   :  { %5326 = vmatpush2.bf16.msra.mxu0 %v7807_v37  ;;  %v7867_v37 = vld [vmem:[#allocation5 + $0x924] ss:$8 sps:$4 sm:$0xff]  }
 0x144   :  { %5367 = vmatpush2.bf16.msra.mxu1 %v7810_v38  ;;  %5327 = vmatprep.subr.bf16.mxu0 %v7815_v42  ;;  %v7862_v38 = vld [vmem:[#allocation5 + $0x820] ss:$8 sps:$4 sm:$0xff]  }
 0x145   :  { %5368 = vmatprep.subr.bf16.mxu1 %v7818_v44  ;;  %v7865_v42 = vld [vmem:[#allocation5 + $0x920] ss:$8 sps:$4 sm:$0xff]   ;;  %v7870_v44 = vld [vmem:[#allocation5 + $0x814] ss:$8 sps:$4 sm:$0xff]  }
 0x147   :  { %5328 = vmatpush2.bf16.msra.mxu0 %v7813_v46  ;;  %v7868_v46 = vld [vmem:[#allocation5 + $0x810] ss:$8 sps:$4 sm:$0xff]  }
 0x148   :  { %5369 = vmatpush2.bf16.msra.mxu1 %v7816_v47  ;;  %5329 = vmatprep.subr.bf16.mxu0 %v7821_v48  ;;  %v7871_v47 = vld [vmem:[#allocation5 + $0x910] ss:$8 sps:$4 sm:$0xff]   ;;  %v7876_v48 = vld [vmem:[#allocation5 + $0x804] ss:$8 sps:$4 sm:$0xff]  }
 0x149   :  { %5370 = vmatprep.subr.bf16.mxu1 %v7824_v50  ;;  %v7879_v50 = vld [vmem:[#allocation5 + $0x904] ss:$8 sps:$4 sm:$0xff]  }
 0x14b   :  { %5330 = vmatpush2.bf16.msra.mxu0 %v7819_v52  ;;  %v7877_v52 = vld [vmem:[#allocation5 + $0x900] ss:$8 sps:$4 sm:$0xff]  }
 0x14c   :  { %5371 = vmatpush2.bf16.msra.mxu1 %v7822_v53  ;;  %5331 = vmatprep.subr.bf16.mxu0 %v7827_v54  ;;  %v7882_v53 = vld [vmem:[#allocation5 + $0x8f4] ss:$8 sps:$4 sm:$0xff]  }
 0x14d   :  { %5372 = vmatprep.subr.bf16.mxu1 %v7830_v55  ;;  %v7885_v54 = vld [vmem:[#allocation5 + $0x9f4] ss:$8 sps:$4 sm:$0xff]   ;;  %v7880_v55 = vld [vmem:[#allocation5 + $0x8f0] ss:$8 sps:$4 sm:$0xff]  }
 0x14f   :  { %5332 = vmatpush2.bf16.msra.mxu0 %v7825_v58  ;;  %v7883_v58 = vld [vmem:[#allocation5 + $0x9f0] ss:$8 sps:$4 sm:$0xff]  }
 0x150   :  { %5373 = vmatpush2.bf16.msra.mxu1 %v7828_v59  ;;  %5383 = vmatprep.subr.bf16.mxu0 %v7834_v60  ;;  %v7888_v59 = vld [vmem:[#allocation5 + $0x8e4] ss:$8 sps:$4 sm:$0xff]   ;;  %v7886_v60 = vld [vmem:[#allocation5 + $0x8e0] ss:$8 sps:$4 sm:$0xff]  }
 0x151   :  { %5424 = vmatprep.subr.bf16.mxu1 %v7837_v61  ;;  %v7889_v61 = vld [vmem:[#allocation5 + $0x9e0] ss:$8 sps:$4 sm:$0xff]  }
 0x152   :  { %v5089_v11 = vpop.f32.mrf.mxu0  ;;  %5334 = vmatmul.mubr.bf16.vlgmr.msra.gmra.mxu0 %v399_v1  ;;  %v7892_v1 = vld [vmem:[#allocation5 + $0x8d0] ss:$8 sps:$4 sm:$0xff]  }
 0x153   :  { %v5130_v12 = vpop.f32.mrf.mxu1  ;;  %5375 = vmatmul.mubr.bf16.vlgmr.msra.gmra.mxu1 %v401_v2  ;;  %v5090_v41 = vadd.f32 %v5089_v11, %v1208_v3  ;;  %5384 = vmatpush1.bf16.msra.mxu0 %v7832_v4  ;;  %v7895_v2 = vld [vmem:[#allocation5 + $0x9d0] ss:$8 sps:$4 sm:$0xff]   ;;  %v7900_v3 = vld [vmem:[#allocation5 + $0x8c4] ss:$8 sps:$4 sm:$0xff]  }
 0x154   :  { %5425 = vmatpush1.bf16.msra.mxu1 %v7835_v5  ;;  %v5091_v15 = vpop.f32.mrf.mxu0  ;;  %5385 = vmatprep.subr.bf16.mxu0 %v7840_v6  ;;  %v7903_v4 = vld [vmem:[#allocation5 + $0x9c4] ss:$8 sps:$4 sm:$0xff]   ;;  %v7898_v5 = vld [vmem:[#allocation5 + $0x8c0] ss:$8 sps:$4 sm:$0xff]  }
 0x155   :  { %v5132_v16 = vpop.f32.mrf.mxu1  ;;  %5426 = vmatprep.subr.bf16.mxu1 %v7843_v7  ;;  %v8986_v18 = vadd.f32 %v5130_v12, %v5090_v41  ;;  %v5092_v19 = vadd.f32 %v5091_v15, %v1212_v8  ;;  %5415 = vmatprep.mubr.bf16.mxu0 %v404_v9  ;;  %v7901_v6 = vld [vmem:[#allocation5 + $0x9c0] ss:$8 sps:$4 sm:$0xff]   ;;  %v7906_v7 = vld [vmem:[#allocation5 + $0x8b4] ss:$8 sps:$4 sm:$0xff]   ;;  %v7904_v9 = vld [vmem:[#allocation5 + $0x8b0] ss:$8 sps:$4 sm:$0xff]  }
 0x156   :  { %5456 = vmatprep.mubr.bf16.mxu1 %v406_v10  ;;  %v5093_v20 = vpop.f32.mrf.mxu0  ;;  %v7909_v8 = vld [vmem:[#allocation5 + $0x9b4] ss:$8 sps:$4 sm:$0xff]   ;;  %v7907_v10 = vld [vmem:[#allocation5 + $0x9b0] ss:$8 sps:$4 sm:$0xff]   ;;  %v7912_v11 = vld [vmem:[#allocation5 + $0x8a4] ss:$8 sps:$4 sm:$0xff]  }
 0x157   :  { %v5134_v21 = vpop.f32.mrf.mxu1  ;;  %v8988_v24 = vadd.f32 %v5132_v16, %v5092_v19  ;;  %5386 = vmatpush1.bf16.msra.mxu0 %v7838_v40  ;;  %v7915_v12 = vld [vmem:[#allocation5 + $0x9a4] ss:$8 sps:$4 sm:$0xff]   ;;  %v7910_v41 = vld [vmem:[#allocation5 + $0x8a0] ss:$8 sps:$4 sm:$0xff]   ;;  %v7921_v15 = vld [vmem:[#allocation5 + $0x994] ss:$8 sps:$4 sm:$0xff]  }
 0x158   :  { %5427 = vmatpush1.bf16.msra.mxu1 %v7841_v13  ;;  %v5094_v25 = vpop.f32.mrf.mxu0  ;;  %5387 = vmatprep.subr.bf16.mxu0 %v7846_v14  ;;  %v116_v40 = vld [vmem:[#allocation2 + $0x28] sm:$0xff]  ;;  %v7918_v14 = vld [vmem:[#allocation5 + $0x894] ss:$8 sps:$4 sm:$0xff]   ;;  %v7919_v19 = vld [vmem:[#allocation5 + $0x990] ss:$8 sps:$4 sm:$0xff]  }
 0x159   :  { %v5135_v26 = vpop.f32.mrf.mxu1  ;;  %5428 = vmatprep.subr.bf16.mxu1 %v7849_v17  ;;  %v7913_v13 = vld [vmem:[#allocation5 + $0x9a0] ss:$8 sps:$4 sm:$0xff]   ;;  %v220_v16 = vcombine.high %v116_v40, %v116_v40  ;;  %v7916_v17 = vld [vmem:[#allocation5 + $0x890] ss:$8 sps:$4 sm:$0xff]   ;;  %v7924_v20 = vld [vmem:[#allocation5 + $0x884] ss:$8 sps:$4 sm:$0xff]  }
 0x15a   :  { %v7927_v21 = vld [vmem:[#allocation5 + $0x984] ss:$8 sps:$4 sm:$0xff]   ;;  %v7922_v25 = vld [vmem:[#allocation5 + $0x880] ss:$8 sps:$4 sm:$0xff]  }
 0x15b   :  { %5388 = vmatpush1.bf16.msra.mxu0 %v7844_v22  ;;  %v8991_v22 = vrot.slane %v116_v40, %v8922_v49  ;;  %v7925_v26 = vld [vmem:[#allocation5 + $0x980] ss:$8 sps:$4 sm:$0xff]   ;;  %v7973_v40 = vld [vmem:[#allocation5 + $0xa04] ss:$8 sps:$4 sm:$0xff]  }
 0x15c   :  { %5429 = vmatpush1.bf16.msra.mxu1 %v7847_v23  ;;  %5389 = vmatprep.subr.bf16.mxu0 %v7852_v27  ;;  %v8994_v23 = vrot.slane %v220_v16, %v8922_v49  ;;  %v7931_v27 = vld [vmem:[#allocation5 + $0xa74] ss:$8 sps:$4 sm:$0xff]  }
 0x15d   :  { %5430 = vmatprep.subr.bf16.mxu1 %v7855_v28  ;;  %v7934_v28 = vld [vmem:[#allocation5 + $0xb74] ss:$8 sps:$4 sm:$0xff]  }
 0x15e   :  { %v7982_v16 = vld [vmem:[#allocation5 + $0xbf4] ss:$8 sps:$4 sm:$0xff]  }
 0x15f   :  { %5390 = vmatpush1.bf16.msra.mxu0 %v7850_v29  ;;  %v7929_v29 = vld [vmem:[#allocation5 + $0xa70] ss:$8 sps:$4 sm:$0xff]  }
 0x160   :  { %5431 = vmatpush1.bf16.msra.mxu1 %v7853_v30  ;;  %5391 = vmatprep.subr.bf16.mxu0 %v7858_v31  ;;  %v7932_v30 = vld [vmem:[#allocation5 + $0xb70] ss:$8 sps:$4 sm:$0xff]   ;;  %v235_v31 = vcombine.high %v8991_v22, %v8991_v22 }
 0x161   :  { %5432 = vmatprep.subr.bf16.mxu1 %v7861_v32  ;;  %v236_v32 = vcombine.high %v8994_v23, %v8994_v23 }
 0x163   :  { %5392 = vmatpush1.bf16.msra.mxu0 %v7856_v33  ;;  %v403_v33 = vpack.c.bf16 %v8965_v56, %v8965_v56 }
 0x164   :  { %5433 = vmatpush1.bf16.msra.mxu1 %v7859_v34  ;;  %5393 = vmatprep.subr.bf16.mxu0 %v7864_v36  ;;  %v405_v34 = vpack.c.bf16 %v8968_v57, %v8968_v57  ;;  %v7937_v36 = vld [vmem:[#allocation5 + $0xa64] ss:$8 sps:$4 sm:$0xff]  }
 0x165   :  { %5434 = vmatprep.subr.bf16.mxu1 %v7867_v37  ;;  %v7940_v37 = vld [vmem:[#allocation5 + $0xb64] ss:$8 sps:$4 sm:$0xff]  }
 0x167   :  { %5394 = vmatpush1.bf16.msra.mxu0 %v7862_v38  ;;  %v7935_v38 = vld [vmem:[#allocation5 + $0xa60] ss:$8 sps:$4 sm:$0xff]  }
 0x168   :  { %5435 = vmatpush1.bf16.msra.mxu1 %v7865_v42  ;;  %5395 = vmatprep.subr.bf16.mxu0 %v7870_v44  ;;  %v7938_v42 = vld [vmem:[#allocation5 + $0xb60] ss:$8 sps:$4 sm:$0xff]   ;;  %v408_v44 = vpack.c.bf16 %v235_v31, %v235_v31  ;;  %v7997_v31 = vld [vmem:[#allocation5 + $0xac4] ss:$8 sps:$4 sm:$0xff]  }
 0x169   :  { %5436 = vmatprep.subr.bf16.mxu1 %v7873_v45  ;;  %v410_v45 = vpack.c.bf16 %v236_v32, %v236_v32  ;;  %v8000_v32 = vld [vmem:[#allocation5 + $0xbc4] ss:$8 sps:$4 sm:$0xff]  }
 0x16b   :  { %5396 = vmatpush1.bf16.msra.mxu0 %v7868_v46 }
 0x16c   :  { %5437 = vmatpush1.bf16.msra.mxu1 %v7871_v47  ;;  %5397 = vmatprep.subr.bf16.mxu0 %v7876_v48 }
 0x16d   :  { %5438 = vmatprep.subr.bf16.mxu1 %v7879_v50  ;;  %v7943_v50 = vld [vmem:[#allocation5 + $0xa54] ss:$8 sps:$4 sm:$0xff]  }
 0x16f   :  { %5398 = vmatpush1.bf16.msra.mxu0 %v7874_v51  ;;  %v7946_v51 = vld [vmem:[#allocation5 + $0xb54] ss:$8 sps:$4 sm:$0xff]  }
 0x170   :  { %5439 = vmatpush1.bf16.msra.mxu1 %v7877_v52  ;;  %5399 = vmatprep.subr.bf16.mxu0 %v7882_v53 }
 0x171   :  { %5440 = vmatprep.subr.bf16.mxu1 %v7885_v54  ;;  %v7941_v54 = vld [vmem:[#allocation5 + $0xa50] ss:$8 sps:$4 sm:$0xff]  }
 0x173   :  { %5400 = vmatpush2.bf16.msra.mxu0 %v7880_v55  ;;  %v7944_v55 = vld [vmem:[#allocation5 + $0xb50] ss:$8 sps:$4 sm:$0xff]  }
 0x174   :  { %5441 = vmatpush2.bf16.msra.mxu1 %v7883_v58  ;;  %5401 = vmatprep.subr.bf16.mxu0 %v7888_v59 }
 0x175   :  { %5442 = vmatprep.subr.bf16.mxu1 %v7891_v35 }
 0x177   :  { %5402 = vmatpush2.bf16.msra.mxu0 %v7886_v60 }
 0x178   :  { %5443 = vmatpush2.bf16.msra.mxu1 %v7889_v61  ;;  %5403 = vmatprep.subr.bf16.mxu0 %v7894_v63  ;;  %v7949_v61 = vld [vmem:[#allocation5 + $0xa44] ss:$8 sps:$4 sm:$0xff]  }
 0x179   :  { %5444 = vmatprep.subr.bf16.mxu1 %v7897_v0  ;;  %v7952_v63 = vld [vmem:[#allocation5 + $0xb44] ss:$8 sps:$4 sm:$0xff]   ;;  %v7947_v0 = vld [vmem:[#allocation5 + $0xa40] ss:$8 sps:$4 sm:$0xff]  }
 0x17b   :  { %5404 = vmatpush2.bf16.msra.mxu0 %v7892_v1  ;;  %v7955_v1 = vld [vmem:[#allocation5 + $0xa34] ss:$8 sps:$4 sm:$0xff]  }
 0x17c   :  { %5445 = vmatpush2.bf16.msra.mxu1 %v7895_v2  ;;  %5405 = vmatprep.subr.bf16.mxu0 %v7900_v3  ;;  %v7958_v2 = vld [vmem:[#allocation5 + $0xb34] ss:$8 sps:$4 sm:$0xff]   ;;  %v7953_v3 = vld [vmem:[#allocation5 + $0xa30] ss:$8 sps:$4 sm:$0xff]  }
 0x17d   :  { %5446 = vmatprep.subr.bf16.mxu1 %v7903_v4  ;;  %v7956_v4 = vld [vmem:[#allocation5 + $0xb30] ss:$8 sps:$4 sm:$0xff]  }
 0x17f   :  { %5406 = vmatpush2.bf16.msra.mxu0 %v7898_v5  ;;  %v7961_v5 = vld [vmem:[#allocation5 + $0xa24] ss:$8 sps:$4 sm:$0xff]  }
 0x180   :  { %5447 = vmatpush2.bf16.msra.mxu1 %v7901_v6  ;;  %5407 = vmatprep.subr.bf16.mxu0 %v7906_v7  ;;  %v7964_v6 = vld [vmem:[#allocation5 + $0xb24] ss:$8 sps:$4 sm:$0xff]   ;;  %v7959_v7 = vld [vmem:[#allocation5 + $0xa20] ss:$8 sps:$4 sm:$0xff]  }
 0x181   :  { %5448 = vmatprep.subr.bf16.mxu1 %v7909_v8  ;;  %v7962_v8 = vld [vmem:[#allocation5 + $0xb20] ss:$8 sps:$4 sm:$0xff]  }
 0x183   :  { %5408 = vmatpush2.bf16.msra.mxu0 %v7904_v9  ;;  %v7967_v9 = vld [vmem:[#allocation5 + $0xa14] ss:$8 sps:$4 sm:$0xff]  }
 0x184   :  { %5449 = vmatpush2.bf16.msra.mxu1 %v7907_v10  ;;  %5409 = vmatprep.subr.bf16.mxu0 %v7912_v11  ;;  %v7970_v10 = vld [vmem:[#allocation5 + $0xb14] ss:$8 sps:$4 sm:$0xff]   ;;  %v7965_v11 = vld [vmem:[#allocation5 + $0xa10] ss:$8 sps:$4 sm:$0xff]  }
 0x185   :  { %5450 = vmatprep.subr.bf16.mxu1 %v7915_v12  ;;  %v7968_v12 = vld [vmem:[#allocation5 + $0xb10] ss:$8 sps:$4 sm:$0xff]  }
 0x187   :  { %5410 = vmatpush2.bf16.msra.mxu0 %v7910_v41  ;;  %v7976_v41 = vld [vmem:[#allocation5 + $0xb04] ss:$8 sps:$4 sm:$0xff]  }
 0x188   :  { %5451 = vmatpush2.bf16.msra.mxu1 %v7913_v13  ;;  %5411 = vmatprep.subr.bf16.mxu0 %v7918_v14  ;;  %v7971_v13 = vld [vmem:[#allocation5 + $0xa00] ss:$8 sps:$4 sm:$0xff]  }
 0x189   :  { %5452 = vmatprep.subr.bf16.mxu1 %v7921_v15  ;;  %v7974_v14 = vld [vmem:[#allocation5 + $0xb00] ss:$8 sps:$4 sm:$0xff]   ;;  %v7979_v15 = vld [vmem:[#allocation5 + $0xaf4] ss:$8 sps:$4 sm:$0xff]  }
 0x18b   :  { %5412 = vmatpush2.bf16.msra.mxu0 %v7916_v17  ;;  %v7977_v17 = vld [vmem:[#allocation5 + $0xaf0] ss:$8 sps:$4 sm:$0xff]  }
 0x18c   :  { %5453 = vmatpush2.bf16.msra.mxu1 %v7919_v19  ;;  %5413 = vmatprep.subr.bf16.mxu0 %v7924_v20  ;;  %v7980_v19 = vld [vmem:[#allocation5 + $0xbf0] ss:$8 sps:$4 sm:$0xff]   ;;  %v7985_v20 = vld [vmem:[#allocation5 + $0xae4] ss:$8 sps:$4 sm:$0xff]  }
 0x18d   :  { %5454 = vmatprep.subr.bf16.mxu1 %v7927_v21  ;;  %v7988_v21 = vld [vmem:[#allocation5 + $0xbe4] ss:$8 sps:$4 sm:$0xff]  }
 0x18f   :  { %5414 = vmatpush2.bf16.msra.mxu0 %v7922_v25  ;;  %v7983_v25 = vld [vmem:[#allocation5 + $0xae0] ss:$8 sps:$4 sm:$0xff]  }
 0x190   :  { %5455 = vmatpush2.bf16.msra.mxu1 %v7925_v26  ;;  %5465 = vmatprep.subr.bf16.mxu0 %v7931_v27  ;;  %v7986_v26 = vld [vmem:[#allocation5 + $0xbe0] ss:$8 sps:$4 sm:$0xff]   ;;  %v7991_v27 = vld [vmem:[#allocation5 + $0xad4] ss:$8 sps:$4 sm:$0xff]  }
 0x191   :  { %5506 = vmatprep.subr.bf16.mxu1 %v7934_v28  ;;  %v7994_v28 = vld [vmem:[#allocation5 + $0xbd4] ss:$8 sps:$4 sm:$0xff]  }
 0x192   :  { %v5171_v46 = vpop.f32.mrf.mxu0  ;;  %5416 = vmatmul.mubr.bf16.vlgmr.msra.gmra.mxu0 %v403_v33  ;;  %v7995_v33 = vld [vmem:[#allocation5 + $0xac0] ss:$8 sps:$4 sm:$0xff]  }
 0x193   :  { %v5212_v47 = vpop.f32.mrf.mxu1  ;;  %5457 = vmatmul.mubr.bf16.vlgmr.msra.gmra.mxu1 %v405_v34  ;;  %v5172_v48 = vadd.f32 %v5171_v46, %v8986_v18  ;;  %5466 = vmatpush1.bf16.msra.mxu0 %v7929_v29  ;;  %v7989_v29 = vld [vmem:[#allocation5 + $0xad0] ss:$8 sps:$4 sm:$0xff]   ;;  %v7998_v34 = vld [vmem:[#allocation5 + $0xbc0] ss:$8 sps:$4 sm:$0xff]  }
 0x194   :  { %5507 = vmatpush1.bf16.msra.mxu1 %v7932_v30  ;;  %v5173_v56 = vpop.f32.mrf.mxu0  ;;  %5467 = vmatprep.subr.bf16.mxu0 %v7937_v36  ;;  %v7992_v30 = vld [vmem:[#allocation5 + $0xbd0] ss:$8 sps:$4 sm:$0xff]   ;;  %v8003_v36 = vld [vmem:[#allocation5 + $0xab4] ss:$8 sps:$4 sm:$0xff]  }
 0x195   :  { %v5214_v57 = vpop.f32.mrf.mxu1  ;;  %5508 = vmatprep.subr.bf16.mxu1 %v7940_v37  ;;  %v9005_v52 = vadd.f32 %v5212_v47, %v5172_v48  ;;  %v5174_v53 = vadd.f32 %v5173_v56, %v8988_v24  ;;  %5497 = vmatprep.mubr.bf16.mxu0 %v408_v44  ;;  %v7950_v24 = vld [vmem:[#allocation5 + $0xb40] ss:$8 sps:$4 sm:$0xff]   ;;  %v8006_v37 = vld [vmem:[#allocation5 + $0xbb4] ss:$8 sps:$4 sm:$0xff]   ;;  %v8009_v44 = vld [vmem:[#allocation5 + $0xaa4] ss:$8 sps:$4 sm:$0xff]  }
 0x196   :  { %5538 = vmatprep.mubr.bf16.mxu1 %v410_v45  ;;  %v5175_v58 = vpop.f32.mrf.mxu0  ;;  %v8012_v45 = vld [vmem:[#allocation5 + $0xba4] ss:$8 sps:$4 sm:$0xff]   ;;  %v117_v46 = vld [vmem:[#allocation2 + $0x30] sm:$0xff]  ;;  %v8007_v47 = vld [vmem:[#allocation5 + $0xaa0] ss:$8 sps:$4 sm:$0xff]  }
 0x197   :  { %v5216_v59 = vpop.f32.mrf.mxu1  ;;  %v9008_v35 = vadd.f32 %v5214_v57, %v5174_v53  ;;  %5468 = vmatpush1.bf16.msra.mxu0 %v7935_v38  ;;  %v8001_v38 = vld [vmem:[#allocation5 + $0xab0] ss:$8 sps:$4 sm:$0xff]   ;;  %v8010_v48 = vld [vmem:[#allocation5 + $0xba0] ss:$8 sps:$4 sm:$0xff]   ;;  %v8015_v56 = vld [vmem:[#allocation5 + $0xa94] ss:$8 sps:$4 sm:$0xff]   ;;  %v9011_v58 = vrot.slane %v117_v46, %v8922_v49 }
 0x198   :  { %5509 = vmatpush1.bf16.msra.mxu1 %v7938_v42  ;;  %v5176_v18 = vpop.f32.mrf.mxu0  ;;  %5469 = vmatprep.subr.bf16.mxu0 %v7943_v50  ;;  %v8004_v42 = vld [vmem:[#allocation5 + $0xbb0] ss:$8 sps:$4 sm:$0xff]   ;;  %v8018_v57 = vld [vmem:[#allocation5 + $0xb94] ss:$8 sps:$4 sm:$0xff]   ;;  %v237_v50 = vcombine.high %v117_v46, %v117_v46  ;;  %v8070_v46 = vld [vmem:[#allocation5 + $0xc04] ss:$8 sps:$4 sm:$0xff]  }
 0x199   :  { %v5217_v60 = vpop.f32.mrf.mxu1  ;;  %5510 = vmatprep.subr.bf16.mxu1 %v7946_v51  ;;  %v8013_v51 = vld [vmem:[#allocation5 + $0xa90] ss:$8 sps:$4 sm:$0xff]   ;;  %v8019_v18 = vld [vmem:[#allocation5 + $0xa80] ss:$8 sps:$4 sm:$0xff]  }
 0x19a   :  { %v8016_v53 = vld [vmem:[#allocation5 + $0xb90] ss:$8 sps:$4 sm:$0xff]   ;;  %v9014_v59 = vrot.slane %v237_v50, %v8922_v49  ;;  %v8022_v60 = vld [vmem:[#allocation5 + $0xb80] ss:$8 sps:$4 sm:$0xff]   ;;  %v8079_v50 = vld [vmem:[#allocation5 + $0xdf4] ss:$8 sps:$4 sm:$0xff]  }
 0x19b   :  { %5470 = vmatpush1.bf16.msra.mxu0 %v7941_v54  ;;  %v8021_v54 = vld [vmem:[#allocation5 + $0xa84] ss:$8 sps:$4 sm:$0xff]  }
 0x19c   :  { %5511 = vmatpush1.bf16.msra.mxu1 %v7944_v55  ;;  %5471 = vmatprep.subr.bf16.mxu0 %v7949_v61  ;;  %v8024_v55 = vld [vmem:[#allocation5 + $0xb84] ss:$8 sps:$4 sm:$0xff]   ;;  %v8028_v61 = vld [vmem:[#allocation5 + $0xc74] ss:$8 sps:$4 sm:$0xff]  }
 0x19d   :  { %5512 = vmatprep.subr.bf16.mxu1 %v7952_v63  ;;  %v8031_v63 = vld [vmem:[#allocation5 + $0xd74] ss:$8 sps:$4 sm:$0xff]  }
 0x19f   :  { %5472 = vmatpush1.bf16.msra.mxu0 %v7947_v0  ;;  %v8026_v0 = vld [vmem:[#allocation5 + $0xc70] ss:$8 sps:$4 sm:$0xff]  }
 0x1a0   :  { %5513 = vmatpush1.bf16.msra.mxu1 %v7950_v24  ;;  %5473 = vmatprep.subr.bf16.mxu0 %v7955_v1  ;;  %v8029_v24 = vld [vmem:[#allocation5 + $0xd70] ss:$8 sps:$4 sm:$0xff]   ;;  %v252_v1 = vcombine.high %v9011_v58, %v9011_v58 }
 0x1a1   :  { %5514 = vmatprep.subr.bf16.mxu1 %v7958_v2  ;;  %v253_v2 = vcombine.high %v9014_v59, %v9014_v59 }
 0x1a3   :  { %5474 = vmatpush1.bf16.msra.mxu0 %v7953_v3  ;;  %v407_v3 = vpack.c.bf16 %v8991_v22, %v8991_v22 }
 0x1a4   :  { %5515 = vmatpush1.bf16.msra.mxu1 %v7956_v4  ;;  %5475 = vmatprep.subr.bf16.mxu0 %v7961_v5  ;;  %v409_v4 = vpack.c.bf16 %v8994_v23, %v8994_v23  ;;  %v8034_v5 = vld [vmem:[#allocation5 + $0xc64] ss:$8 sps:$4 sm:$0xff]  }
 0x1a5   :  { %5516 = vmatprep.subr.bf16.mxu1 %v7964_v6  ;;  %v8037_v6 = vld [vmem:[#allocation5 + $0xd64] ss:$8 sps:$4 sm:$0xff]  }
 0x1a7   :  { %5476 = vmatpush1.bf16.msra.mxu0 %v7959_v7  ;;  %v8032_v7 = vld [vmem:[#allocation5 + $0xc60] ss:$8 sps:$4 sm:$0xff]  }
 0x1a8   :  { %5517 = vmatpush1.bf16.msra.mxu1 %v7962_v8  ;;  %5477 = vmatprep.subr.bf16.mxu0 %v7967_v9  ;;  %v8035_v8 = vld [vmem:[#allocation5 + $0xd60] ss:$8 sps:$4 sm:$0xff]   ;;  %v412_v9 = vpack.c.bf16 %v252_v1, %v252_v1  ;;  %v8094_v1 = vld [vmem:[#allocation5 + $0xcc4] ss:$8 sps:$4 sm:$0xff]  }
 0x1a9   :  { %5518 = vmatprep.subr.bf16.mxu1 %v7970_v10  ;;  %v414_v10 = vpack.c.bf16 %v253_v2, %v253_v2  ;;  %v8097_v2 = vld [vmem:[#allocation5 + $0xdc4] ss:$8 sps:$4 sm:$0xff]  }
 0x1ab   :  { %5478 = vmatpush1.bf16.msra.mxu0 %v7965_v11 }
 0x1ac   :  { %5519 = vmatpush1.bf16.msra.mxu1 %v7968_v12  ;;  %5479 = vmatprep.subr.bf16.mxu0 %v7973_v40 }
 0x1ad   :  { %5520 = vmatprep.subr.bf16.mxu1 %v7976_v41  ;;  %v8040_v41 = vld [vmem:[#allocation5 + $0xc54] ss:$8 sps:$4 sm:$0xff]  }
 0x1af   :  { %5480 = vmatpush1.bf16.msra.mxu0 %v7971_v13  ;;  %v8043_v13 = vld [vmem:[#allocation5 + $0xd54] ss:$8 sps:$4 sm:$0xff]  }
 0x1b0   :  { %5521 = vmatpush1.bf16.msra.mxu1 %v7974_v14  ;;  %5481 = vmatprep.subr.bf16.mxu0 %v7979_v15 }
 0x1b1   :  { %5522 = vmatprep.subr.bf16.mxu1 %v7982_v16  ;;  %v8038_v16 = vld [vmem:[#allocation5 + $0xc50] ss:$8 sps:$4 sm:$0xff]  }
 0x1b3   :  { %5482 = vmatpush2.bf16.msra.mxu0 %v7977_v17  ;;  %v8041_v17 = vld [vmem:[#allocation5 + $0xd50] ss:$8 sps:$4 sm:$0xff]  }
 0x1b4   :  { %5523 = vmatpush2.bf16.msra.mxu1 %v7980_v19  ;;  %5483 = vmatprep.subr.bf16.mxu0 %v7985_v20 }
 0x1b5   :  { %5524 = vmatprep.subr.bf16.mxu1 %v7988_v21 }
 0x1b7   :  { %5484 = vmatpush2.bf16.msra.mxu0 %v7983_v25 }
 0x1b8   :  { %5525 = vmatpush2.bf16.msra.mxu1 %v7986_v26  ;;  %5485 = vmatprep.subr.bf16.mxu0 %v7991_v27  ;;  %v8046_v26 = vld [vmem:[#allocation5 + $0xc44] ss:$8 sps:$4 sm:$0xff]  }
 0x1b9   :  { %5526 = vmatprep.subr.bf16.mxu1 %v7994_v28  ;;  %v8049_v27 = vld [vmem:[#allocation5 + $0xd44] ss:$8 sps:$4 sm:$0xff]   ;;  %v8044_v28 = vld [vmem:[#allocation5 + $0xc40] ss:$8 sps:$4 sm:$0xff]  }
 0x1bb   :  { %5486 = vmatpush2.bf16.msra.mxu0 %v7989_v29  ;;  %v8052_v29 = vld [vmem:[#allocation5 + $0xc34] ss:$8 sps:$4 sm:$0xff]  }
 0x1bc   :  { %5527 = vmatpush2.bf16.msra.mxu1 %v7992_v30  ;;  %5487 = vmatprep.subr.bf16.mxu0 %v7997_v31  ;;  %v8055_v30 = vld [vmem:[#allocation5 + $0xd34] ss:$8 sps:$4 sm:$0xff]   ;;  %v8050_v31 = vld [vmem:[#allocation5 + $0xc30] ss:$8 sps:$4 sm:$0xff]  }
 0x1bd   :  { %5528 = vmatprep.subr.bf16.mxu1 %v8000_v32  ;;  %v8053_v32 = vld [vmem:[#allocation5 + $0xd30] ss:$8 sps:$4 sm:$0xff]  }
 0x1bf   :  { %5488 = vmatpush2.bf16.msra.mxu0 %v7995_v33  ;;  %v8058_v33 = vld [vmem:[#allocation5 + $0xc24] ss:$8 sps:$4 sm:$0xff]  }
 0x1c0   :  { %5529 = vmatpush2.bf16.msra.mxu1 %v7998_v34  ;;  %5489 = vmatprep.subr.bf16.mxu0 %v8003_v36  ;;  %v8061_v34 = vld [vmem:[#allocation5 + $0xd24] ss:$8 sps:$4 sm:$0xff]   ;;  %v8056_v36 = vld [vmem:[#allocation5 + $0xc20] ss:$8 sps:$4 sm:$0xff]  }
 0x1c1   :  { %5530 = vmatprep.subr.bf16.mxu1 %v8006_v37  ;;  %v8059_v37 = vld [vmem:[#allocation5 + $0xd20] ss:$8 sps:$4 sm:$0xff]  }
 0x1c3   :  { %5490 = vmatpush2.bf16.msra.mxu0 %v8001_v38  ;;  %v8064_v38 = vld [vmem:[#allocation5 + $0xc14] ss:$8 sps:$4 sm:$0xff]  }
 0x1c4   :  { %5531 = vmatpush2.bf16.msra.mxu1 %v8004_v42  ;;  %5491 = vmatprep.subr.bf16.mxu0 %v8009_v44  ;;  %v8067_v42 = vld [vmem:[#allocation5 + $0xd14] ss:$8 sps:$4 sm:$0xff]   ;;  %v8062_v44 = vld [vmem:[#allocation5 + $0xc10] ss:$8 sps:$4 sm:$0xff]  }
 0x1c5   :  { %5532 = vmatprep.subr.bf16.mxu1 %v8012_v45  ;;  %v8065_v45 = vld [vmem:[#allocation5 + $0xd10] ss:$8 sps:$4 sm:$0xff]  }
 0x1c7   :  { %5492 = vmatpush2.bf16.msra.mxu0 %v8007_v47  ;;  %v8073_v47 = vld [vmem:[#allocation5 + $0xd04] ss:$8 sps:$4 sm:$0xff]  }
 0x1c8   :  { %5533 = vmatpush2.bf16.msra.mxu1 %v8010_v48  ;;  %5493 = vmatprep.subr.bf16.mxu0 %v8015_v56  ;;  %v8068_v48 = vld [vmem:[#allocation5 + $0xc00] ss:$8 sps:$4 sm:$0xff]  }
 0x1c9   :  { %5534 = vmatprep.subr.bf16.mxu1 %v8018_v57  ;;  %v8071_v56 = vld [vmem:[#allocation5 + $0xd00] ss:$8 sps:$4 sm:$0xff]   ;;  %v8076_v57 = vld [vmem:[#allocation5 + $0xcf4] ss:$8 sps:$4 sm:$0xff]  }
 0x1cb   :  { %5494 = vmatpush2.bf16.msra.mxu0 %v8013_v51  ;;  %v8074_v51 = vld [vmem:[#allocation5 + $0xcf0] ss:$8 sps:$4 sm:$0xff]  }
 0x1cc   :  { %5535 = vmatpush2.bf16.msra.mxu1 %v8016_v53  ;;  %5495 = vmatprep.subr.bf16.mxu0 %v8021_v54  ;;  %v8077_v53 = vld [vmem:[#allocation5 + $0xdf0] ss:$8 sps:$4 sm:$0xff]   ;;  %v8082_v54 = vld [vmem:[#allocation5 + $0xce4] ss:$8 sps:$4 sm:$0xff]  }
 0x1cd   :  { %5536 = vmatprep.subr.bf16.mxu1 %v8024_v55  ;;  %v8085_v55 = vld [vmem:[#allocation5 + $0xde4] ss:$8 sps:$4 sm:$0xff]  }
 0x1cf   :  { %5496 = vmatpush2.bf16.msra.mxu0 %v8019_v18  ;;  %v8080_v18 = vld [vmem:[#allocation5 + $0xce0] ss:$8 sps:$4 sm:$0xff]  }
 0x1d0   :  { %5537 = vmatpush2.bf16.msra.mxu1 %v8022_v60  ;;  %5547 = vmatprep.subr.bf16.mxu0 %v8028_v61  ;;  %v8083_v60 = vld [vmem:[#allocation5 + $0xde0] ss:$8 sps:$4 sm:$0xff]   ;;  %v8088_v61 = vld [vmem:[#allocation5 + $0xcd4] ss:$8 sps:$4 sm:$0xff]  }
 0x1d1   :  { %5588 = vmatprep.subr.bf16.mxu1 %v8031_v63  ;;  %v8091_v63 = vld [vmem:[#allocation5 + $0xdd4] ss:$8 sps:$4 sm:$0xff]  }
 0x1d2   :  { %v5253_v11 = vpop.f32.mrf.mxu0  ;;  %5498 = vmatmul.mubr.bf16.vlgmr.msra.gmra.mxu0 %v407_v3  ;;  %v8092_v3 = vld [vmem:[#allocation5 + $0xcc0] ss:$8 sps:$4 sm:$0xff]  }
 0x1d3   :  { %v5294_v12 = vpop.f32.mrf.mxu1  ;;  %5539 = vmatmul.mubr.bf16.vlgmr.msra.gmra.mxu1 %v409_v4  ;;  %v5254_v40 = vadd.f32 %v5253_v11, %v9005_v52  ;;  %5548 = vmatpush1.bf16.msra.mxu0 %v8026_v0  ;;  %v8086_v0 = vld [vmem:[#allocation5 + $0xcd0] ss:$8 sps:$4 sm:$0xff]   ;;  %v8095_v4 = vld [vmem:[#allocation5 + $0xdc0] ss:$8 sps:$4 sm:$0xff]  }
 0x1d4   :  { %5589 = vmatpush1.bf16.msra.mxu1 %v8029_v24  ;;  %v5255_v22 = vpop.f32.mrf.mxu0  ;;  %5549 = vmatprep.subr.bf16.mxu0 %v8034_v5  ;;  %v8089_v24 = vld [vmem:[#allocation5 + $0xdd0] ss:$8 sps:$4 sm:$0xff]   ;;  %v8100_v5 = vld [vmem:[#allocation5 + $0xcb4] ss:$8 sps:$4 sm:$0xff]  }
 0x1d5   :  { %v5296_v23 = vpop.f32.mrf.mxu1  ;;  %5590 = vmatprep.subr.bf16.mxu1 %v8037_v6  ;;  %v9025_v14 = vadd.f32 %v5294_v12, %v5254_v40  ;;  %v5256_v15 = vadd.f32 %v5255_v22, %v9008_v35  ;;  %5579 = vmatprep.mubr.bf16.mxu0 %v412_v9  ;;  %v8047_v35 = vld [vmem:[#allocation5 + $0xd40] ss:$8 sps:$4 sm:$0xff]   ;;  %v8103_v6 = vld [vmem:[#allocation5 + $0xdb4] ss:$8 sps:$4 sm:$0xff]   ;;  %v8106_v9 = vld [vmem:[#allocation5 + $0xca4] ss:$8 sps:$4 sm:$0xff]  }
 0x1d6   :  { %5620 = vmatprep.mubr.bf16.mxu1 %v414_v10  ;;  %v5257_v19 = vpop.f32.mrf.mxu0  ;;  %v8109_v10 = vld [vmem:[#allocation5 + $0xda4] ss:$8 sps:$4 sm:$0xff]   ;;  %v118_v11 = vld [vmem:[#allocation2 + $0x38] sm:$0xff]  ;;  %v8104_v12 = vld [vmem:[#allocation5 + $0xca0] ss:$8 sps:$4 sm:$0xff]  }
 0x1d7   :  { %v5298_v20 = vpop.f32.mrf.mxu1  ;;  %v9028_v21 = vadd.f32 %v5296_v23, %v5256_v15  ;;  %5550 = vmatpush1.bf16.msra.mxu0 %v8032_v7  ;;  %v8098_v7 = vld [vmem:[#allocation5 + $0xcb0] ss:$8 sps:$4 sm:$0xff]   ;;  %v8107_v40 = vld [vmem:[#allocation5 + $0xda0] ss:$8 sps:$4 sm:$0xff]   ;;  %v8112_v22 = vld [vmem:[#allocation5 + $0xc94] ss:$8 sps:$4 sm:$0xff]   ;;  %v9031_v19 = vrot.slane %v118_v11, %v8922_v49 }
 0x1d8   :  { %5591 = vmatpush1.bf16.msra.mxu1 %v8035_v8  ;;  %v5258_v52 = vpop.f32.mrf.mxu0  ;;  %5551 = vmatprep.subr.bf16.mxu0 %v8040_v41  ;;  %v8101_v8 = vld [vmem:[#allocation5 + $0xdb0] ss:$8 sps:$4 sm:$0xff]   ;;  %v8115_v23 = vld [vmem:[#allocation5 + $0xd94] ss:$8 sps:$4 sm:$0xff]   ;;  %v254_v41 = vcombine.high %v118_v11, %v118_v11  ;;  %v8167_v11 = vld [vmem:[#allocation5 + $0xe04] ss:$8 sps:$4 sm:$0xff]  }
 0x1d9   :  { %v5299_v25 = vpop.f32.mrf.mxu1  ;;  %5592 = vmatprep.subr.bf16.mxu1 %v8043_v13  ;;  %v8110_v13 = vld [vmem:[#allocation5 + $0xc90] ss:$8 sps:$4 sm:$0xff]   ;;  %v8116_v52 = vld [vmem:[#allocation5 + $0xc80] ss:$8 sps:$4 sm:$0xff]  }
 0x1da   :  { %v8113_v15 = vld [vmem:[#allocation5 + $0xd90] ss:$8 sps:$4 sm:$0xff]   ;;  %v9034_v20 = vrot.slane %v254_v41, %v8922_v49  ;;  %v8119_v25 = vld [vmem:[#allocation5 + $0xd80] ss:$8 sps:$4 sm:$0xff]   ;;  %v8176_v41 = vld [vmem:[#allocation5 + $0xff4] ss:$8 sps:$4 sm:$0xff]  }
 0x1db   :  { %5552 = vmatpush1.bf16.msra.mxu0 %v8038_v16  ;;  %v8118_v16 = vld [vmem:[#allocation5 + $0xc84] ss:$8 sps:$4 sm:$0xff]  }
 0x1dc   :  { %5593 = vmatpush1.bf16.msra.mxu1 %v8041_v17  ;;  %5553 = vmatprep.subr.bf16.mxu0 %v8046_v26  ;;  %v8121_v17 = vld [vmem:[#allocation5 + $0xd84] ss:$8 sps:$4 sm:$0xff]   ;;  %v8125_v26 = vld [vmem:[#allocation5 + $0xe74] ss:$8 sps:$4 sm:$0xff]  }
 0x1dd   :  { %5594 = vmatprep.subr.bf16.mxu1 %v8049_v27  ;;  %v8128_v27 = vld [vmem:[#allocation5 + $0xf74] ss:$8 sps:$4 sm:$0xff]  }
 0x1df   :  { %5554 = vmatpush1.bf16.msra.mxu0 %v8044_v28  ;;  %v8123_v28 = vld [vmem:[#allocation5 + $0xe70] ss:$8 sps:$4 sm:$0xff]  }
 0x1e0   :  { %5595 = vmatpush1.bf16.msra.mxu1 %v8047_v35  ;;  %5555 = vmatprep.subr.bf16.mxu0 %v8052_v29  ;;  %v8126_v35 = vld [vmem:[#allocation5 + $0xf70] ss:$8 sps:$4 sm:$0xff]   ;;  %v269_v29 = vcombine.high %v9031_v19, %v9031_v19 }
 0x1e1   :  { %5596 = vmatprep.subr.bf16.mxu1 %v8055_v30  ;;  %v270_v30 = vcombine.high %v9034_v20, %v9034_v20 }
 0x1e3   :  { %5556 = vmatpush1.bf16.msra.mxu0 %v8050_v31  ;;  %v411_v31 = vpack.c.bf16 %v9011_v58, %v9011_v58 }
 0x1e4   :  { %5597 = vmatpush1.bf16.msra.mxu1 %v8053_v32  ;;  %5557 = vmatprep.subr.bf16.mxu0 %v8058_v33  ;;  %v413_v32 = vpack.c.bf16 %v9014_v59, %v9014_v59  ;;  %v8131_v33 = vld [vmem:[#allocation5 + $0xe64] ss:$8 sps:$4 sm:$0xff]  }
 0x1e5   :  { %5598 = vmatprep.subr.bf16.mxu1 %v8061_v34  ;;  %v8134_v34 = vld [vmem:[#allocation5 + $0xf64] ss:$8 sps:$4 sm:$0xff]  }
 0x1e7   :  { %5558 = vmatpush1.bf16.msra.mxu0 %v8056_v36  ;;  %v8129_v36 = vld [vmem:[#allocation5 + $0xe60] ss:$8 sps:$4 sm:$0xff]  }
 0x1e8   :  { %5599 = vmatpush1.bf16.msra.mxu1 %v8059_v37  ;;  %5559 = vmatprep.subr.bf16.mxu0 %v8064_v38  ;;  %v8132_v37 = vld [vmem:[#allocation5 + $0xf60] ss:$8 sps:$4 sm:$0xff]   ;;  %v416_v38 = vpack.c.bf16 %v269_v29, %v269_v29  ;;  %v8191_v29 = vld [vmem:[#allocation5 + $0xec4] ss:$8 sps:$4 sm:$0xff]  }
 0x1e9   :  { %5600 = vmatprep.subr.bf16.mxu1 %v8067_v42  ;;  %v418_v42 = vpack.c.bf16 %v270_v30, %v270_v30  ;;  %v8194_v30 = vld [vmem:[#allocation5 + $0xfc4] ss:$8 sps:$4 sm:$0xff]  }
 0x1eb   :  { %5560 = vmatpush1.bf16.msra.mxu0 %v8062_v44 }
 0x1ec   :  { %5601 = vmatpush1.bf16.msra.mxu1 %v8065_v45  ;;  %5561 = vmatprep.subr.bf16.mxu0 %v8070_v46 }
 0x1ed   :  { %5602 = vmatprep.subr.bf16.mxu1 %v8073_v47  ;;  %v8137_v47 = vld [vmem:[#allocation5 + $0xe54] ss:$8 sps:$4 sm:$0xff]  }
 0x1ef   :  { %5562 = vmatpush1.bf16.msra.mxu0 %v8068_v48  ;;  %v8140_v48 = vld [vmem:[#allocation5 + $0xf54] ss:$8 sps:$4 sm:$0xff]  }
 0x1f0   :  { %5603 = vmatpush1.bf16.msra.mxu1 %v8071_v56  ;;  %5563 = vmatprep.subr.bf16.mxu0 %v8076_v57 }
 0x1f1   :  { %5604 = vmatprep.subr.bf16.mxu1 %v8079_v50  ;;  %v8135_v50 = vld [vmem:[#allocation5 + $0xe50] ss:$8 sps:$4 sm:$0xff]  }
 0x1f3   :  { %5564 = vmatpush2.bf16.msra.mxu0 %v8074_v51  ;;  %v8138_v51 = vld [vmem:[#allocation5 + $0xf50] ss:$8 sps:$4 sm:$0xff]  }
 0x1f4   :  { %5605 = vmatpush2.bf16.msra.mxu1 %v8077_v53  ;;  %5565 = vmatprep.subr.bf16.mxu0 %v8082_v54 }
 0x1f5   :  { %5606 = vmatprep.subr.bf16.mxu1 %v8085_v55 }
 0x1f7   :  { %5566 = vmatpush2.bf16.msra.mxu0 %v8080_v18 }
 0x1f8   :  { %5607 = vmatpush2.bf16.msra.mxu1 %v8083_v60  ;;  %5567 = vmatprep.subr.bf16.mxu0 %v8088_v61  ;;  %v8143_v60 = vld [vmem:[#allocation5 + $0xe44] ss:$8 sps:$4 sm:$0xff]  }
 0x1f9   :  { %5608 = vmatprep.subr.bf16.mxu1 %v8091_v63  ;;  %v8146_v61 = vld [vmem:[#allocation5 + $0xf44] ss:$8 sps:$4 sm:$0xff]   ;;  %v8141_v63 = vld [vmem:[#allocation5 + $0xe40] ss:$8 sps:$4 sm:$0xff]  }
 0x1fb   :  { %5568 = vmatpush2.bf16.msra.mxu0 %v8086_v0  ;;  %v8149_v0 = vld [vmem:[#allocation5 + $0xe34] ss:$8 sps:$4 sm:$0xff]  }
 0x1fc   :  { %5609 = vmatpush2.bf16.msra.mxu1 %v8089_v24  ;;  %5569 = vmatprep.subr.bf16.mxu0 %v8094_v1  ;;  %v8152_v24 = vld [vmem:[#allocation5 + $0xf34] ss:$8 sps:$4 sm:$0xff]   ;;  %v8147_v1 = vld [vmem:[#allocation5 + $0xe30] ss:$8 sps:$4 sm:$0xff]  }
 0x1fd   :  { %5610 = vmatprep.subr.bf16.mxu1 %v8097_v2  ;;  %v8150_v2 = vld [vmem:[#allocation5 + $0xf30] ss:$8 sps:$4 sm:$0xff]  }
 0x1ff   :  { %5570 = vmatpush2.bf16.msra.mxu0 %v8092_v3  ;;  %v8155_v3 = vld [vmem:[#allocation5 + $0xe24] ss:$8 sps:$4 sm:$0xff]  }
 0x200   :  { %5611 = vmatpush2.bf16.msra.mxu1 %v8095_v4  ;;  %5571 = vmatprep.subr.bf16.mxu0 %v8100_v5  ;;  %v8158_v4 = vld [vmem:[#allocation5 + $0xf24] ss:$8 sps:$4 sm:$0xff]   ;;  %v8153_v5 = vld [vmem:[#allocation5 + $0xe20] ss:$8 sps:$4 sm:$0xff]  }
 0x201   :  { %5612 = vmatprep.subr.bf16.mxu1 %v8103_v6  ;;  %v8156_v6 = vld [vmem:[#allocation5 + $0xf20] ss:$8 sps:$4 sm:$0xff]  }
 0x203   :  { %5572 = vmatpush2.bf16.msra.mxu0 %v8098_v7  ;;  %v8161_v7 = vld [vmem:[#allocation5 + $0xe14] ss:$8 sps:$4 sm:$0xff]  }
 0x204   :  { %5613 = vmatpush2.bf16.msra.mxu1 %v8101_v8  ;;  %5573 = vmatprep.subr.bf16.mxu0 %v8106_v9  ;;  %v8164_v8 = vld [vmem:[#allocation5 + $0xf14] ss:$8 sps:$4 sm:$0xff]   ;;  %v8159_v9 = vld [vmem:[#allocation5 + $0xe10] ss:$8 sps:$4 sm:$0xff]  }
 0x205   :  { %5614 = vmatprep.subr.bf16.mxu1 %v8109_v10  ;;  %v8162_v10 = vld [vmem:[#allocation5 + $0xf10] ss:$8 sps:$4 sm:$0xff]  }
 0x207   :  { %5574 = vmatpush2.bf16.msra.mxu0 %v8104_v12  ;;  %v8170_v12 = vld [vmem:[#allocation5 + $0xf04] ss:$8 sps:$4 sm:$0xff]  }
 0x208   :  { %5615 = vmatpush2.bf16.msra.mxu1 %v8107_v40  ;;  %5575 = vmatprep.subr.bf16.mxu0 %v8112_v22  ;;  %v8165_v40 = vld [vmem:[#allocation5 + $0xe00] ss:$8 sps:$4 sm:$0xff]  }
 0x209   :  { %5616 = vmatprep.subr.bf16.mxu1 %v8115_v23  ;;  %v8168_v22 = vld [vmem:[#allocation5 + $0xf00] ss:$8 sps:$4 sm:$0xff]   ;;  %v8173_v23 = vld [vmem:[#allocation5 + $0xef4] ss:$8 sps:$4 sm:$0xff]  }
 0x20b   :  { %5576 = vmatpush2.bf16.msra.mxu0 %v8110_v13  ;;  %v8171_v13 = vld [vmem:[#allocation5 + $0xef0] ss:$8 sps:$4 sm:$0xff]  }
 0x20c   :  { %5617 = vmatpush2.bf16.msra.mxu1 %v8113_v15  ;;  %5577 = vmatprep.subr.bf16.mxu0 %v8118_v16  ;;  %v8174_v15 = vld [vmem:[#allocation5 + $0xff0] ss:$8 sps:$4 sm:$0xff]   ;;  %v8179_v16 = vld [vmem:[#allocation5 + $0xee4] ss:$8 sps:$4 sm:$0xff]  }
 0x20d   :  { %5618 = vmatprep.subr.bf16.mxu1 %v8121_v17  ;;  %v8182_v17 = vld [vmem:[#allocation5 + $0xfe4] ss:$8 sps:$4 sm:$0xff]  }
 0x20f   :  { %5578 = vmatpush2.bf16.msra.mxu0 %v8116_v52  ;;  %v8177_v52 = vld [vmem:[#allocation5 + $0xee0] ss:$8 sps:$4 sm:$0xff]  }
 0x210   :  { %5619 = vmatpush2.bf16.msra.mxu1 %v8119_v25  ;;  %5629 = vmatprep.subr.bf16.mxu0 %v8125_v26  ;;  %v8180_v25 = vld [vmem:[#allocation5 + $0xfe0] ss:$8 sps:$4 sm:$0xff]   ;;  %v8185_v26 = vld [vmem:[#allocation5 + $0xed4] ss:$8 sps:$4 sm:$0xff]  }
 0x211   :  { %5670 = vmatprep.subr.bf16.mxu1 %v8128_v27  ;;  %v8188_v27 = vld [vmem:[#allocation5 + $0xfd4] ss:$8 sps:$4 sm:$0xff]  }
 0x212   :  { %v5335_v44 = vpop.f32.mrf.mxu0  ;;  %5580 = vmatmul.mubr.bf16.vlgmr.msra.gmra.mxu0 %v411_v31  ;;  %v8189_v31 = vld [vmem:[#allocation5 + $0xec0] ss:$8 sps:$4 sm:$0xff]  }
 0x213   :  { %v5376_v45 = vpop.f32.mrf.mxu1  ;;  %5621 = vmatmul.mubr.bf16.vlgmr.msra.gmra.mxu1 %v413_v32  ;;  %v5336_v46 = vadd.f32 %v5335_v44, %v9025_v14  ;;  %5630 = vmatpush1.bf16.msra.mxu0 %v8123_v28  ;;  %v8183_v28 = vld [vmem:[#allocation5 + $0xed0] ss:$8 sps:$4 sm:$0xff]   ;;  %v8192_v32 = vld [vmem:[#allocation5 + $0xfc0] ss:$8 sps:$4 sm:$0xff]  }
 0x214   :  { %5671 = vmatpush1.bf16.msra.mxu1 %v8126_v35  ;;  %v5337_v58 = vpop.f32.mrf.mxu0  ;;  %5631 = vmatprep.subr.bf16.mxu0 %v8131_v33  ;;  %v8186_v35 = vld [vmem:[#allocation5 + $0xfd0] ss:$8 sps:$4 sm:$0xff]   ;;  %v8197_v33 = vld [vmem:[#allocation5 + $0xeb4] ss:$8 sps:$4 sm:$0xff]   ;;  %v119_v44 = vld [vmem:[#allocation2 + $0x40] sm:$0xff] }
 0x215   :  { %v5378_v59 = vpop.f32.mrf.mxu1  ;;  %5672 = vmatprep.subr.bf16.mxu1 %v8134_v34  ;;  %v9045_v56 = vadd.f32 %v5376_v45, %v5336_v46  ;;  %v5338_v57 = vadd.f32 %v5337_v58, %v9028_v21  ;;  %5661 = vmatprep.mubr.bf16.mxu0 %v416_v38  ;;  %v8144_v21 = vld [vmem:[#allocation5 + $0xf40] ss:$8 sps:$4 sm:$0xff]   ;;  %v8200_v34 = vld [vmem:[#allocation5 + $0xfb4] ss:$8 sps:$4 sm:$0xff]   ;;  %v8203_v38 = vld [vmem:[#allocation5 + $0xea4] ss:$8 sps:$4 sm:$0xff]  }
 0x216   :  { %5702 = vmatprep.mubr.bf16.mxu1 %v418_v42  ;;  %v5339_v53 = vpop.f32.mrf.mxu0  ;;  %v8206_v42 = vld [vmem:[#allocation5 + $0xfa4] ss:$8 sps:$4 sm:$0xff]   ;;  %v8201_v45 = vld [vmem:[#allocation5 + $0xea0] ss:$8 sps:$4 sm:$0xff]   ;;  %v8209_v58 = vld [vmem:[#allocation5 + $0xe94] ss:$8 sps:$4 sm:$0xff]  }
 0x217   :  { %v5380_v54 = vpop.f32.mrf.mxu1  ;;  %v9048_v55 = vadd.f32 %v5378_v59, %v5338_v57  ;;  %5632 = vmatpush1.bf16.msra.mxu0 %v8129_v36  ;;  %v8195_v36 = vld [vmem:[#allocation5 + $0xeb0] ss:$8 sps:$4 sm:$0xff]   ;;  %v8204_v46 = vld [vmem:[#allocation5 + $0xfa0] ss:$8 sps:$4 sm:$0xff]   ;;  %v8212_v59 = vld [vmem:[#allocation5 + $0xf94] ss:$8 sps:$4 sm:$0xff]   ;;  %v9051_v53 = vrot.slane %v119_v44, %v8922_v49 }
 0x218   :  { %5673 = vmatpush1.bf16.msra.mxu1 %v8132_v37  ;;  %v5340_v14 = vpop.f32.mrf.mxu0  ;;  %5633 = vmatprep.subr.bf16.mxu0 %v8137_v47  ;;  %v8198_v37 = vld [vmem:[#allocation5 + $0xfb0] ss:$8 sps:$4 sm:$0xff]   ;;  %v271_v47 = vcombine.high %v119_v44, %v119_v44  ;;  %v8264_v44 = vld [vmem:[#allocation5 + $0x1004] ss:$8 sps:$4 sm:$0xff]  }
 0x219   :  { %v5381_v18 = vpop.f32.mrf.mxu1  ;;  %5674 = vmatprep.subr.bf16.mxu1 %v8140_v48  ;;  %v8207_v48 = vld [vmem:[#allocation5 + $0xe90] ss:$8 sps:$4 sm:$0xff]   ;;  %v8213_v14 = vld [vmem:[#allocation5 + $0xe80] ss:$8 sps:$4 sm:$0xff]  }
 0x21a   :  { %v8210_v57 = vld [vmem:[#allocation5 + $0xf90] ss:$8 sps:$4 sm:$0xff]   ;;  %v9054_v54 = vrot.slane %v271_v47, %v8922_v49  ;;  %v8216_v18 = vld [vmem:[#allocation5 + $0xf80] ss:$8 sps:$4 sm:$0xff]   ;;  %v8273_v47 = vld [vmem:[#allocation5 + $0x11f4] ss:$8 sps:$4 sm:$0xff]  }
 0x21b   :  { %5634 = vmatpush1.bf16.msra.mxu0 %v8135_v50  ;;  %v8215_v50 = vld [vmem:[#allocation5 + $0xe84] ss:$8 sps:$4 sm:$0xff]  }
 0x21c   :  { %5675 = vmatpush1.bf16.msra.mxu1 %v8138_v51  ;;  %5635 = vmatprep.subr.bf16.mxu0 %v8143_v60  ;;  %v8218_v51 = vld [vmem:[#allocation5 + $0xf84] ss:$8 sps:$4 sm:$0xff]   ;;  %v8222_v60 = vld [vmem:[#allocation5 + $0x1074] ss:$8 sps:$4 sm:$0xff]  }
 0x21d   :  { %5676 = vmatprep.subr.bf16.mxu1 %v8146_v61  ;;  %v8225_v61 = vld [vmem:[#allocation5 + $0x1174] ss:$8 sps:$4 sm:$0xff]  }
 0x21f   :  { %5636 = vmatpush1.bf16.msra.mxu0 %v8141_v63  ;;  %v286_v63 = vcombine.high %v9051_v53, %v9051_v53 }
 0x220   :  { %5677 = vmatpush1.bf16.msra.mxu1 %v8144_v21  ;;  %5637 = vmatprep.subr.bf16.mxu0 %v8149_v0  ;;  %v287_v21 = vcombine.high %v9054_v54, %v9054_v54  ;;  %v415_v0 = vpack.c.bf16 %v9031_v19, %v9031_v19  ;;  %v8226_v19 = vld [vmem:[#allocation5 + $0x1060] ss:$8 sps:$4 sm:$0xff]  }
 0x221   :  { %5678 = vmatprep.subr.bf16.mxu1 %v8152_v24  ;;  %v417_v24 = vpack.c.bf16 %v9034_v20, %v9034_v20  ;;  %v8229_v20 = vld [vmem:[#allocation5 + $0x1160] ss:$8 sps:$4 sm:$0xff]  }
 0x223   :  { %5638 = vmatpush1.bf16.msra.mxu0 %v8147_v1  ;;  %v8220_v1 = vld [vmem:[#allocation5 + $0x1070] ss:$8 sps:$4 sm:$0xff]  }
 0x224   :  { %5679 = vmatpush1.bf16.msra.mxu1 %v8150_v2  ;;  %5639 = vmatprep.subr.bf16.mxu0 %v8155_v3  ;;  %v8223_v2 = vld [vmem:[#allocation5 + $0x1170] ss:$8 sps:$4 sm:$0xff]   ;;  %v8228_v3 = vld [vmem:[#allocation5 + $0x1064] ss:$8 sps:$4 sm:$0xff]  }
 0x225   :  { %5680 = vmatprep.subr.bf16.mxu1 %v8158_v4  ;;  %v8231_v4 = vld [vmem:[#allocation5 + $0x1164] ss:$8 sps:$4 sm:$0xff]  }
 0x227   :  { %5640 = vmatpush1.bf16.msra.mxu0 %v8153_v5  ;;  %v420_v5 = vpack.c.bf16 %v286_v63, %v286_v63  ;;  %v8280_v63 = vld [vmem:[#allocation5 + $0x10d0] ss:$8 sps:$4 sm:$0xff]  }
 0x228   :  { %5681 = vmatpush1.bf16.msra.mxu1 %v8156_v6  ;;  %5641 = vmatprep.subr.bf16.mxu0 %v8161_v7  ;;  %v422_v6 = vpack.c.bf16 %v287_v21, %v287_v21  ;;  %v8283_v21 = vld [vmem:[#allocation5 + $0x11d0] ss:$8 sps:$4 sm:$0xff]  }
 0x229   :  { %5682 = vmatprep.subr.bf16.mxu1 %v8164_v8 }
 0x22b   :  { %5642 = vmatpush1.bf16.msra.mxu0 %v8159_v9 }
 0x22c   :  { %5683 = vmatpush1.bf16.msra.mxu1 %v8162_v10  ;;  %5643 = vmatprep.subr.bf16.mxu0 %v8167_v11 }
 0x22d   :  { %5684 = vmatprep.subr.bf16.mxu1 %v8170_v12  ;;  %v8234_v12 = vld [vmem:[#allocation5 + $0x1054] ss:$8 sps:$4 sm:$0xff]  }
 0x22f   :  { %5644 = vmatpush1.bf16.msra.mxu0 %v8165_v40  ;;  %v8237_v40 = vld [vmem:[#allocation5 + $0x1154] ss:$8 sps:$4 sm:$0xff]  }
 0x230   :  { %5685 = vmatpush1.bf16.msra.mxu1 %v8168_v22  ;;  %5645 = vmatprep.subr.bf16.mxu0 %v8173_v23 }
 0x231   :  { %5686 = vmatprep.subr.bf16.mxu1 %v8176_v41 }
 0x233   :  { %5646 = vmatpush2.bf16.msra.mxu0 %v8171_v13 }
 0x234   :  { %5687 = vmatpush2.bf16.msra.mxu1 %v8174_v15  ;;  %5647 = vmatprep.subr.bf16.mxu0 %v8179_v16  ;;  %v8235_v16 = vld [vmem:[#allocation5 + $0x1150] ss:$8 sps:$4 sm:$0xff]  }
 0x235   :  { %5688 = vmatprep.subr.bf16.mxu1 %v8182_v17 }
 0x237   :  { %5648 = vmatpush2.bf16.msra.mxu0 %v8177_v52 }
 0x238   :  { %5689 = vmatpush2.bf16.msra.mxu1 %v8180_v25  ;;  %5649 = vmatprep.subr.bf16.mxu0 %v8185_v26  ;;  %v8240_v25 = vld [vmem:[#allocation5 + $0x1044] ss:$8 sps:$4 sm:$0xff]  }
 0x239   :  { %5690 = vmatprep.subr.bf16.mxu1 %v8188_v27  ;;  %v8243_v26 = vld [vmem:[#allocation5 + $0x1144] ss:$8 sps:$4 sm:$0xff]   ;;  %v8238_v27 = vld [vmem:[#allocation5 + $0x1040] ss:$8 sps:$4 sm:$0xff]  }
 0x23b   :  { %5650 = vmatpush2.bf16.msra.mxu0 %v8183_v28  ;;  %v8246_v28 = vld [vmem:[#allocation5 + $0x1034] ss:$8 sps:$4 sm:$0xff]  }
 0x23c   :  { %5691 = vmatpush2.bf16.msra.mxu1 %v8186_v35  ;;  %5651 = vmatprep.subr.bf16.mxu0 %v8191_v29  ;;  %v8249_v35 = vld [vmem:[#allocation5 + $0x1134] ss:$8 sps:$4 sm:$0xff]   ;;  %v8244_v29 = vld [vmem:[#allocation5 + $0x1030] ss:$8 sps:$4 sm:$0xff]  }
 0x23d   :  { %5692 = vmatprep.subr.bf16.mxu1 %v8194_v30  ;;  %v8247_v30 = vld [vmem:[#allocation5 + $0x1130] ss:$8 sps:$4 sm:$0xff]  }
 0x23f   :  { %5652 = vmatpush2.bf16.msra.mxu0 %v8189_v31  ;;  %v8252_v31 = vld [vmem:[#allocation5 + $0x1024] ss:$8 sps:$4 sm:$0xff]  }
 0x240   :  { %5693 = vmatpush2.bf16.msra.mxu1 %v8192_v32  ;;  %5653 = vmatprep.subr.bf16.mxu0 %v8197_v33  ;;  %v8255_v32 = vld [vmem:[#allocation5 + $0x1124] ss:$8 sps:$4 sm:$0xff]   ;;  %v8250_v33 = vld [vmem:[#allocation5 + $0x1020] ss:$8 sps:$4 sm:$0xff]  }
 0x241   :  { %5694 = vmatprep.subr.bf16.mxu1 %v8200_v34  ;;  %v8253_v34 = vld [vmem:[#allocation5 + $0x1120] ss:$8 sps:$4 sm:$0xff]  }
 0x243   :  { %5654 = vmatpush2.bf16.msra.mxu0 %v8195_v36  ;;  %v8258_v36 = vld [vmem:[#allocation5 + $0x1014] ss:$8 sps:$4 sm:$0xff]  }
 0x244   :  { %5695 = vmatpush2.bf16.msra.mxu1 %v8198_v37  ;;  %5655 = vmatprep.subr.bf16.mxu0 %v8203_v38  ;;  %v8261_v37 = vld [vmem:[#allocation5 + $0x1114] ss:$8 sps:$4 sm:$0xff]   ;;  %v8256_v38 = vld [vmem:[#allocation5 + $0x1010] ss:$8 sps:$4 sm:$0xff]  }
 0x245   :  { %5696 = vmatprep.subr.bf16.mxu1 %v8206_v42  ;;  %v8259_v42 = vld [vmem:[#allocation5 + $0x1110] ss:$8 sps:$4 sm:$0xff]  }
 0x247   :  { %5656 = vmatpush2.bf16.msra.mxu0 %v8201_v45  ;;  %v8267_v45 = vld [vmem:[#allocation5 + $0x1104] ss:$8 sps:$4 sm:$0xff]  }
 0x248   :  { %5697 = vmatpush2.bf16.msra.mxu1 %v8204_v46  ;;  %5657 = vmatprep.subr.bf16.mxu0 %v8209_v58  ;;  %v8262_v46 = vld [vmem:[#allocation5 + $0x1000] ss:$8 sps:$4 sm:$0xff]  }
 0x249   :  { %5698 = vmatprep.subr.bf16.mxu1 %v8212_v59  ;;  %v8265_v58 = vld [vmem:[#allocation5 + $0x1100] ss:$8 sps:$4 sm:$0xff]   ;;  %v8270_v59 = vld [vmem:[#allocation5 + $0x10f4] ss:$8 sps:$4 sm:$0xff]  }
 0x24b   :  { %5658 = vmatpush2.bf16.msra.mxu0 %v8207_v48  ;;  %v8268_v48 = vld [vmem:[#allocation5 + $0x10f0] ss:$8 sps:$4 sm:$0xff]  }
 0x24c   :  { %5699 = vmatpush2.bf16.msra.mxu1 %v8210_v57  ;;  %5659 = vmatprep.subr.bf16.mxu0 %v8215_v50  ;;  %v8271_v57 = vld [vmem:[#allocation5 + $0x11f0] ss:$8 sps:$4 sm:$0xff]   ;;  %v8276_v50 = vld [vmem:[#allocation5 + $0x10e4] ss:$8 sps:$4 sm:$0xff]  }
 0x24d   :  { %5700 = vmatprep.subr.bf16.mxu1 %v8218_v51  ;;  %v8279_v51 = vld [vmem:[#allocation5 + $0x11e4] ss:$8 sps:$4 sm:$0xff]  }
 0x24f   :  { %5660 = vmatpush2.bf16.msra.mxu0 %v8213_v14  ;;  %v8274_v14 = vld [vmem:[#allocation5 + $0x10e0] ss:$8 sps:$4 sm:$0xff]  }
 0x250   :  { %5701 = vmatpush2.bf16.msra.mxu1 %v8216_v18  ;;  %5711 = vmatprep.subr.bf16.mxu0 %v8222_v60  ;;  %v8277_v18 = vld [vmem:[#allocation5 + $0x11e0] ss:$8 sps:$4 sm:$0xff]   ;;  %v8282_v60 = vld [vmem:[#allocation5 + $0x10d4] ss:$8 sps:$4 sm:$0xff]  }
 0x251   :  { %5752 = vmatprep.subr.bf16.mxu1 %v8225_v61  ;;  %v8285_v61 = vld [vmem:[#allocation5 + $0x11d4] ss:$8 sps:$4 sm:$0xff]  }
 0x252   :  { %v5417_v7 = vpop.f32.mrf.mxu0  ;;  %5662 = vmatmul.mubr.bf16.vlgmr.msra.gmra.mxu0 %v415_v0  ;;  %v8288_v0 = vld [vmem:[#allocation5 + $0x10c4] ss:$8 sps:$4 sm:$0xff]  }
 0x253   :  { %v5458_v8 = vpop.f32.mrf.mxu1  ;;  %5703 = vmatmul.mubr.bf16.vlgmr.msra.gmra.mxu1 %v417_v24  ;;  %v5418_v9 = vadd.f32 %v5417_v7, %v9045_v56  ;;  %5712 = vmatpush1.bf16.msra.mxu0 %v8220_v1  ;;  %v8232_v56 = vld [vmem:[#allocation5 + $0x1050] ss:$8 sps:$4 sm:$0xff]   ;;  %v8291_v24 = vld [vmem:[#allocation5 + $0x11c4] ss:$8 sps:$4 sm:$0xff]   ;;  %v8286_v1 = vld [vmem:[#allocation5 + $0x10c0] ss:$8 sps:$4 sm:$0xff]  }
 0x254   :  { %5753 = vmatpush1.bf16.msra.mxu1 %v8223_v2  ;;  %v5419_v10 = vpop.f32.mrf.mxu0  ;;  %5713 = vmatprep.subr.bf16.mxu0 %v8228_v3  ;;  %v8289_v2 = vld [vmem:[#allocation5 + $0x11c0] ss:$8 sps:$4 sm:$0xff]   ;;  %v8294_v3 = vld [vmem:[#allocation5 + $0x10b4] ss:$8 sps:$4 sm:$0xff]   ;;  %v8300_v7 = vld [vmem:[#allocation5 + $0x10a4] ss:$8 sps:$4 sm:$0xff]  }
 0x255   :  { %v5460_v11 = vpop.f32.mrf.mxu1  ;;  %5754 = vmatprep.subr.bf16.mxu1 %v8231_v4  ;;  %v9065_v22 = vadd.f32 %v5458_v8, %v5418_v9  ;;  %v5420_v23 = vadd.f32 %v5419_v10, %v9048_v55  ;;  %5743 = vmatprep.mubr.bf16.mxu0 %v420_v5  ;;  %v8241_v55 = vld [vmem:[#allocation5 + $0x1140] ss:$8 sps:$4 sm:$0xff]   ;;  %v8297_v4 = vld [vmem:[#allocation5 + $0x11b4] ss:$8 sps:$4 sm:$0xff]   ;;  %v8292_v5 = vld [vmem:[#allocation5 + $0x10b0] ss:$8 sps:$4 sm:$0xff]  }
 0x256   :  { %5784 = vmatprep.mubr.bf16.mxu1 %v422_v6  ;;  %v5421_v41 = vpop.f32.mrf.mxu0  ;;  %v8295_v6 = vld [vmem:[#allocation5 + $0x11b0] ss:$8 sps:$4 sm:$0xff]   ;;  %v8303_v8 = vld [vmem:[#allocation5 + $0x11a4] ss:$8 sps:$4 sm:$0xff]   ;;  %v8306_v10 = vld [vmem:[#allocation5 + $0x1094] ss:$8 sps:$4 sm:$0xff]  }
 0x257   :  { %v5462_v13 = vpop.f32.mrf.mxu1  ;;  %v9068_v15 = vadd.f32 %v5460_v11, %v5420_v23  ;;  %5714 = vmatpush1.bf16.msra.mxu0 %v8226_v19  ;;  %v120_v9 = vld [vmem:[#allocation2 + $0x48] sm:$0xff]  ;;  %v8309_v11 = vld [vmem:[#allocation5 + $0x1194] ss:$8 sps:$4 sm:$0xff]   ;;  %v8307_v23 = vld [vmem:[#allocation5 + $0x1190] ss:$8 sps:$4 sm:$0xff]  }
 0x258   :  { %5755 = vmatpush1.bf16.msra.mxu1 %v8229_v20  ;;  %v5422_v17 = vpop.f32.mrf.mxu0  ;;  %5715 = vmatprep.subr.bf16.mxu0 %v8234_v12  ;;  %v8298_v19 = vld [vmem:[#allocation5 + $0x10a0] ss:$8 sps:$4 sm:$0xff]   ;;  %v288_v12 = vcombine.high %v120_v9, %v120_v9  ;;  %v8312_v41 = vld [vmem:[#allocation5 + $0x1084] ss:$8 sps:$4 sm:$0xff]  }
 0x259   :  { %v5463_v52 = vpop.f32.mrf.mxu1  ;;  %5756 = vmatprep.subr.bf16.mxu1 %v8237_v40  ;;  %v8301_v20 = vld [vmem:[#allocation5 + $0x11a0] ss:$8 sps:$4 sm:$0xff]   ;;  %v8304_v40 = vld [vmem:[#allocation5 + $0x1090] ss:$8 sps:$4 sm:$0xff]   ;;  %v8315_v13 = vld [vmem:[#allocation5 + $0x1184] ss:$8 sps:$4 sm:$0xff]  }
 0x25a   :  { %v8310_v17 = vld [vmem:[#allocation5 + $0x1080] ss:$8 sps:$4 sm:$0xff]  }
 0x25b   :  { %5716 = vmatpush1.bf16.msra.mxu0 %v8232_v56  ;;  %v9071_v56 = vrot.slane %v120_v9, %v8922_v49  ;;  %v8313_v52 = vld [vmem:[#allocation5 + $0x1180] ss:$8 sps:$4 sm:$0xff]   ;;  %v8361_v9 = vld [vmem:[#allocation5 + $0x1204] ss:$8 sps:$4 sm:$0xff]  }
 0x25c   :  { %5757 = vmatpush1.bf16.msra.mxu1 %v8235_v16  ;;  %5717 = vmatprep.subr.bf16.mxu0 %v8240_v25  ;;  %v9074_v16 = vrot.slane %v288_v12, %v8922_v49  ;;  %v8319_v25 = vld [vmem:[#allocation5 + $0x1274] ss:$8 sps:$4 sm:$0xff]  }
 0x25d   :  { %5758 = vmatprep.subr.bf16.mxu1 %v8243_v26  ;;  %v8322_v26 = vld [vmem:[#allocation5 + $0x1374] ss:$8 sps:$4 sm:$0xff]  }
 0x25e   :  { %v8370_v12 = vld [vmem:[#allocation5 + $0x13f4] ss:$8 sps:$4 sm:$0xff]  }
 0x25f   :  { %5718 = vmatpush1.bf16.msra.mxu0 %v8238_v27  ;;  %v303_v27 = vcombine.high %v9071_v56, %v9071_v56 }
 0x260   :  { %5759 = vmatpush1.bf16.msra.mxu1 %v8241_v55  ;;  %5719 = vmatprep.subr.bf16.mxu0 %v8246_v28  ;;  %v304_v55 = vcombine.high %v9074_v16, %v9074_v16  ;;  %v419_v28 = vpack.c.bf16 %v9051_v53, %v9051_v53  ;;  %v8323_v53 = vld [vmem:[#allocation5 + $0x1260] ss:$8 sps:$4 sm:$0xff]  }
 0x261   :  { %5760 = vmatprep.subr.bf16.mxu1 %v8249_v35  ;;  %v421_v35 = vpack.c.bf16 %v9054_v54, %v9054_v54  ;;  %v8326_v54 = vld [vmem:[#allocation5 + $0x1360] ss:$8 sps:$4 sm:$0xff]  }
 0x263   :  { %5720 = vmatpush1.bf16.msra.mxu0 %v8244_v29  ;;  %v8317_v29 = vld [vmem:[#allocation5 + $0x1270] ss:$8 sps:$4 sm:$0xff]  }
 0x264   :  { %5761 = vmatpush1.bf16.msra.mxu1 %v8247_v30  ;;  %5721 = vmatprep.subr.bf16.mxu0 %v8252_v31  ;;  %v8320_v30 = vld [vmem:[#allocation5 + $0x1370] ss:$8 sps:$4 sm:$0xff]   ;;  %v8325_v31 = vld [vmem:[#allocation5 + $0x1264] ss:$8 sps:$4 sm:$0xff]  }
 0x265   :  { %5762 = vmatprep.subr.bf16.mxu1 %v8255_v32  ;;  %v8328_v32 = vld [vmem:[#allocation5 + $0x1364] ss:$8 sps:$4 sm:$0xff]  }
 0x267   :  { %5722 = vmatpush1.bf16.msra.mxu0 %v8250_v33  ;;  %v424_v33 = vpack.c.bf16 %v303_v27, %v303_v27  ;;  %v8377_v27 = vld [vmem:[#allocation5 + $0x12d0] ss:$8 sps:$4 sm:$0xff]  }
 0x268   :  { %5763 = vmatpush1.bf16.msra.mxu1 %v8253_v34  ;;  %5723 = vmatprep.subr.bf16.mxu0 %v8258_v36  ;;  %v426_v34 = vpack.c.bf16 %v304_v55, %v304_v55  ;;  %v8380_v55 = vld [vmem:[#allocation5 + $0x13d0] ss:$8 sps:$4 sm:$0xff]  }
 0x269   :  { %5764 = vmatprep.subr.bf16.mxu1 %v8261_v37 }
 0x26b   :  { %5724 = vmatpush1.bf16.msra.mxu0 %v8256_v38 }
 0x26c   :  { %5765 = vmatpush1.bf16.msra.mxu1 %v8259_v42  ;;  %5725 = vmatprep.subr.bf16.mxu0 %v8264_v44 }
 0x26d   :  { %5766 = vmatprep.subr.bf16.mxu1 %v8267_v45  ;;  %v8331_v45 = vld [vmem:[#allocation5 + $0x1254] ss:$8 sps:$4 sm:$0xff]  }
 0x26f   :  { %5726 = vmatpush1.bf16.msra.mxu0 %v8262_v46  ;;  %v8334_v46 = vld [vmem:[#allocation5 + $0x1354] ss:$8 sps:$4 sm:$0xff]  }
 0x270   :  { %5767 = vmatpush1.bf16.msra.mxu1 %v8265_v58  ;;  %5727 = vmatprep.subr.bf16.mxu0 %v8270_v59 }
 0x271   :  { %5768 = vmatprep.subr.bf16.mxu1 %v8273_v47 }
 0x273   :  { %5728 = vmatpush2.bf16.msra.mxu0 %v8268_v48 }
 0x274   :  { %5769 = vmatpush2.bf16.msra.mxu1 %v8271_v57  ;;  %5729 = vmatprep.subr.bf16.mxu0 %v8276_v50  ;;  %v8332_v50 = vld [vmem:[#allocation5 + $0x1350] ss:$8 sps:$4 sm:$0xff]  }
 0x275   :  { %5770 = vmatprep.subr.bf16.mxu1 %v8279_v51 }
 0x277   :  { %5730 = vmatpush2.bf16.msra.mxu0 %v8274_v14 }
 0x278   :  { %5771 = vmatpush2.bf16.msra.mxu1 %v8277_v18  ;;  %5731 = vmatprep.subr.bf16.mxu0 %v8282_v60  ;;  %v8337_v18 = vld [vmem:[#allocation5 + $0x1244] ss:$8 sps:$4 sm:$0xff]  }
 0x279   :  { %5772 = vmatprep.subr.bf16.mxu1 %v8285_v61  ;;  %v8340_v60 = vld [vmem:[#allocation5 + $0x1344] ss:$8 sps:$4 sm:$0xff]   ;;  %v8335_v61 = vld [vmem:[#allocation5 + $0x1240] ss:$8 sps:$4 sm:$0xff]  }
 0x27b   :  { %5732 = vmatpush2.bf16.msra.mxu0 %v8280_v63  ;;  %v8343_v63 = vld [vmem:[#allocation5 + $0x1234] ss:$8 sps:$4 sm:$0xff]  }
 0x27c   :  { %5773 = vmatpush2.bf16.msra.mxu1 %v8283_v21  ;;  %5733 = vmatprep.subr.bf16.mxu0 %v8288_v0  ;;  %v8346_v21 = vld [vmem:[#allocation5 + $0x1334] ss:$8 sps:$4 sm:$0xff]   ;;  %v8341_v0 = vld [vmem:[#allocation5 + $0x1230] ss:$8 sps:$4 sm:$0xff]  }
 0x27d   :  { %5774 = vmatprep.subr.bf16.mxu1 %v8291_v24  ;;  %v8344_v24 = vld [vmem:[#allocation5 + $0x1330] ss:$8 sps:$4 sm:$0xff]  }
 0x27f   :  { %5734 = vmatpush2.bf16.msra.mxu0 %v8286_v1  ;;  %v8349_v1 = vld [vmem:[#allocation5 + $0x1224] ss:$8 sps:$4 sm:$0xff]  }
 0x280   :  { %5775 = vmatpush2.bf16.msra.mxu1 %v8289_v2  ;;  %5735 = vmatprep.subr.bf16.mxu0 %v8294_v3  ;;  %v8352_v2 = vld [vmem:[#allocation5 + $0x1324] ss:$8 sps:$4 sm:$0xff]   ;;  %v8347_v3 = vld [vmem:[#allocation5 + $0x1220] ss:$8 sps:$4 sm:$0xff]  }
 0x281   :  { %5776 = vmatprep.subr.bf16.mxu1 %v8297_v4  ;;  %v8350_v4 = vld [vmem:[#allocation5 + $0x1320] ss:$8 sps:$4 sm:$0xff]  }
 0x283   :  { %5736 = vmatpush2.bf16.msra.mxu0 %v8292_v5  ;;  %v8355_v5 = vld [vmem:[#allocation5 + $0x1214] ss:$8 sps:$4 sm:$0xff]  }
 0x284   :  { %5777 = vmatpush2.bf16.msra.mxu1 %v8295_v6  ;;  %5737 = vmatprep.subr.bf16.mxu0 %v8300_v7  ;;  %v8358_v6 = vld [vmem:[#allocation5 + $0x1314] ss:$8 sps:$4 sm:$0xff]   ;;  %v8353_v7 = vld [vmem:[#allocation5 + $0x1210] ss:$8 sps:$4 sm:$0xff]  }
 0x285   :  { %5778 = vmatprep.subr.bf16.mxu1 %v8303_v8  ;;  %v8356_v8 = vld [vmem:[#allocation5 + $0x1310] ss:$8 sps:$4 sm:$0xff]  }
 0x287   :  { %5738 = vmatpush2.bf16.msra.mxu0 %v8298_v19  ;;  %v8364_v19 = vld [vmem:[#allocation5 + $0x1304] ss:$8 sps:$4 sm:$0xff]  }
 0x288   :  { %5779 = vmatpush2.bf16.msra.mxu1 %v8301_v20  ;;  %5739 = vmatprep.subr.bf16.mxu0 %v8306_v10  ;;  %v8359_v20 = vld [vmem:[#allocation5 + $0x1200] ss:$8 sps:$4 sm:$0xff]  }
 0x289   :  { %5780 = vmatprep.subr.bf16.mxu1 %v8309_v11  ;;  %v8362_v10 = vld [vmem:[#allocation5 + $0x1300] ss:$8 sps:$4 sm:$0xff]   ;;  %v8367_v11 = vld [vmem:[#allocation5 + $0x12f4] ss:$8 sps:$4 sm:$0xff]  }
 0x28b   :  { %5740 = vmatpush2.bf16.msra.mxu0 %v8304_v40  ;;  %v8365_v40 = vld [vmem:[#allocation5 + $0x12f0] ss:$8 sps:$4 sm:$0xff]  }
 0x28c   :  { %5781 = vmatpush2.bf16.msra.mxu1 %v8307_v23  ;;  %5741 = vmatprep.subr.bf16.mxu0 %v8312_v41  ;;  %v8368_v23 = vld [vmem:[#allocation5 + $0x13f0] ss:$8 sps:$4 sm:$0xff]   ;;  %v8373_v41 = vld [vmem:[#allocation5 + $0x12e4] ss:$8 sps:$4 sm:$0xff]  }
 0x28d   :  { %5782 = vmatprep.subr.bf16.mxu1 %v8315_v13  ;;  %v8376_v13 = vld [vmem:[#allocation5 + $0x13e4] ss:$8 sps:$4 sm:$0xff]  }
 0x28f   :  { %5742 = vmatpush2.bf16.msra.mxu0 %v8310_v17  ;;  %v8371_v17 = vld [vmem:[#allocation5 + $0x12e0] ss:$8 sps:$4 sm:$0xff]  }
 0x290   :  { %5783 = vmatpush2.bf16.msra.mxu1 %v8313_v52  ;;  %5793 = vmatprep.subr.bf16.mxu0 %v8319_v25  ;;  %v8374_v52 = vld [vmem:[#allocation5 + $0x13e0] ss:$8 sps:$4 sm:$0xff]   ;;  %v8379_v25 = vld [vmem:[#allocation5 + $0x12d4] ss:$8 sps:$4 sm:$0xff]  }
 0x291   :  { %5834 = vmatprep.subr.bf16.mxu1 %v8322_v26  ;;  %v8382_v26 = vld [vmem:[#allocation5 + $0x13d4] ss:$8 sps:$4 sm:$0xff]  }
 0x292   :  { %v5499_v36 = vpop.f32.mrf.mxu0  ;;  %5744 = vmatmul.mubr.bf16.vlgmr.msra.gmra.mxu0 %v419_v28  ;;  %v8385_v28 = vld [vmem:[#allocation5 + $0x12c4] ss:$8 sps:$4 sm:$0xff]  }
 0x293   :  { %v5540_v37 = vpop.f32.mrf.mxu1  ;;  %5785 = vmatmul.mubr.bf16.vlgmr.msra.gmra.mxu1 %v421_v35  ;;  %v5500_v38 = vadd.f32 %v5499_v36, %v9065_v22  ;;  %5794 = vmatpush1.bf16.msra.mxu0 %v8317_v29  ;;  %v8329_v22 = vld [vmem:[#allocation5 + $0x1250] ss:$8 sps:$4 sm:$0xff]   ;;  %v8388_v35 = vld [vmem:[#allocation5 + $0x13c4] ss:$8 sps:$4 sm:$0xff]   ;;  %v8383_v29 = vld [vmem:[#allocation5 + $0x12c0] ss:$8 sps:$4 sm:$0xff]  }
 0x294   :  { %5835 = vmatpush1.bf16.msra.mxu1 %v8320_v30  ;;  %v5501_v42 = vpop.f32.mrf.mxu0  ;;  %5795 = vmatprep.subr.bf16.mxu0 %v8325_v31  ;;  %v8386_v30 = vld [vmem:[#allocation5 + $0x13c0] ss:$8 sps:$4 sm:$0xff]   ;;  %v8391_v31 = vld [vmem:[#allocation5 + $0x12b4] ss:$8 sps:$4 sm:$0xff]   ;;  %v8397_v36 = vld [vmem:[#allocation5 + $0x12a4] ss:$8 sps:$4 sm:$0xff]  }
 0x295   :  { %v5542_v44 = vpop.f32.mrf.mxu1  ;;  %5836 = vmatprep.subr.bf16.mxu1 %v8328_v32  ;;  %v9085_v58 = vadd.f32 %v5540_v37, %v5500_v38  ;;  %v5502_v59 = vadd.f32 %v5501_v42, %v9068_v15  ;;  %5825 = vmatprep.mubr.bf16.mxu0 %v424_v33  ;;  %v8338_v15 = vld [vmem:[#allocation5 + $0x1340] ss:$8 sps:$4 sm:$0xff]   ;;  %v8394_v32 = vld [vmem:[#allocation5 + $0x13b4] ss:$8 sps:$4 sm:$0xff]   ;;  %v8389_v33 = vld [vmem:[#allocation5 + $0x12b0] ss:$8 sps:$4 sm:$0xff]  }
 0x296   :  { %5866 = vmatprep.mubr.bf16.mxu1 %v426_v34  ;;  %v5503_v47 = vpop.f32.mrf.mxu0  ;;  %v8392_v34 = vld [vmem:[#allocation5 + $0x13b0] ss:$8 sps:$4 sm:$0xff]   ;;  %v8400_v37 = vld [vmem:[#allocation5 + $0x13a4] ss:$8 sps:$4 sm:$0xff]   ;;  %v8403_v42 = vld [vmem:[#allocation5 + $0x1294] ss:$8 sps:$4 sm:$0xff]  }
 0x297   :  { %v5544_v48 = vpop.f32.mrf.mxu1  ;;  %v9088_v57 = vadd.f32 %v5542_v44, %v5502_v59  ;;  %5796 = vmatpush1.bf16.msra.mxu0 %v8323_v53  ;;  %v121_v38 = vld [vmem:[#allocation2 + $0x50] sm:$0xff]  ;;  %v8395_v53 = vld [vmem:[#allocation5 + $0x12a0] ss:$8 sps:$4 sm:$0xff]   ;;  %v8409_v47 = vld [vmem:[#allocation5 + $0x1284] ss:$8 sps:$4 sm:$0xff]  }
 0x298   :  { %5837 = vmatpush1.bf16.msra.mxu1 %v8326_v54  ;;  %v5504_v51 = vpop.f32.mrf.mxu0  ;;  %5797 = vmatprep.subr.bf16.mxu0 %v8331_v45  ;;  %v8398_v54 = vld [vmem:[#allocation5 + $0x13a0] ss:$8 sps:$4 sm:$0xff]   ;;  %v8406_v44 = vld [vmem:[#allocation5 + $0x1394] ss:$8 sps:$4 sm:$0xff]   ;;  %v305_v45 = vcombine.high %v121_v38, %v121_v38  ;;  %v8404_v59 = vld [vmem:[#allocation5 + $0x1390] ss:$8 sps:$4 sm:$0xff]  }
 0x299   :  { %v5545_v14 = vpop.f32.mrf.mxu1  ;;  %5838 = vmatprep.subr.bf16.mxu1 %v8334_v46  ;;  %v8401_v46 = vld [vmem:[#allocation5 + $0x1290] ss:$8 sps:$4 sm:$0xff]   ;;  %v8412_v48 = vld [vmem:[#allocation5 + $0x1384] ss:$8 sps:$4 sm:$0xff]   ;;  %v8407_v51 = vld [vmem:[#allocation5 + $0x1280] ss:$8 sps:$4 sm:$0xff]  }
 0x29a   :  { %v8410_v14 = vld [vmem:[#allocation5 + $0x1380] ss:$8 sps:$4 sm:$0xff]  }
 0x29b   :  { %5798 = vmatpush1.bf16.msra.mxu0 %v8329_v22  ;;  %v9091_v22 = vrot.slane %v121_v38, %v8922_v49  ;;  %v8458_v38 = vld [vmem:[#allocation5 + $0x1404] ss:$8 sps:$4 sm:$0xff]  }
 0x29c   :  { %5839 = vmatpush1.bf16.msra.mxu1 %v8332_v50  ;;  %5799 = vmatprep.subr.bf16.mxu0 %v8337_v18  ;;  %v9094_v50 = vrot.slane %v305_v45, %v8922_v49  ;;  %v8416_v18 = vld [vmem:[#allocation5 + $0x1474] ss:$8 sps:$4 sm:$0xff]  }
 0x29d   :  { %5840 = vmatprep.subr.bf16.mxu1 %v8340_v60  ;;  %v8419_v60 = vld [vmem:[#allocation5 + $0x1574] ss:$8 sps:$4 sm:$0xff]  }
 0x29e   :  { %v8467_v45 = vld [vmem:[#allocation5 + $0x15f4] ss:$8 sps:$4 sm:$0xff]  }
 0x29f   :  { %5800 = vmatpush1.bf16.msra.mxu0 %v8335_v61  ;;  %v320_v61 = vcombine.high %v9091_v22, %v9091_v22 }
 0x2a0   :  { %5841 = vmatpush1.bf16.msra.mxu1 %v8338_v15  ;;  %5801 = vmatprep.subr.bf16.mxu0 %v8343_v63  ;;  %v321_v15 = vcombine.high %v9094_v50, %v9094_v50  ;;  %v423_v63 = vpack.c.bf16 %v9071_v56, %v9071_v56  ;;  %v8420_v56 = vld [vmem:[#allocation5 + $0x1460] ss:$8 sps:$4 sm:$0xff]  }
 0x2a1   :  { %5842 = vmatprep.subr.bf16.mxu1 %v8346_v21  ;;  %v425_v21 = vpack.c.bf16 %v9074_v16, %v9074_v16  ;;  %v8423_v16 = vld [vmem:[#allocation5 + $0x1560] ss:$8 sps:$4 sm:$0xff]  }
 0x2a3   :  { %5802 = vmatpush1.bf16.msra.mxu0 %v8341_v0  ;;  %v8414_v0 = vld [vmem:[#allocation5 + $0x1470] ss:$8 sps:$4 sm:$0xff]  }
 0x2a4   :  { %5843 = vmatpush1.bf16.msra.mxu1 %v8344_v24  ;;  %5803 = vmatprep.subr.bf16.mxu0 %v8349_v1  ;;  %v8417_v24 = vld [vmem:[#allocation5 + $0x1570] ss:$8 sps:$4 sm:$0xff]   ;;  %v8422_v1 = vld [vmem:[#allocation5 + $0x1464] ss:$8 sps:$4 sm:$0xff]  }
 0x2a5   :  { %5844 = vmatprep.subr.bf16.mxu1 %v8352_v2  ;;  %v8425_v2 = vld [vmem:[#allocation5 + $0x1564] ss:$8 sps:$4 sm:$0xff]  }
 0x2a7   :  { %5804 = vmatpush1.bf16.msra.mxu0 %v8347_v3  ;;  %v428_v3 = vpack.c.bf16 %v320_v61, %v320_v61  ;;  %v8474_v61 = vld [vmem:[#allocation5 + $0x14d0] ss:$8 sps:$4 sm:$0xff]  }
 0x2a8   :  { %5845 = vmatpush1.bf16.msra.mxu1 %v8350_v4  ;;  %5805 = vmatprep.subr.bf16.mxu0 %v8355_v5  ;;  %v430_v4 = vpack.c.bf16 %v321_v15, %v321_v15  ;;  %v8477_v15 = vld [vmem:[#allocation5 + $0x15d0] ss:$8 sps:$4 sm:$0xff]  }
 0x2a9   :  { %5846 = vmatprep.subr.bf16.mxu1 %v8358_v6 }
 0x2ab   :  { %5806 = vmatpush1.bf16.msra.mxu0 %v8353_v7 }
 0x2ac   :  { %5847 = vmatpush1.bf16.msra.mxu1 %v8356_v8  ;;  %5807 = vmatprep.subr.bf16.mxu0 %v8361_v9 }
 0x2ad   :  { %5848 = vmatprep.subr.bf16.mxu1 %v8364_v19  ;;  %v8428_v19 = vld [vmem:[#allocation5 + $0x1454] ss:$8 sps:$4 sm:$0xff]  }
 0x2af   :  { %5808 = vmatpush1.bf16.msra.mxu0 %v8359_v20  ;;  %v8431_v20 = vld [vmem:[#allocation5 + $0x1554] ss:$8 sps:$4 sm:$0xff]  }
 0x2b0   :  { %5849 = vmatpush1.bf16.msra.mxu1 %v8362_v10  ;;  %5809 = vmatprep.subr.bf16.mxu0 %v8367_v11 }
 0x2b1   :  { %5850 = vmatprep.subr.bf16.mxu1 %v8370_v12 }
 0x2b3   :  { %5810 = vmatpush2.bf16.msra.mxu0 %v8365_v40 }
 0x2b4   :  { %5851 = vmatpush2.bf16.msra.mxu1 %v8368_v23  ;;  %5811 = vmatprep.subr.bf16.mxu0 %v8373_v41  ;;  %v8429_v41 = vld [vmem:[#allocation5 + $0x1550] ss:$8 sps:$4 sm:$0xff]  }
 0x2b5   :  { %5852 = vmatprep.subr.bf16.mxu1 %v8376_v13 }
 0x2b7   :  { %5812 = vmatpush2.bf16.msra.mxu0 %v8371_v17 }
 0x2b8   :  { %5853 = vmatpush2.bf16.msra.mxu1 %v8374_v52  ;;  %5813 = vmatprep.subr.bf16.mxu0 %v8379_v25  ;;  %v8434_v52 = vld [vmem:[#allocation5 + $0x1444] ss:$8 sps:$4 sm:$0xff]  }
 0x2b9   :  { %5854 = vmatprep.subr.bf16.mxu1 %v8382_v26  ;;  %v8437_v25 = vld [vmem:[#allocation5 + $0x1544] ss:$8 sps:$4 sm:$0xff]   ;;  %v8432_v26 = vld [vmem:[#allocation5 + $0x1440] ss:$8 sps:$4 sm:$0xff]  }
 0x2bb   :  { %5814 = vmatpush2.bf16.msra.mxu0 %v8377_v27  ;;  %v8440_v27 = vld [vmem:[#allocation5 + $0x1434] ss:$8 sps:$4 sm:$0xff]  }
 0x2bc   :  { %5855 = vmatpush2.bf16.msra.mxu1 %v8380_v55  ;;  %5815 = vmatprep.subr.bf16.mxu0 %v8385_v28  ;;  %v8443_v55 = vld [vmem:[#allocation5 + $0x1534] ss:$8 sps:$4 sm:$0xff]   ;;  %v8438_v28 = vld [vmem:[#allocation5 + $0x1430] ss:$8 sps:$4 sm:$0xff]  }
 0x2bd   :  { %5856 = vmatprep.subr.bf16.mxu1 %v8388_v35  ;;  %v8441_v35 = vld [vmem:[#allocation5 + $0x1530] ss:$8 sps:$4 sm:$0xff]  }
 0x2bf   :  { %5816 = vmatpush2.bf16.msra.mxu0 %v8383_v29  ;;  %v8446_v29 = vld [vmem:[#allocation5 + $0x1424] ss:$8 sps:$4 sm:$0xff]  }
 0x2c0   :  { %5857 = vmatpush2.bf16.msra.mxu1 %v8386_v30  ;;  %5817 = vmatprep.subr.bf16.mxu0 %v8391_v31  ;;  %v8449_v30 = vld [vmem:[#allocation5 + $0x1524] ss:$8 sps:$4 sm:$0xff]   ;;  %v8444_v31 = vld [vmem:[#allocation5 + $0x1420] ss:$8 sps:$4 sm:$0xff]  }
 0x2c1   :  { %5858 = vmatprep.subr.bf16.mxu1 %v8394_v32  ;;  %v8447_v32 = vld [vmem:[#allocation5 + $0x1520] ss:$8 sps:$4 sm:$0xff]  }
 0x2c3   :  { %5818 = vmatpush2.bf16.msra.mxu0 %v8389_v33  ;;  %v8452_v33 = vld [vmem:[#allocation5 + $0x1414] ss:$8 sps:$4 sm:$0xff]  }
 0x2c4   :  { %5859 = vmatpush2.bf16.msra.mxu1 %v8392_v34  ;;  %5819 = vmatprep.subr.bf16.mxu0 %v8397_v36  ;;  %v8455_v34 = vld [vmem:[#allocation5 + $0x1514] ss:$8 sps:$4 sm:$0xff]   ;;  %v8450_v36 = vld [vmem:[#allocation5 + $0x1410] ss:$8 sps:$4 sm:$0xff]  }
 0x2c5   :  { %5860 = vmatprep.subr.bf16.mxu1 %v8400_v37  ;;  %v8453_v37 = vld [vmem:[#allocation5 + $0x1510] ss:$8 sps:$4 sm:$0xff]  }
 0x2c7   :  { %5820 = vmatpush2.bf16.msra.mxu0 %v8395_v53  ;;  %v8461_v53 = vld [vmem:[#allocation5 + $0x1504] ss:$8 sps:$4 sm:$0xff]  }
 0x2c8   :  { %5861 = vmatpush2.bf16.msra.mxu1 %v8398_v54  ;;  %5821 = vmatprep.subr.bf16.mxu0 %v8403_v42  ;;  %v8456_v54 = vld [vmem:[#allocation5 + $0x1400] ss:$8 sps:$4 sm:$0xff]  }
 0x2c9   :  { %5862 = vmatprep.subr.bf16.mxu1 %v8406_v44  ;;  %v8459_v42 = vld [vmem:[#allocation5 + $0x1500] ss:$8 sps:$4 sm:$0xff]   ;;  %v8464_v44 = vld [vmem:[#allocation5 + $0x14f4] ss:$8 sps:$4 sm:$0xff]  }
 0x2cb   :  { %5822 = vmatpush2.bf16.msra.mxu0 %v8401_v46  ;;  %v8462_v46 = vld [vmem:[#allocation5 + $0x14f0] ss:$8 sps:$4 sm:$0xff]  }
 0x2cc   :  { %5863 = vmatpush2.bf16.msra.mxu1 %v8404_v59  ;;  %5823 = vmatprep.subr.bf16.mxu0 %v8409_v47  ;;  %v8465_v59 = vld [vmem:[#allocation5 + $0x15f0] ss:$8 sps:$4 sm:$0xff]   ;;  %v8470_v47 = vld [vmem:[#allocation5 + $0x14e4] ss:$8 sps:$4 sm:$0xff]  }
 0x2cd   :  { %5864 = vmatprep.subr.bf16.mxu1 %v8412_v48  ;;  %v8473_v48 = vld [vmem:[#allocation5 + $0x15e4] ss:$8 sps:$4 sm:$0xff]  }
 0x2cf   :  { %5824 = vmatpush2.bf16.msra.mxu0 %v8407_v51  ;;  %v8468_v51 = vld [vmem:[#allocation5 + $0x14e0] ss:$8 sps:$4 sm:$0xff]  }
 0x2d0   :  { %5865 = vmatpush2.bf16.msra.mxu1 %v8410_v14  ;;  %5875 = vmatprep.subr.bf16.mxu0 %v8416_v18  ;;  %v8471_v14 = vld [vmem:[#allocation5 + $0x15e0] ss:$8 sps:$4 sm:$0xff]   ;;  %v8476_v18 = vld [vmem:[#allocation5 + $0x14d4] ss:$8 sps:$4 sm:$0xff]  }
 0x2d1   :  { %5916 = vmatprep.subr.bf16.mxu1 %v8419_v60  ;;  %v8479_v60 = vld [vmem:[#allocation5 + $0x15d4] ss:$8 sps:$4 sm:$0xff]  }
 0x2d2   :  { %v5581_v5 = vpop.f32.mrf.mxu0  ;;  %5826 = vmatmul.mubr.bf16.vlgmr.msra.gmra.mxu0 %v423_v63  ;;  %v8482_v63 = vld [vmem:[#allocation5 + $0x14c4] ss:$8 sps:$4 sm:$0xff]  }
 0x2d3   :  { %v5622_v6 = vpop.f32.mrf.mxu1  ;;  %5867 = vmatmul.mubr.bf16.vlgmr.msra.gmra.mxu1 %v425_v21  ;;  %v5582_v7 = vadd.f32 %v5581_v5, %v9085_v58  ;;  %5876 = vmatpush1.bf16.msra.mxu0 %v8414_v0  ;;  %v8426_v58 = vld [vmem:[#allocation5 + $0x1450] ss:$8 sps:$4 sm:$0xff]   ;;  %v8485_v21 = vld [vmem:[#allocation5 + $0x15c4] ss:$8 sps:$4 sm:$0xff]   ;;  %v8480_v0 = vld [vmem:[#allocation5 + $0x14c0] ss:$8 sps:$4 sm:$0xff]  }
 0x2d4   :  { %5917 = vmatpush1.bf16.msra.mxu1 %v8417_v24  ;;  %v5583_v8 = vpop.f32.mrf.mxu0  ;;  %5877 = vmatprep.subr.bf16.mxu0 %v8422_v1  ;;  %v8483_v24 = vld [vmem:[#allocation5 + $0x15c0] ss:$8 sps:$4 sm:$0xff]   ;;  %v8488_v1 = vld [vmem:[#allocation5 + $0x14b4] ss:$8 sps:$4 sm:$0xff]   ;;  %v8494_v5 = vld [vmem:[#allocation5 + $0x14a4] ss:$8 sps:$4 sm:$0xff]  }
 0x2d5   :  { %v5624_v9 = vpop.f32.mrf.mxu1  ;;  %5918 = vmatprep.subr.bf16.mxu1 %v8425_v2  ;;  %v9105_v10 = vadd.f32 %v5622_v6, %v5582_v7  ;;  %v5584_v11 = vadd.f32 %v5583_v8, %v9088_v57  ;;  %5907 = vmatprep.mubr.bf16.mxu0 %v428_v3  ;;  %v8435_v57 = vld [vmem:[#allocation5 + $0x1540] ss:$8 sps:$4 sm:$0xff]   ;;  %v8491_v2 = vld [vmem:[#allocation5 + $0x15b4] ss:$8 sps:$4 sm:$0xff]   ;;  %v8486_v3 = vld [vmem:[#allocation5 + $0x14b0] ss:$8 sps:$4 sm:$0xff]  }
 0x2d6   :  { %5948 = vmatprep.mubr.bf16.mxu1 %v430_v4  ;;  %v5585_v12 = vpop.f32.mrf.mxu0  ;;  %v8489_v4 = vld [vmem:[#allocation5 + $0x15b0] ss:$8 sps:$4 sm:$0xff]   ;;  %v8497_v6 = vld [vmem:[#allocation5 + $0x15a4] ss:$8 sps:$4 sm:$0xff]   ;;  %v8500_v8 = vld [vmem:[#allocation5 + $0x1494] ss:$8 sps:$4 sm:$0xff]  }
 0x2d7   :  { %v5626_v40 = vpop.f32.mrf.mxu1  ;;  %v9108_v23 = vadd.f32 %v5624_v9, %v5584_v11  ;;  %5878 = vmatpush1.bf16.msra.mxu0 %v8420_v56  ;;  %v122_v7 = vld [vmem:[#allocation2 + $0x58] sm:$0xff]  ;;  %v8492_v56 = vld [vmem:[#allocation5 + $0x14a0] ss:$8 sps:$4 sm:$0xff]   ;;  %v8506_v12 = vld [vmem:[#allocation5 + $0x1484] ss:$8 sps:$4 sm:$0xff]  }
 0x2d8   :  { %5919 = vmatpush1.bf16.msra.mxu1 %v8423_v16  ;;  %v5586_v13 = vpop.f32.mrf.mxu0  ;;  %5879 = vmatprep.subr.bf16.mxu0 %v8428_v19  ;;  %v8495_v16 = vld [vmem:[#allocation5 + $0x15a0] ss:$8 sps:$4 sm:$0xff]   ;;  %v8503_v9 = vld [vmem:[#allocation5 + $0x1594] ss:$8 sps:$4 sm:$0xff]   ;;  %v322_v19 = vcombine.high %v122_v7, %v122_v7  ;;  %v8501_v11 = vld [vmem:[#allocation5 + $0x1590] ss:$8 sps:$4 sm:$0xff]  }
 0x2d9   :  { %v5627_v17 = vpop.f32.mrf.mxu1  ;;  %5920 = vmatprep.subr.bf16.mxu1 %v8431_v20  ;;  %v8498_v20 = vld [vmem:[#allocation5 + $0x1490] ss:$8 sps:$4 sm:$0xff]   ;;  %v8509_v40 = vld [vmem:[#allocation5 + $0x1584] ss:$8 sps:$4 sm:$0xff]   ;;  %v8504_v13 = vld [vmem:[#allocation5 + $0x1480] ss:$8 sps:$4 sm:$0xff]  }
 0x2da   :  { %v8507_v17 = vld [vmem:[#allocation5 + $0x1580] ss:$8 sps:$4 sm:$0xff]  }
 0x2db   :  { %5880 = vmatpush1.bf16.msra.mxu0 %v8426_v58  ;;  %v9111_v58 = vrot.slane %v122_v7, %v8922_v49  ;;  %v8558_v7 = vld [vmem:[#allocation5 + $0x1704] ss:$8 sps:$4 sm:$0xff]  }
 0x2dc   :  { %5921 = vmatpush1.bf16.msra.mxu1 %v8429_v41  ;;  %5881 = vmatprep.subr.bf16.mxu0 %v8434_v52  ;;  %v9114_v41 = vrot.slane %v322_v19, %v8922_v49  ;;  %v8513_v52 = vld [vmem:[#allocation5 + $0x1674] ss:$8 sps:$4 sm:$0xff]   ;;  %v429_v49 = vpack.c.bf16 %v9094_v50, %v9094_v50  ;;  %v8520_v50 = vld [vmem:[#allocation5 + $0x1760] ss:$8 sps:$4 sm:$0xff]   ;;  %v8559_v19 = vld [vmem:[#allocation5 + $0x16f0] ss:$8 sps:$4 sm:$0xff]  }
 0x2dd   :  { %5922 = vmatprep.subr.bf16.mxu1 %v8437_v25  ;;  %v8516_v25 = vld [vmem:[#allocation5 + $0x1774] ss:$8 sps:$4 sm:$0xff]  }
 0x2df   :  { %5882 = vmatpush1.bf16.msra.mxu0 %v8432_v26  ;;  %v337_v26 = vcombine.high %v9111_v58, %v9111_v58 }
 0x2e0   :  { %5923 = vmatpush1.bf16.msra.mxu1 %v8435_v57  ;;  %5883 = vmatprep.subr.bf16.mxu0 %v8440_v27  ;;  %v338_v57 = vcombine.high %v9114_v41, %v9114_v41  ;;  %v427_v27 = vpack.c.bf16 %v9091_v22, %v9091_v22  ;;  %v8517_v22 = vld [vmem:[#allocation5 + $0x1660] ss:$8 sps:$4 sm:$0xff]  }
 0x2e1   :  { %5924 = vmatprep.subr.bf16.mxu1 %v8443_v55  ;;  %v8511_v55 = vld [vmem:[#allocation5 + $0x1670] ss:$8 sps:$4 sm:$0xff]  }
 0x2e3   :  { %5884 = vmatpush1.bf16.msra.mxu0 %v8438_v28  ;;  %v8514_v28 = vld [vmem:[#allocation5 + $0x1770] ss:$8 sps:$4 sm:$0xff]  }
 0x2e4   :  { %5925 = vmatpush1.bf16.msra.mxu1 %v8441_v35  ;;  %5885 = vmatprep.subr.bf16.mxu0 %v8446_v29  ;;  %v8519_v35 = vld [vmem:[#allocation5 + $0x1664] ss:$8 sps:$4 sm:$0xff]  }
 0x2e5   :  { %5926 = vmatprep.subr.bf16.mxu1 %v8449_v30  ;;  %v8522_v29 = vld [vmem:[#allocation5 + $0x1764] ss:$8 sps:$4 sm:$0xff]   ;;  %v432_v30 = vpack.c.bf16 %v337_v26, %v337_v26  ;;  %v8574_v26 = vld [vmem:[#allocation5 + $0x17d0] ss:$8 sps:$4 sm:$0xff]  }
 0x2e7   :  { %5886 = vmatpush1.bf16.msra.mxu0 %v8444_v31  ;;  %v434_v31 = vpack.c.bf16 %v338_v57, %v338_v57  ;;  %v8579_v57 = vld [vmem:[#allocation5 + $0x16c4] ss:$8 sps:$4 sm:$0xff]  }
 0x2e8   :  { %5927 = vmatpush1.bf16.msra.mxu1 %v8447_v32  ;;  %5887 = vmatprep.subr.bf16.mxu0 %v8452_v33 }
 0x2e9   :  { %5928 = vmatprep.subr.bf16.mxu1 %v8455_v34 }
 0x2eb   :  { %5888 = vmatpush1.bf16.msra.mxu0 %v8450_v36 }
 0x2ec   :  { %5929 = vmatpush1.bf16.msra.mxu1 %v8453_v37  ;;  %5889 = vmatprep.subr.bf16.mxu0 %v8458_v38  ;;  %v8525_v38 = vld [vmem:[#allocation5 + $0x1654] ss:$8 sps:$4 sm:$0xff]  }
 0x2ed   :  { %5930 = vmatprep.subr.bf16.mxu1 %v8461_v53  ;;  %v8528_v53 = vld [vmem:[#allocation5 + $0x1754] ss:$8 sps:$4 sm:$0xff]  }
 0x2ef   :  { %5890 = vmatpush1.bf16.msra.mxu0 %v8456_v54 }
 0x2f0   :  { %5931 = vmatpush1.bf16.msra.mxu1 %v8459_v42  ;;  %5891 = vmatprep.subr.bf16.mxu0 %v8464_v44 }
 0x2f1   :  { %5932 = vmatprep.subr.bf16.mxu1 %v8467_v45 }
 0x2f3   :  { %5892 = vmatpush2.bf16.msra.mxu0 %v8462_v46 }
 0x2f4   :  { %5933 = vmatpush2.bf16.msra.mxu1 %v8465_v59  ;;  %5893 = vmatprep.subr.bf16.mxu0 %v8470_v47  ;;  %v8526_v59 = vld [vmem:[#allocation5 + $0x1750] ss:$8 sps:$4 sm:$0xff]  }
 0x2f5   :  { %5934 = vmatprep.subr.bf16.mxu1 %v8473_v48 }
 0x2f7   :  { %5894 = vmatpush2.bf16.msra.mxu0 %v8468_v51  ;;  %v8531_v51 = vld [vmem:[#allocation5 + $0x1644] ss:$8 sps:$4 sm:$0xff]  }
 0x2f8   :  { %5935 = vmatpush2.bf16.msra.mxu1 %v8471_v14  ;;  %5895 = vmatprep.subr.bf16.mxu0 %v8476_v18  ;;  %v8534_v14 = vld [vmem:[#allocation5 + $0x1744] ss:$8 sps:$4 sm:$0xff]   ;;  %v8529_v18 = vld [vmem:[#allocation5 + $0x1640] ss:$8 sps:$4 sm:$0xff]  }
 0x2f9   :  { %5936 = vmatprep.subr.bf16.mxu1 %v8479_v60  ;;  %v8537_v60 = vld [vmem:[#allocation5 + $0x1634] ss:$8 sps:$4 sm:$0xff]  }
 0x2fb   :  { %5896 = vmatpush2.bf16.msra.mxu0 %v8474_v61  ;;  %v8540_v61 = vld [vmem:[#allocation5 + $0x1734] ss:$8 sps:$4 sm:$0xff]  }
 0x2fc   :  { %5937 = vmatpush2.bf16.msra.mxu1 %v8477_v15  ;;  %5897 = vmatprep.subr.bf16.mxu0 %v8482_v63  ;;  %v8535_v15 = vld [vmem:[#allocation5 + $0x1630] ss:$8 sps:$4 sm:$0xff]  }
 0x2fd   :  { %5938 = vmatprep.subr.bf16.mxu1 %v8485_v21  ;;  %v8538_v63 = vld [vmem:[#allocation5 + $0x1730] ss:$8 sps:$4 sm:$0xff]   ;;  %v8543_v21 = vld [vmem:[#allocation5 + $0x1624] ss:$8 sps:$4 sm:$0xff]  }
 0x2ff   :  { %5898 = vmatpush2.bf16.msra.mxu0 %v8480_v0  ;;  %v8546_v0 = vld [vmem:[#allocation5 + $0x1724] ss:$8 sps:$4 sm:$0xff]  }
 0x300   :  { %5939 = vmatpush2.bf16.msra.mxu1 %v8483_v24  ;;  %5899 = vmatprep.subr.bf16.mxu0 %v8488_v1  ;;  %v8541_v24 = vld [vmem:[#allocation5 + $0x1620] ss:$8 sps:$4 sm:$0xff]  }
 0x301   :  { %5940 = vmatprep.subr.bf16.mxu1 %v8491_v2  ;;  %v8544_v1 = vld [vmem:[#allocation5 + $0x1720] ss:$8 sps:$4 sm:$0xff]   ;;  %v8549_v2 = vld [vmem:[#allocation5 + $0x1614] ss:$8 sps:$4 sm:$0xff]  }
 0x303   :  { %5900 = vmatpush2.bf16.msra.mxu0 %v8486_v3  ;;  %v8552_v3 = vld [vmem:[#allocation5 + $0x1714] ss:$8 sps:$4 sm:$0xff]  }
 0x304   :  { %5941 = vmatpush2.bf16.msra.mxu1 %v8489_v4  ;;  %5901 = vmatprep.subr.bf16.mxu0 %v8494_v5  ;;  %v8547_v4 = vld [vmem:[#allocation5 + $0x1610] ss:$8 sps:$4 sm:$0xff]  }
 0x305   :  { %5942 = vmatprep.subr.bf16.mxu1 %v8497_v6  ;;  %v8550_v5 = vld [vmem:[#allocation5 + $0x1710] ss:$8 sps:$4 sm:$0xff]   ;;  %v8555_v6 = vld [vmem:[#allocation5 + $0x1604] ss:$8 sps:$4 sm:$0xff]  }
 0x307   :  { %5902 = vmatpush2.bf16.msra.mxu0 %v8492_v56  ;;  %v8553_v56 = vld [vmem:[#allocation5 + $0x1600] ss:$8 sps:$4 sm:$0xff]  }
 0x308   :  { %5943 = vmatpush2.bf16.msra.mxu1 %v8495_v16  ;;  %5903 = vmatprep.subr.bf16.mxu0 %v8500_v8  ;;  %v8556_v16 = vld [vmem:[#allocation5 + $0x1700] ss:$8 sps:$4 sm:$0xff]   ;;  %v8561_v8 = vld [vmem:[#allocation5 + $0x16f4] ss:$8 sps:$4 sm:$0xff]  }
 0x309   :  { %5944 = vmatprep.subr.bf16.mxu1 %v8503_v9  ;;  %v8564_v9 = vld [vmem:[#allocation5 + $0x17f4] ss:$8 sps:$4 sm:$0xff]  }
 0x30b   :  { %5904 = vmatpush2.bf16.msra.mxu0 %v8498_v20  ;;  %v8562_v20 = vld [vmem:[#allocation5 + $0x17f0] ss:$8 sps:$4 sm:$0xff]  }
 0x30c   :  { %5945 = vmatpush2.bf16.msra.mxu1 %v8501_v11  ;;  %5905 = vmatprep.subr.bf16.mxu0 %v8506_v12  ;;  %v8567_v11 = vld [vmem:[#allocation5 + $0x16e4] ss:$8 sps:$4 sm:$0xff]  }
 0x30d   :  { %5946 = vmatprep.subr.bf16.mxu1 %v8509_v40  ;;  %v8570_v12 = vld [vmem:[#allocation5 + $0x17e4] ss:$8 sps:$4 sm:$0xff]   ;;  %v8565_v40 = vld [vmem:[#allocation5 + $0x16e0] ss:$8 sps:$4 sm:$0xff]  }
 0x30f   :  { %5906 = vmatpush2.bf16.msra.mxu0 %v8504_v13  ;;  %v8568_v13 = vld [vmem:[#allocation5 + $0x17e0] ss:$8 sps:$4 sm:$0xff]  }
 0x310   :  { %5947 = vmatpush2.bf16.msra.mxu1 %v8507_v17  ;;  %5957 = vmatprep.subr.bf16.mxu0 %v8513_v52  ;;  %v8573_v17 = vld [vmem:[#allocation5 + $0x16d4] ss:$8 sps:$4 sm:$0xff]  }
 0x311   :  { %5998 = vmatprep.subr.bf16.mxu1 %v8516_v25  ;;  %v8576_v52 = vld [vmem:[#allocation5 + $0x17d4] ss:$8 sps:$4 sm:$0xff]   ;;  %v8571_v25 = vld [vmem:[#allocation5 + $0x16d0] ss:$8 sps:$4 sm:$0xff]  }
 0x312   :  { %v5663_v32 = vpop.f32.mrf.mxu0  ;;  %5908 = vmatmul.mubr.bf16.vlgmr.msra.gmra.mxu0 %v427_v27  ;;  %v8582_v27 = vld [vmem:[#allocation5 + $0x17c4] ss:$8 sps:$4 sm:$0xff]  }
 0x313   :  { %v5704_v33 = vpop.f32.mrf.mxu1  ;;  %5949 = vmatmul.mubr.bf16.vlgmr.msra.gmra.mxu1 %v429_v49  ;;  %v5664_v34 = vadd.f32 %v5663_v32, %v9105_v10  ;;  %5958 = vmatpush1.bf16.msra.mxu0 %v8511_v55  ;;  %v8523_v10 = vld [vmem:[#allocation5 + $0x1650] ss:$8 sps:$4 sm:$0xff]   ;;  %v8577_v49 = vld [vmem:[#allocation5 + $0x16c0] ss:$8 sps:$4 sm:$0xff]   ;;  %v8594_v32 = vld [vmem:[#allocation5 + $0x17a4] ss:$8 sps:$4 sm:$0xff]  }
 0x314   :  { %5999 = vmatpush1.bf16.msra.mxu1 %v8514_v28  ;;  %v5665_v36 = vpop.f32.mrf.mxu0  ;;  %5959 = vmatprep.subr.bf16.mxu0 %v8519_v35  ;;  %v8580_v55 = vld [vmem:[#allocation5 + $0x17c0] ss:$8 sps:$4 sm:$0xff]   ;;  %v8585_v28 = vld [vmem:[#allocation5 + $0x16b4] ss:$8 sps:$4 sm:$0xff]  }
 0x315   :  { %v5706_v37 = vpop.f32.mrf.mxu1  ;;  %6000 = vmatprep.subr.bf16.mxu1 %v8522_v29  ;;  %v9125_v54 = vadd.f32 %v5704_v33, %v5664_v34  ;;  %v5666_v42 = vadd.f32 %v5665_v36, %v9108_v23  ;;  %5989 = vmatprep.mubr.bf16.mxu0 %v432_v30  ;;  %v8532_v23 = vld [vmem:[#allocation5 + $0x1740] ss:$8 sps:$4 sm:$0xff]   ;;  %v8588_v35 = vld [vmem:[#allocation5 + $0x17b4] ss:$8 sps:$4 sm:$0xff]   ;;  %v8583_v29 = vld [vmem:[#allocation5 + $0x16b0] ss:$8 sps:$4 sm:$0xff]  }
 0x316   :  { %6030 = vmatprep.mubr.bf16.mxu1 %v434_v31  ;;  %v5667_v44 = vpop.f32.mrf.mxu0  ;;  %v8586_v30 = vld [vmem:[#allocation5 + $0x17b0] ss:$8 sps:$4 sm:$0xff]   ;;  %v8591_v31 = vld [vmem:[#allocation5 + $0x16a4] ss:$8 sps:$4 sm:$0xff]   ;;  %v8589_v33 = vld [vmem:[#allocation5 + $0x16a0] ss:$8 sps:$4 sm:$0xff]  }
 0x317   :  { %v5708_v45 = vpop.f32.mrf.mxu1  ;;  %v9128_v46 = vadd.f32 %v5706_v37, %v5666_v42  ;;  %5960 = vmatpush1.bf16.msra.mxu0 %v8517_v22  ;;  %v8592_v34 = vld [vmem:[#allocation5 + $0x17a0] ss:$8 sps:$4 sm:$0xff]   ;;  %v8597_v22 = vld [vmem:[#allocation5 + $0x1694] ss:$8 sps:$4 sm:$0xff]   ;;  %v8595_v36 = vld [vmem:[#allocation5 + $0x1690] ss:$8 sps:$4 sm:$0xff]  }
 0x318   :  { %6001 = vmatpush1.bf16.msra.mxu1 %v8520_v50  ;;  %v5668_v47 = vpop.f32.mrf.mxu0  ;;  %5961 = vmatprep.subr.bf16.mxu0 %v8525_v38  ;;  %v8600_v50 = vld [vmem:[#allocation5 + $0x1794] ss:$8 sps:$4 sm:$0xff]   ;;  %v8598_v37 = vld [vmem:[#allocation5 + $0x1790] ss:$8 sps:$4 sm:$0xff]   ;;  %v8603_v38 = vld [vmem:[#allocation5 + $0x1684] ss:$8 sps:$4 sm:$0xff]   ;;  %v431_v45 = vpack.c.bf16 %v9111_v58, %v9111_v58 }
 0x319   :  { %v5709_v48 = vpop.f32.mrf.mxu1  ;;  %6002 = vmatprep.subr.bf16.mxu1 %v8528_v53  ;;  %v8606_v53 = vld [vmem:[#allocation5 + $0x1784] ss:$8 sps:$4 sm:$0xff]   ;;  %v8601_v42 = vld [vmem:[#allocation5 + $0x1680] ss:$8 sps:$4 sm:$0xff]  }
 0x31a   :  { %v8604_v44 = vld [vmem:[#allocation5 + $0x1780] ss:$8 sps:$4 sm:$0xff]  }
 0x31b   :  { %5962 = vmatpush1.bf16.msra.mxu0 %v8523_v10  ;;  %v433_v10 = vpack.c.bf16 %v9114_v41, %v9114_v41 }
 0x31c   :  { %6003 = vmatpush1.bf16.msra.mxu1 %v8526_v59  ;;  %5963 = vmatprep.subr.bf16.mxu0 %v8531_v51 }
 0x31d   :  { %6004 = vmatprep.subr.bf16.mxu1 %v8534_v14 }
 0x31f   :  { %5964 = vmatpush1.bf16.msra.mxu0 %v8529_v18 }
 0x320   :  { %6005 = vmatpush1.bf16.msra.mxu1 %v8532_v23  ;;  %5965 = vmatprep.subr.bf16.mxu0 %v8537_v60 }
 0x321   :  { %6006 = vmatprep.subr.bf16.mxu1 %v8540_v61 }
 0x323   :  { %5966 = vmatpush1.bf16.msra.mxu0 %v8535_v15 }
 0x324   :  { %6007 = vmatpush1.bf16.msra.mxu1 %v8538_v63  ;;  %5967 = vmatprep.subr.bf16.mxu0 %v8543_v21  ;;  %v8608_v63 = vld [vmem:[#allocation8 + $0xe0] ss:$16 sps:$4 sm:$0xff]   ;;  %v8610_v21 = vld [vmem:[#allocation8 + $0xe4] ss:$16 sps:$4 sm:$0xff]  }
 0x325   :  { %6008 = vmatprep.subr.bf16.mxu1 %v8546_v0  ;;  %v8611_v0 = vld [vmem:[#allocation8 + $0xe8] ss:$16 sps:$4 sm:$0xff]  }
 0x327   :  { %5968 = vmatpush1.bf16.msra.mxu0 %v8541_v24  ;;  %v8613_v24 = vld [vmem:[#allocation8 + $0xec] ss:$16 sps:$4 sm:$0xff]  }
 0x328   :  { %6009 = vmatpush1.bf16.msra.mxu1 %v8544_v1  ;;  %5969 = vmatprep.subr.bf16.mxu0 %v8549_v2  ;;  %v8616_v1 = vld [vmem:[#allocation8 + $0xc4] ss:$16 sps:$4 sm:$0xff]   ;;  %v8619_v2 = vld [vmem:[#allocation8 + $0xcc] ss:$16 sps:$4 sm:$0xff]  }
 0x329   :  { %6010 = vmatprep.subr.bf16.mxu1 %v8552_v3  ;;  %v8617_v3 = vld [vmem:[#allocation8 + $0xc8] ss:$16 sps:$4 sm:$0xff]  }
 0x32b   :  { %5970 = vmatpush1.bf16.msra.mxu0 %v8547_v4  ;;  %v8625_v4 = vld [vmem:[#allocation8 + $0xac] ss:$16 sps:$4 sm:$0xff]  }
 0x32c   :  { %6011 = vmatpush1.bf16.msra.mxu1 %v8550_v5  ;;  %5971 = vmatprep.subr.bf16.mxu0 %v8555_v6  ;;  %v8620_v5 = vld [vmem:[#allocation8 + $0xa0] ss:$16 sps:$4 sm:$0xff]   ;;  %v8623_v6 = vld [vmem:[#allocation8 + $0xa8] ss:$16 sps:$4 sm:$0xff]  }
 0x32d   :  { %6012 = vmatprep.subr.bf16.mxu1 %v8558_v7  ;;  %v8628_v7 = vld [vmem:[#allocation8 + $0x84] ss:$16 sps:$4 sm:$0xff]  }
 0x32f   :  { %5972 = vmatpush1.bf16.msra.mxu0 %v8553_v56  ;;  %v8631_v56 = vld [vmem:[#allocation8 + $0x8c] ss:$16 sps:$4 sm:$0xff]  }
 0x330   :  { %6013 = vmatpush1.bf16.msra.mxu1 %v8556_v16  ;;  %5973 = vmatprep.subr.bf16.mxu0 %v8561_v8  ;;  %v8626_v16 = vld [vmem:[#allocation8 + $0x80] ss:$16 sps:$4 sm:$0xff]   ;;  %v8629_v8 = vld [vmem:[#allocation8 + $0x88] ss:$16 sps:$4 sm:$0xff]  }
 0x331   :  { %6014 = vmatprep.subr.bf16.mxu1 %v8564_v9  ;;  %v8634_v9 = vld [vmem:[#allocation8 + $0x64] ss:$16 sps:$4 sm:$0xff]  }
 0x333   :  { %5974 = vmatpush2.bf16.msra.mxu0 %v8559_v19  ;;  %v8637_v19 = vld [vmem:[#allocation8 + $0x6c] ss:$16 sps:$4 sm:$0xff]  }
 0x334   :  { %6015 = vmatpush2.bf16.msra.mxu1 %v8562_v20  ;;  %5975 = vmatprep.subr.bf16.mxu0 %v8567_v11  ;;  %v8632_v20 = vld [vmem:[#allocation8 + $0x60] ss:$16 sps:$4 sm:$0xff]   ;;  %v8635_v11 = vld [vmem:[#allocation8 + $0x68] ss:$16 sps:$4 sm:$0xff]  }
 0x335   :  { %6016 = vmatprep.subr.bf16.mxu1 %v8570_v12  ;;  %v8640_v12 = vld [vmem:[#allocation8 + $0x44] ss:$16 sps:$4 sm:$0xff]  }
 0x337   :  { %5976 = vmatpush2.bf16.msra.mxu0 %v8565_v40  ;;  %v8643_v40 = vld [vmem:[#allocation8 + $0x4c] ss:$16 sps:$4 sm:$0xff]  }
 0x338   :  { %6017 = vmatpush2.bf16.msra.mxu1 %v8568_v13  ;;  %5977 = vmatprep.subr.bf16.mxu0 %v8573_v17  ;;  %v8638_v13 = vld [vmem:[#allocation8 + $0x40] ss:$16 sps:$4 sm:$0xff]   ;;  %v8641_v17 = vld [vmem:[#allocation8 + $0x48] ss:$16 sps:$4 sm:$0xff]  }
 0x339   :  { %6018 = vmatprep.subr.bf16.mxu1 %v8576_v52  ;;  %v8646_v52 = vld [vmem:[#allocation8 + $0x24] ss:$16 sps:$4 sm:$0xff]  }
 0x33b   :  { %5978 = vmatpush2.bf16.msra.mxu0 %v8571_v25  ;;  %v8649_v25 = vld [vmem:[#allocation8 + $0x2c] ss:$16 sps:$4 sm:$0xff]  }
 0x33c   :  { %6019 = vmatpush2.bf16.msra.mxu1 %v8574_v26  ;;  %5979 = vmatprep.subr.bf16.mxu0 %v8579_v57  ;;  %v8644_v26 = vld [vmem:[#allocation8 + $0x20] ss:$16 sps:$4 sm:$0xff]   ;;  %v8647_v57 = vld [vmem:[#allocation8 + $0x28] ss:$16 sps:$4 sm:$0xff]  }
 0x33d   :  { %6020 = vmatprep.subr.bf16.mxu1 %v8582_v27  ;;  %v8652_v27 = vld [vmem:[#allocation8 + $0x4] ss:$16 sps:$4 sm:$0xff]  }
 0x33f   :  { %5980 = vmatpush2.bf16.msra.mxu0 %v8577_v49  ;;  %v8655_v49 = vld [vmem:[#allocation8 + $0xc] ss:$16 sps:$4 sm:$0xff]  }
 0x340   :  { %6021 = vmatpush2.bf16.msra.mxu1 %v8580_v55  ;;  %5981 = vmatprep.subr.bf16.mxu0 %v8585_v28  ;;  %v8650_v55 = vld [vmem:[#allocation8] ss:$16 sps:$4 sm:$0xff]   ;;  %v8653_v28 = vld [vmem:[#allocation8 + $0x8] ss:$16 sps:$4 sm:$0xff]  }
 0x341   :  { %6022 = vmatprep.subr.bf16.mxu1 %v8588_v35  ;;  %v8658_v35 = vld [vmem:[#allocation8 + $0x1e4] ss:$16 sps:$4 sm:$0xff]  }
 0x343   :  { %5982 = vmatpush2.bf16.msra.mxu0 %v8583_v29  ;;  %v8661_v29 = vld [vmem:[#allocation8 + $0x1ec] ss:$16 sps:$4 sm:$0xff]  }
 0x344   :  { %6023 = vmatpush2.bf16.msra.mxu1 %v8586_v30  ;;  %5983 = vmatprep.subr.bf16.mxu0 %v8591_v31  ;;  %v8656_v30 = vld [vmem:[#allocation8 + $0x1e0] ss:$16 sps:$4 sm:$0xff]   ;;  %v8659_v31 = vld [vmem:[#allocation8 + $0x1e8] ss:$16 sps:$4 sm:$0xff]  }
 0x345   :  { %6024 = vmatprep.subr.bf16.mxu1 %v8594_v32  ;;  %v8664_v32 = vld [vmem:[#allocation8 + $0x1c4] ss:$16 sps:$4 sm:$0xff]  }
 0x347   :  { %5984 = vmatpush2.bf16.msra.mxu0 %v8589_v33  ;;  %v8667_v33 = vld [vmem:[#allocation8 + $0x1cc] ss:$16 sps:$4 sm:$0xff]  }
 0x348   :  { %6025 = vmatpush2.bf16.msra.mxu1 %v8592_v34  ;;  %5985 = vmatprep.subr.bf16.mxu0 %v8597_v22  ;;  %v8662_v34 = vld [vmem:[#allocation8 + $0x1c0] ss:$16 sps:$4 sm:$0xff]   ;;  %v8665_v22 = vld [vmem:[#allocation8 + $0x1c8] ss:$16 sps:$4 sm:$0xff]  }
 0x349   :  { %6026 = vmatprep.subr.bf16.mxu1 %v8600_v50  ;;  %v8670_v50 = vld [vmem:[#allocation8 + $0x1a4] ss:$16 sps:$4 sm:$0xff]  }
 0x34b   :  { %5986 = vmatpush2.bf16.msra.mxu0 %v8595_v36  ;;  %v8673_v36 = vld [vmem:[#allocation8 + $0x1ac] ss:$16 sps:$4 sm:$0xff]  }
 0x34c   :  { %6027 = vmatpush2.bf16.msra.mxu1 %v8598_v37  ;;  %5987 = vmatprep.subr.bf16.mxu0 %v8603_v38  ;;  %v8668_v37 = vld [vmem:[#allocation8 + $0x1a0] ss:$16 sps:$4 sm:$0xff]   ;;  %v8671_v38 = vld [vmem:[#allocation8 + $0x1a8] ss:$16 sps:$4 sm:$0xff]  }
 0x34d   :  { %6028 = vmatprep.subr.bf16.mxu1 %v8606_v53  ;;  %v8676_v53 = vld [vmem:[#allocation8 + $0x184] ss:$16 sps:$4 sm:$0xff]  }
 0x34f   :  { %5988 = vmatpush2.bf16.msra.mxu0 %v8601_v42  ;;  %v8679_v42 = vld [vmem:[#allocation8 + $0x18c] ss:$16 sps:$4 sm:$0xff]  }
 0x350   :  { %6029 = vmatpush2.bf16.msra.mxu1 %v8604_v44  ;;  %6449 = vmatprep.subr.bf16.mxu0 %v8610_v21  ;;  %v8674_v44 = vld [vmem:[#allocation8 + $0x180] ss:$16 sps:$4 sm:$0xff]  }
 0x351   :  { %6490 = vmatprep.subr.bf16.mxu1 %v8613_v24  ;;  %v8697_v24 = vld [vmem:[#allocation8 + $0x12c] ss:$16 sps:$4 sm:$0xff]  }
 0x352   :  { %v5745_v59 = vpop.f32.mrf.mxu0  ;;  %5990 = vmatmul.mubr.bf16.vlgmr.msra.gmra.mxu0 %v431_v45  ;;  %v8677_v45 = vld [vmem:[#allocation8 + $0x188] ss:$16 sps:$4 sm:$0xff]  }
 0x353   :  { %v5786_v47 = vpop.f32.mrf.mxu1  ;;  %6031 = vmatmul.mubr.bf16.vlgmr.msra.gmra.mxu1 %v433_v10  ;;  %v5746_v48 = vadd.f32 %v5745_v59, %v9125_v54  ;;  %6450 = vmatpush1.bf16.msra.mxu0 %v8608_v63  ;;  %v8614_v54 = vld [vmem:[#allocation8 + $0xc0] ss:$16 sps:$4 sm:$0xff]   ;;  %v8682_v10 = vld [vmem:[#allocation8 + $0x164] ss:$16 sps:$4 sm:$0xff]   ;;  %v8685_v59 = vld [vmem:[#allocation8 + $0x16c] ss:$16 sps:$4 sm:$0xff]  }
 0x354   :  { %v5747_v51 = vpop.f32.mrf.mxu0  ;;  %6491 = vmatpush1.bf16.msra.mxu1 %v8611_v0  ;;  %6451 = vmatprep.subr.bf16.mxu0 %v8616_v1  ;;  %v8694_v0 = vld [vmem:[#allocation8 + $0x124] ss:$16 sps:$4 sm:$0xff]  }
 0x355   :  { %v5788_v14 = vpop.f32.mrf.mxu1  ;;  %v9135_v18 = vadd.f32 %v5786_v47, %v5746_v48  ;;  %v5748_v23 = vadd.f32 %v5747_v51, %v9128_v46  ;;  %v8622_v46 = vld [vmem:[#allocation8 + $0xa4] ss:$16 sps:$4 sm:$0xff]   ;;  %6492 = vmatprep.subr.bf16.mxu1 %v8619_v2  ;;  %v8680_v47 = vld [vmem:[#allocation8 + $0x160] ss:$16 sps:$4 sm:$0xff]   ;;  %v8683_v48 = vld [vmem:[#allocation8 + $0x168] ss:$16 sps:$4 sm:$0xff]  }
 0x356   :  { %v5749_v60 = vpop.f32.mrf.mxu0  ;;  %v8688_v51 = vld [vmem:[#allocation8 + $0x144] ss:$16 sps:$4 sm:$0xff]  }
 0x357   :  { %v5790_v61 = vpop.f32.mrf.mxu1  ;;  %v9138_v58 = vadd.f32 %v5788_v14, %v5748_v23  ;;  %6452 = vmatpush1.bf16.msra.mxu0 %v8614_v54  ;;  %v8691_v14 = vld [vmem:[#allocation8 + $0x14c] ss:$16 sps:$4 sm:$0xff]   ;;  %v8686_v23 = vld [vmem:[#allocation8 + $0x140] ss:$16 sps:$4 sm:$0xff]   ;;  %v8689_v60 = vld [vmem:[#allocation8 + $0x148] ss:$16 sps:$4 sm:$0xff]  }
 0x358   :  { %v5750_v15 = vpop.f32.mrf.mxu0  ;;  %6493 = vmatpush1.bf16.msra.mxu1 %v8617_v3  ;;  %6453 = vmatprep.subr.bf16.mxu0 %v8622_v46  ;;  %v8692_v54 = vld [vmem:[#allocation8 + $0x120] ss:$16 sps:$4 sm:$0xff]   ;;  %v8695_v3 = vld [vmem:[#allocation8 + $0x128] ss:$16 sps:$4 sm:$0xff]  }
 0x359   :  { %v5791_v41 = vpop.f32.mrf.mxu1  ;;  %6494 = vmatprep.subr.bf16.mxu1 %v8625_v4 }
 0x35b   :  { %6454 = vmatpush1.bf16.msra.mxu0 %v8620_v5 }
 0x35c   :  { %6495 = vmatpush1.bf16.msra.mxu1 %v8623_v6  ;;  %6455 = vmatprep.subr.bf16.mxu0 %v8628_v7  ;;  %v8700_v7 = vld [vmem:[#allocation8 + $0x104] ss:$16 sps:$4 sm:$0xff]  }
 0x35d   :  { %6496 = vmatprep.subr.bf16.mxu1 %v8631_v56  ;;  %v8703_v56 = vld [vmem:[#allocation8 + $0x10c] ss:$16 sps:$4 sm:$0xff]  }
 0x35f   :  { %6456 = vmatpush1.bf16.msra.mxu0 %v8626_v16  ;;  %v8698_v16 = vld [vmem:[#allocation8 + $0x100] ss:$16 sps:$4 sm:$0xff]  }
 0x360   :  { %6497 = vmatpush1.bf16.msra.mxu1 %v8629_v8  ;;  %6457 = vmatprep.subr.bf16.mxu0 %v8634_v9  ;;  %v8701_v8 = vld [vmem:[#allocation8 + $0x108] ss:$16 sps:$4 sm:$0xff]  }
 0x361   :  { %6498 = vmatprep.subr.bf16.mxu1 %v8637_v19 }
 0x363   :  { %6458 = vmatpush1.bf16.msra.mxu0 %v8632_v20 }
 0x364   :  { %6499 = vmatpush1.bf16.msra.mxu1 %v8635_v11  ;;  %6459 = vmatprep.subr.bf16.mxu0 %v8640_v12 }
 0x365   :  { %6500 = vmatprep.subr.bf16.mxu1 %v8643_v40 }
 0x367   :  { %6460 = vmatpush1.bf16.msra.mxu0 %v8638_v13 }
 0x368   :  { %6501 = vmatpush1.bf16.msra.mxu1 %v8641_v17  ;;  %6461 = vmatprep.subr.bf16.mxu0 %v8646_v52 }
 0x369   :  { %6502 = vmatprep.subr.bf16.mxu1 %v8649_v25 }
 0x36b   :  { %6462 = vmatpush1.bf16.msra.mxu0 %v8644_v26 }
 0x36c   :  { %6503 = vmatpush1.bf16.msra.mxu1 %v8647_v57  ;;  %6463 = vmatprep.subr.bf16.mxu0 %v8652_v27 }
 0x36d   :  { %6504 = vmatprep.subr.bf16.mxu1 %v8655_v49 }
 0x36f   :  { %6464 = vmatpush1.bf16.msra.mxu0 %v8650_v55 }
 0x370   :  { %6505 = vmatpush1.bf16.msra.mxu1 %v8653_v28  ;;  %6465 = vmatprep.subr.bf16.mxu0 %v8658_v35 }
 0x371   :  { %6506 = vmatprep.subr.bf16.mxu1 %v8661_v29 }
 0x373   :  { %6466 = vmatpush2.bf16.msra.mxu0 %v8656_v30 }
 0x374   :  { %6507 = vmatpush2.bf16.msra.mxu1 %v8659_v31  ;;  %6467 = vmatprep.subr.bf16.mxu0 %v8664_v32 }
 0x375   :  { %6508 = vmatprep.subr.bf16.mxu1 %v8667_v33 }
 0x377   :  { %6468 = vmatpush2.bf16.msra.mxu0 %v8662_v34 }
 0x378   :  { %6509 = vmatpush2.bf16.msra.mxu1 %v8665_v22  ;;  %6469 = vmatprep.subr.bf16.mxu0 %v8670_v50 }
 0x379   :  { %6510 = vmatprep.subr.bf16.mxu1 %v8673_v36 }
 0x37b   :  { %6470 = vmatpush2.bf16.msra.mxu0 %v8668_v37 }
 0x37c   :  { %6511 = vmatpush2.bf16.msra.mxu1 %v8671_v38  ;;  %6471 = vmatprep.subr.bf16.mxu0 %v8676_v53  ;;  %v6119_v38 = vsub.s32 2, %v8919_v43  ;;  %v6107_v53 = vld [vmem:[#allocation10] sm:$0xf] }
 0x37d   :  { %6512 = vmatprep.subr.bf16.mxu1 %v8679_v42  ;;  %v6123_v42 = vsub.s32 3, %v8919_v43 }
 0x37f   :  { %6472 = vmatpush2.bf16.msra.mxu0 %v8674_v44  ;;  %v6112_v44 = vrot.slane %v6107_v53, %v8971_v39 }
 0x380   :  { %6513 = vmatpush2.bf16.msra.mxu1 %v8677_v45  ;;  %6473 = vmatprep.subr.bf16.mxu0 %v8682_v10  ;;  %v6120_v45 = vrot.slane %v6107_v53, %v6119_v38  ;;  %v6535_v10 = vld [vmem:[#allocation11] sm:$0xf] }
 0x381   :  { %6514 = vmatprep.subr.bf16.mxu1 %v8685_v59  ;;  %v6116_v59 = vrot.slane %v6107_v53, %v8974_v62 }
 0x383   :  { %6474 = vmatpush2.bf16.msra.mxu0 %v8680_v47  ;;  %v6124_v47 = vrot.slane %v6107_v53, %v6123_v42 }
 0x384   :  { %6515 = vmatpush2.bf16.msra.mxu1 %v8683_v48  ;;  %6475 = vmatprep.subr.bf16.mxu0 %v8688_v51 }
 0x385   :  { %6516 = vmatprep.subr.bf16.mxu1 %v8691_v14 }
 0x387   :  { %6476 = vmatpush2.bf16.msra.mxu0 %v8686_v23  ;;  %v6540_v23 = vrot.slane %v6535_v10, %v8971_v39 }
 0x388   :  { %6517 = vmatpush2.bf16.msra.mxu1 %v8689_v60  ;;  %6477 = vmatprep.subr.bf16.mxu0 %v8694_v0 }
 0x389   :  { %6518 = vmatprep.subr.bf16.mxu1 %v8697_v24 }
 0x38b   :  { %6478 = vmatpush2.bf16.msra.mxu0 %v8692_v54 }
 0x38c   :  { %6519 = vmatpush2.bf16.msra.mxu1 %v8695_v3  ;;  %6479 = vmatprep.subr.bf16.mxu0 %v8700_v7 }
 0x38d   :  { %6520 = vmatprep.subr.bf16.mxu1 %v8703_v56 }
 0x38f   :  { %6480 = vmatpush2.bf16.msra.mxu0 %v8698_v16 }
 0x390   :  { %6521 = vmatpush2.bf16.msra.mxu1 %v8701_v8 }
 0x392   :  { %v5827_v61 = vpop.f32.mrf.mxu0 }
 0x393   :  { %v5868_v15 = vpop.f32.mrf.mxu1  ;;  %v5828_v41 = vadd.f32 %v5827_v61, %v9135_v18  ;;  %v6548_v61 = vrot.slane %v6535_v10, %v6119_v38 }
 0x394   :  { %v5829_v63 = vpop.f32.mrf.mxu0 }
 0x395   :  { %v5870_v21 = vpop.f32.mrf.mxu1  ;;  %v5869_v1 = vadd.f32 %v5868_v15, %v5828_v41  ;;  %v5830_v2 = vadd.f32 %v5829_v63, %v9138_v58  ;;  %v6544_v41 = vrot.slane %v6535_v10, %v8974_v62 }
 0x396   :  { %v5831_v46 = vpop.f32.mrf.mxu0 }
 0x397   :  { %v5872_v4 = vpop.f32.mrf.mxu1  ;;  %v5871_v5 = vadd.f32 %v5870_v21, %v5830_v2 }
 0x398   :  { %v5832_v6 = vpop.f32.mrf.mxu0  ;;  %v6552_v4 = vrot.slane %v6535_v10, %v6123_v42 }
 0x399   :  { %v5873_v18 = vpop.f32.mrf.mxu1 }
 0x3d2   :  { %v5909_v58 = vpop.f32.mrf.mxu0 }
 0x3d3   :  { %v5950_v9 = vpop.f32.mrf.mxu1  ;;  %v5910_v19 = vadd.f32 %v5909_v58, %v5869_v1 }
 0x3d4   :  { %v5911_v20 = vpop.f32.mrf.mxu0 }
 0x3d5   :  { %v5952_v11 = vpop.f32.mrf.mxu1  ;;  %v5951_v12 = vadd.f32 %v5950_v9, %v5910_v19  ;;  %v5912_v25 = vadd.f32 %v5911_v20, %v5871_v5  ;;  %v6572_v20 = vstv %s6571_s4 }
 0x3d6   :  { %v5913_v40 = vpop.f32.mrf.mxu0 }
 0x3d7   :  { %v5954_v13 = vpop.f32.mrf.mxu1  ;;  %v5953_v27 = vadd.f32 %v5952_v11, %v5912_v25  ;;  %v6576_v40 = vstv %s7430_s5 }
 0x3d8   :  { %v5914_v17 = vpop.f32.mrf.mxu0 }
 0x3d9   :  { %v5955_v52 = vpop.f32.mrf.mxu1  ;;  %v6579_v17 = vstv %s7431_s6 }
 0x412   :  { %v5991_v26 = vpop.f32.mrf.mxu0 }
 0x413   :  { %v6032_v57 = vpop.f32.mrf.mxu1  ;;  %v5992_v49 = vadd.f32 %v5991_v26, %v5951_v12 }
 0x414   :  { %v5993_v55 = vpop.f32.mrf.mxu0 }
 0x415   :  { %v6034_v28 = vpop.f32.mrf.mxu1  ;;  %v6033_v35 = vadd.f32 %v6032_v57, %v5992_v49  ;;  %v5994_v29 = vadd.f32 %v5993_v55, %v5953_v27 }
 0x416   :  { %v5995_v30 = vpop.f32.mrf.mxu0 }
 0x417   :  { %v6036_v31 = vpop.f32.mrf.mxu1  ;;  %v6035_v32 = vadd.f32 %v6034_v28, %v5994_v29  ;;  %v6039_v33 = vmax.f32 %v6033_v35, 0.0 }
 0x418   :  { %v5996_v34 = vpop.f32.mrf.mxu0 }
 0x419   :  { %v6037_v22 = vpop.f32.mrf.mxu1  ;;  %v6040_v50 = vmax.f32 %v6035_v32, 0.0  ;;  %v6041_v37 = vpack.c.bf16 %v6039_v33, %v6039_v33 }
 0x41b   :  { %v6042_v36 = vpack.c.bf16 %v6040_v50, %v6040_v50 }
 0x41d   :  { %6481 = vmatprep.mubr.bf16.mxu0 %v6042_v36  ;;  %6522 = vmatprep.mubr.bf16.mxu1 %v6042_v36 }
 0x41e   :  { %6482 = vmatmul.mubr.bf16.vlgmr.msra.gmra.mxu0 %v6041_v37  ;;  %6523 = vmatmul.mubr.bf16.vlgmr.msra.gmra.mxu1 %v6041_v37 }
 0x4de   :  { %v6483_v48 = vpop.f32.mrf.mxu0  ;;  %v6524_v51 = vpop.f32.mrf.mxu1 }
 0x4df   :  { %v6484_v14 = vadd.f32 %v6483_v48, %v6112_v44  ;;  %v6525_v60 = vadd.f32 %v6524_v51, %v6120_v45 }
 0x4e0   :  { %v6485_v15 = vpop.f32.mrf.mxu0  ;;  %v6526_v63 = vpop.f32.mrf.mxu1 }
 0x4e1   :  { %v6531_v21 = vmax.f32 %v6484_v14, 0.0  ;;  %v6533_v43 = vmax.f32 %v6525_v60, 0.0  ;;  %v6486_v0 = vadd.f32 %v6485_v15, %v6116_v59  ;;  %v6527_v24 = vadd.f32 %v6526_v63, %v6124_v47 }
 0x4e2   :  { %v6487_v1 = vpop.f32.mrf.mxu0  ;;  %v6528_v2 = vpop.f32.mrf.mxu1 }
 0x4e3   :  { %v6557_v54 = vmul.f32 %v6540_v23, %v6531_v21  ;;  %v6532_v3 = vmax.f32 %v6486_v0, 0.0  ;;  %v6534_v46 = vmax.f32 %v6527_v24, 0.0  ;;  %v6559_v39 = vmul.f32 %v6548_v61, %v6533_v43 }
 0x4e4   :  { %v6488_v5 = vpop.f32.mrf.mxu0  ;;  %v6529_v6 = vpop.f32.mrf.mxu1 }
 0x4e5   :  { %v6558_v18 = vmul.f32 %v6544_v41, %v6532_v3  ;;  %v6560_v7 = vmul.f32 %v6552_v4, %v6534_v46  ;;  %v6562_v56 = vsel %vm6561_vm0, %v6557_v54, 0.0  ;;  %v6565_v8 = vsel %vm6561_vm0, %v6559_v39, 0.0 }
 0x4e7   :  { %v6563_v16 = vsel %vm6561_vm0, %v6558_v18, 0.0  ;;  %v6567_v9 = vsel %vm6561_vm0, %v6560_v7, 0.0 }
 0x4e8   :  { %v6564_v62 = vadd.f32 %v6563_v16, %v6562_v56 }
 0x4ea   :  { %v6566_v58 = vadd.f32 %v6565_v8, %v6564_v62 }
 0x4ec   :  { %v6568_v19 = vadd.f32 %v6567_v9, %v6566_v58 }
 0x4ee   :  { %6569 = vadd.xlane.f32.xlu0 %v6568_v19 }
 0x577   :  { %v6570_v11 = vpop.xlane.xlu0 %6569 }
 0x578   :  { %v6573_v12 = vadd.f32 %v6572_v20, %v6570_v11 }
 0x57a   :  { %v6574_v13 = vmax.f32 %v6573_v12, 0.0 }
 0x57c   :  { %v6577_v52 = vmul.f32 %v6576_v40, %v6574_v13 }
 0x57e   :  { %v6580_v25 = vadd.f32 %v6579_v17, %v6577_v52 }
 0x580   :  { %v6581_v26 = vsub.f32 0.0, %v6580_v25 }
 0x582   :  { %v6582_v57 = vmul.f32 1.442695, %v6581_v26 }
 0x584   :  { %8704 = vpow2.f32 %v6582_v57 }
 0x591   :  { %v8705_v27 = vpop.eup %8704 }
 0x592   :  { %v6584_v49 = vadd.f32 1.0, %v8705_v27 }
 0x594   :  { %8706 = vrcp.f32 %v6584_v49 }
 0x5a1   :  { %v8707_v55 = vpop.eup %8706 }
 0x5a2   :  { %6588 = vst.msk [vmem:[%s9158_s7] sm:$0x3] %vm6587_vm1, %v8707_v55 }
 0x5a3   :  { %6593 = vsyncpa [#allocation3], 1 }
 0x5a4   :  { %6594 = vsyncpa [#allocation6], 1 }
 0x5a5   :  { %6595 = vsyncpa [#allocation9], 1 }
 0x5a6   :  { %6596 = vsyncpa [#allocation12], 1 }
 0x5a7   :  { %6597 = vsyncpa [#allocation4], 1 }

</bundles_post_ra>
